<compile_context>
chip_gen: v5e
topology: v5e:2x2
jax: 0.10.0
libtpu: 0.0.40
codegen_flags: <defaults>
</compile_context>

<pallas_src>
import functools

import jax
import jax.numpy as jnp
from jax import lax
from jax.experimental import pallas as pl
from jax.experimental.pallas import tpu as pltpu


def _round_up(x, m):
    return (x + m - 1) // m * m


def _lstm_kernel(len_ref, xg_ref, whh_ref, out_ref, hn_ref, cn_ref, *, t_block):
    """One grid step == one (batch tile, block of `t_block` LSTM time steps).

    len_ref : [Bt, 1]             int32  per-sequence lengths (this batch tile)
    xg_ref  : [t_block, Bt, 4Hp]  bf16   x @ W_ih^T + bias (gate-major, padded)
    whh_ref : [Hp, 4Hp]           bf16   hidden->gates weight (gate-major, padded)
    out_ref : [t_block, Bt, Hp]   f32    LSTM outputs for this time block
    hn_ref  : [Bt, Hp]            f32    resident output == running hidden carry
    cn_ref  : [Bt, Hp]            f32    resident output == running cell carry
    """
    t_blk = pl.program_id(1)

    @pl.when(t_blk == 0)
    def _():
        hn_ref[...] = jnp.zeros_like(hn_ref)
        cn_ref[...] = jnp.zeros_like(cn_ref)

    lens = len_ref[...]                       # [Bt, 1] int32
    hp = hn_ref.shape[-1]                     # padded hidden size (x128)

    def step(i, carry):
        h_prev, c_prev = carry                # [Bt, Hp] f32
        t = t_blk * t_block + i
        # Serial path: only the recurrent projection; the input projection
        # (+ bias) was hoisted outside and is streamed here in bf16.
        gates = xg_ref[i].astype(jnp.float32) + jnp.dot(
            h_prev.astype(jnp.bfloat16), whh_ref[...],
            preferred_element_type=jnp.float32)              # [Bt, 4Hp] f32

        # PyTorch gate order i, f, g, o; each slab is a lane-aligned Hp window.
        i_g = jax.nn.sigmoid(gates[:, 0 * hp:1 * hp])
        f_g = jax.nn.sigmoid(gates[:, 1 * hp:2 * hp])
        g_g = jnp.tanh(gates[:, 2 * hp:3 * hp])
        o_g = jax.nn.sigmoid(gates[:, 3 * hp:4 * hp])
        # TODO(synk): a bf16 EUP path for the activations (v6e/v7x, ~2x
        # transcendental throughput) is possible; kept f32 for accuracy parity.

        c_new = f_g * c_prev + i_g * g_g
        h_new = o_g * jnp.tanh(c_new)

        # pack_padded_sequence semantics: past a sequence's length the state
        # freezes (so h_n/c_n = state at t = len-1) and padded outputs are 0.
        # Materialize the mask broadcast ONCE and reuse it in all selects.
        valid = jnp.broadcast_to(t < lens, h_new.shape)      # [Bt, Hp] bool
        h_upd = jnp.where(valid, h_new, h_prev)
        c_upd = jnp.where(valid, c_new, c_prev)
        out_ref[i] = jnp.where(valid, h_new, jnp.zeros_like(h_new))
        return h_upd, c_upd

    h_fin, c_fin = lax.fori_loop(0, t_block, step, (hn_ref[...], cn_ref[...]),
                                 unroll=True)
    hn_ref[...] = h_fin
    cn_ref[...] = c_fin


def _budget_t_block(t_block, T, b_tile, hp, vmem_budget_bytes):
    """Cap t_block so the (double-buffered) streamed tiles fit the VMEM budget.

    Returns (t_block, estimated_vmem_bytes). The estimate includes the 2x
    pipeline copies of the constant-block-index inputs (W_hh, lens) since we
    do not reduce their buffer count.
    """
    fixed = 2 * hp * (4 * hp) * 2                  # W_hh bf16 double buffer
    fixed += 2 * 2 * b_tile * hp * 4               # hn + cn f32 residents
    fixed += 2 * _round_up(b_tile, 8) * 128 * 4    # lens (padded to a vreg tile)
    per_t = 2 * b_tile * (4 * hp) * 2              # xg bf16 double buffer
    per_t += 2 * b_tile * hp * 4                   # out f32 double buffer
    tb = max(1, min(t_block, T, (vmem_budget_bytes - fixed) // per_t))
    return int(tb), int(fixed + tb * per_t)


@functools.partial(jax.jit, static_argnames=("t_block", "b_tile"))
def encoder_forward(src, src_len, params, *, t_block=16, b_tile=None):
    """src: [T, B] int32 token ids, src_len: [B] lengths.

    Returns (outputs [T, B, H], (h_n [1, B, H], c_n [1, B, H])) matching the
    PyTorch Encoder.forward (dropout as identity / eval mode).
    """
    emb_table = params["embedding"]
    w_ih, w_hh = params["w_ih"], params["w_hh"]          # [4H, E], [4H, H]
    b_ih, b_hh = params["b_ih"], params["b_hh"]          # [4H], [4H]

    T, B = src.shape
    E = emb_table.shape[1]
    H = w_hh.shape[1]
    Hp = max(128, _round_up(H, 128))                     # lane-dense hidden pad

    # Batch tiling: leading "parallel" grid axis lets v7x's two TensorCores
    # split the batch. Only split when each tile stays sublane-aligned (x8);
    # at small B this degenerates to a single tile (harmless on v5e/v6e).
    if b_tile is None:
        b_tile = B // 2 if (B >= 16 and B % 16 == 0) else B
    assert B % b_tile == 0
    n_btile = B // b_tile

    # Budget t_block against 48 MiB so double-buffering survives v7x's 64 MiB
    # VMEM; v5e/v6e (128 MiB) simply get the same (already generous) blocks.
    t_block, vmem_needed = _budget_t_block(t_block, T, b_tile, Hp,
                                           48 * 1024 * 1024)
    Tp = _round_up(T, t_block)
    n_blk = Tp // t_block
    vmem_limit = int(min(max(2 * vmem_needed + (8 << 20), 32 << 20), 100 << 20))

    # ---- Embedding lookup (+ dropout identity / eval mode) -- plain XLA glue.
    # TODO(synk): training-mode dropout would need a PRNG mask on `embedded`.
    embedded = jnp.take(emb_table, src, axis=0)          # [T, B, E] f32

    # ---- Hoisted input projection, emitted DIRECTLY into the padded,
    # gate-major layout by padding W_ih / bias first (gate k occupies columns
    # [k*Hp, (k+1)*Hp)), so no extra pad pass over the big [Tp,B,4Hp] tensor.
    wih_gm = w_ih.T.reshape(E, 4, H)                                    # [E,4,H]
    wih_pad = jnp.zeros((E, 4, Hp), jnp.float32).at[:, :, :H].set(wih_gm)
    wih_pad = wih_pad.reshape(E, 4 * Hp).astype(jnp.bfloat16)
    bias_gm = (b_ih + b_hh).astype(jnp.float32).reshape(4, H)
    bias_pad = jnp.zeros((4, Hp), jnp.float32).at[:, :H].set(bias_gm)
    bias_pad = bias_pad.reshape(4 * Hp)

    xg = jnp.dot(embedded.reshape(T * B, E).astype(jnp.bfloat16), wih_pad,
                 preferred_element_type=jnp.float32) + bias_pad         # [T*B,4Hp]
    xg = xg.reshape(T, B, 4 * Hp)
    if Tp > T:
        xg = jnp.pad(xg, ((0, Tp - T), (0, 0), (0, 0)))
    # Stream the dominant input in bf16 (half the HBM->VMEM DMA + half the
    # double-buffer). Padded lanes are exactly 0 in bf16 too -> no leakage.
    xg = xg.astype(jnp.bfloat16)

    whh_gm = w_hh.T.reshape(H, 4, H)                                    # [H,4,H]
    whh_pad = jnp.zeros((Hp, 4, Hp), jnp.float32).at[:H, :, :H].set(whh_gm)
    whh_pad = whh_pad.reshape(Hp, 4 * Hp).astype(jnp.bfloat16)

    lens = src_len.astype(jnp.int32).reshape(B, 1)                      # [B, 1]

    kernel = functools.partial(_lstm_kernel, t_block=t_block)

    grid_spec = pltpu.PrefetchScalarGridSpec(
        num_scalar_prefetch=0,
        grid=(n_btile, n_blk),
        in_specs=[
            pl.BlockSpec((b_tile, 1), lambda bt, tb: (bt, 0)),              # lens
            pl.BlockSpec((t_block, b_tile, 4 * Hp),
                         lambda bt, tb: (tb, bt, 0)),                       # xg (bf16)
            pl.BlockSpec((Hp, 4 * Hp), lambda bt, tb: (0, 0)),              # W_hh^T
        ],
        out_specs=[
            pl.BlockSpec((t_block, b_tile, Hp), lambda bt, tb: (tb, bt, 0)),  # outputs
            pl.BlockSpec((b_tile, Hp), lambda bt, tb: (bt, 0)),               # h_n carry
            pl.BlockSpec((b_tile, Hp), lambda bt, tb: (bt, 0)),               # c_n carry
        ],
    )

    out_pad, hn_pad, cn_pad = pl.pallas_call(
        kernel,
        out_shape=(
            jax.ShapeDtypeStruct((Tp, B, Hp), jnp.float32),
            jax.ShapeDtypeStruct((B, Hp), jnp.float32),
            jax.ShapeDtypeStruct((B, Hp), jnp.float32),
        ),
        grid_spec=grid_spec,
        compiler_params=pltpu.CompilerParams(
            # batch tiles are independent (megacore on v7x); time is serial.
            dimension_semantics=("parallel", "arbitrary"),
            vmem_limit_bytes=vmem_limit,
        ),
    )(lens, xg, whh_pad)

    outputs = out_pad[:T, :, :H]
    h_n = hn_pad[:, :H][None, :, :]
    c_n = cn_pad[:, :H][None, :, :]
    return outputs, (h_n, c_n)


def _reference_forward(src, src_len, params):
    """Pure-JAX f32 reference of the packed-LSTM encoder (for sanity check)."""
    emb = jnp.take(params["embedding"], src, axis=0)
    w_ih, w_hh = params["w_ih"], params["w_hh"]
    b = params["b_ih"] + params["b_hh"]
    T, B = src.shape
    H = w_hh.shape[1]

    def step(carry, t):
        h, c = carry
        g = emb[t] @ w_ih.T + h @ w_hh.T + b
        i = jax.nn.sigmoid(g[:, :H])
        f = jax.nn.sigmoid(g[:, H:2 * H])
        gg = jnp.tanh(g[:, 2 * H:3 * H])
        o = jax.nn.sigmoid(g[:, 3 * H:])
        c_new = f * c + i * gg
        h_new = o * jnp.tanh(c_new)
        valid = (t < src_len)[:, None]
        h_u = jnp.where(valid, h_new, h)
        c_u = jnp.where(valid, c_new, c)
        out = jnp.where(valid, h_new, jnp.zeros_like(h_new))
        return (h_u, c_u), out

    init = (jnp.zeros((B, H), jnp.float32), jnp.zeros((B, H), jnp.float32))
    (hT, cT), outs = lax.scan(step, init, jnp.arange(T))
    return outs, (hT[None], cT[None])


def init_params(key, input_dim, emb_dim, enc_hid_dim):
    """Deterministic init mimicking PyTorch defaults (shapes match nn.LSTM)."""
    k_emb, k1, k2, k3, k4 = jax.random.split(key, 5)
    bound = 1.0 / jnp.sqrt(enc_hid_dim)
    return {
        "embedding": jax.random.normal(k_emb, (input_dim, emb_dim), jnp.float32),
        # PyTorch LSTM weight shapes: W_ih [4H, E], W_hh [4H, H], biases [4H]
        "w_ih": jax.random.uniform(k1, (4 * enc_hid_dim, emb_dim),
                                   jnp.float32, -bound, bound),
        "w_hh": jax.random.uniform(k2, (4 * enc_hid_dim, enc_hid_dim),
                                   jnp.float32, -bound, bound),
        "b_ih": jax.random.uniform(k3, (4 * enc_hid_dim,),
                                   jnp.float32, -bound, bound),
        "b_hh": jax.random.uniform(k4, (4 * enc_hid_dim,),
                                   jnp.float32, -bound, bound),
    }


if __name__ == "__main__":
    INPUT_DIM = 50    # vocab size
    EMB_DIM = 32
    ENC_HID_DIM = 32
    T = 8             # max sequence length (time-major)
    B = 8             # batch

    key = jax.random.PRNGKey(0)
    k_params, k_src = jax.random.split(key)

    params = init_params(k_params, INPUT_DIM, EMB_DIM, ENC_HID_DIM)

    src = jax.random.randint(k_src, (T, B), 0, INPUT_DIM, dtype=jnp.int32)
    src_len = jnp.array([8, 6, 5, 8, 3, 7, 4, 2], dtype=jnp.int32)

    outputs, (h_n, c_n) = encoder_forward(src, src_len, params)
    jax.block_until_ready((outputs, h_n, c_n))

    assert outputs.shape == (T, B, ENC_HID_DIM)
    assert h_n.shape == (1, B, ENC_HID_DIM)
    assert c_n.shape == (1, B, ENC_HID_DIM)

    # Sanity check against a pure-JAX f32 reference (bf16 matmul operands and
    # bf16-streamed gate pre-activations => loose tolerance).
    ref_out, (ref_h, ref_c) = _reference_forward(src, src_len, params)
    assert float(jnp.max(jnp.abs(outputs - ref_out))) < 5e-2
    assert float(jnp.max(jnp.abs(h_n - ref_h))) < 5e-2
    assert float(jnp.max(jnp.abs(c_n - ref_c))) < 5e-2

    print("KERNEL_OK")
</pallas_src>

<mosaic_0001>
module attributes {stable_mosaic.version = 11 : i64} {
  func.func @_lstm_kernel(%arg0: i32, %arg1: i32, %arg2: memref<8x1xi32, #tpu.memory_space<vmem>>, %arg3: memref<8x8x512xbf16, #tpu.memory_space<vmem>>, %arg4: memref<128x512xbf16, #tpu.memory_space<vmem>>, %arg5: memref<8x8x128xf32, #tpu.memory_space<vmem>>, %arg6: memref<8x128xf32, #tpu.memory_space<vmem>>, %arg7: memref<8x128xf32, #tpu.memory_space<vmem>>) attributes {dimension_semantics = [#tpu.dimension_semantics<parallel>, #tpu.dimension_semantics<arbitrary>], iteration_bounds = array<i64: 1, 1>, scalar_prefetch = 0 : i64, scratch_operands = 0 : i64, tpu.core_type = #tpu.core_type<tc>, window_params = [{transform_indices = @transform_0, window_bounds = array<i64: 8, 1>}, {transform_indices = @transform_1, window_bounds = array<i64: 8, 8, 512>}, {pipeline_mode = #tpu.pipeline_mode<synchronous>, transform_indices = @transform_2, window_bounds = array<i64: 128, 512>}, {transform_indices = @transform_3, window_bounds = array<i64: 8, 8, 128>}, {transform_indices = @transform_4, window_bounds = array<i64: 8, 128>}, {transform_indices = @transform_5, window_bounds = array<i64: 8, 128>}]} {
    %c0_i32 = arith.constant 0 : i32
    %0 = arith.cmpi eq, %arg1, %c0_i32 : i32
    %1 = arith.extui %0 : i1 to i32
    %c0_i32_0 = arith.constant 0 : i32
    %2 = arith.cmpi ne, %1, %c0_i32_0 : i32
    scf.if %2 {
      %cst_106 = arith.constant 0.000000e+00 : f32
      %384 = vector.broadcast %cst_106 : f32 to vector<8x128xf32>
      %c0_107 = arith.constant 0 : index
      %c0_108 = arith.constant 0 : index
      %385 = vector.load %arg6[%c0_107, %c0_108] : memref<8x128xf32, #tpu.memory_space<vmem>>, vector<8x128xf32>
      tpu.vector_store %arg6[%c0_107, %c0_108], %384 {strides = array<i32>} : memref<8x128xf32, #tpu.memory_space<vmem>>, vector<8x128xf32>,
      %cst_109 = arith.constant 0.000000e+00 : f32
      %386 = vector.broadcast %cst_109 : f32 to vector<8x128xf32>
      %c0_110 = arith.constant 0 : index
      %c0_111 = arith.constant 0 : index
      %387 = vector.load %arg7[%c0_110, %c0_111] : memref<8x128xf32, #tpu.memory_space<vmem>>, vector<8x128xf32>
      tpu.vector_store %arg7[%c0_110, %c0_111], %386 {strides = array<i32>} : memref<8x128xf32, #tpu.memory_space<vmem>>, vector<8x128xf32>,
    } else {
    }
    %c0 = arith.constant 0 : index
    %c0_1 = arith.constant 0 : index
    %3 = vector.load %arg2[%c0, %c0_1] : memref<8x1xi32, #tpu.memory_space<vmem>>, vector<8x1xi32>
    %c0_2 = arith.constant 0 : index
    %c0_3 = arith.constant 0 : index
    %4 = vector.load %arg6[%c0_2, %c0_3] : memref<8x128xf32, #tpu.memory_space<vmem>>, vector<8x128xf32>
    %c0_4 = arith.constant 0 : index
    %c0_5 = arith.constant 0 : index
    %5 = vector.load %arg7[%c0_4, %c0_5] : memref<8x128xf32, #tpu.memory_space<vmem>>, vector<8x128xf32>
    %c0_i32_6 = arith.constant 0 : i32
    %c8_i32 = arith.constant 8 : i32
    %6 = arith.muli %arg1, %c8_i32 : i32
    %7 = arith.addi %6, %c0_i32_6 : i32
    %8 = arith.index_cast %c0_i32_6 : i32 to index
    %c0_7 = arith.constant 0 : index
    %c0_8 = arith.constant 0 : index
    %9 = vector.load %arg3[%8, %c0_7, %c0_8] : memref<8x8x512xbf16, #tpu.memory_space<vmem>>, vector<1x8x512xbf16>
    %10 = vector.shape_cast %9 : vector<1x8x512xbf16> to vector<8x512xbf16>
    %11 = arith.extf %10 : vector<8x512xbf16> to vector<8x512xf32>
    %12 = arith.truncf %4 : vector<8x128xf32> to vector<8x128xbf16>
    %c0_9 = arith.constant 0 : index
    %c0_10 = arith.constant 0 : index
    %13 = vector.load %arg4[%c0_9, %c0_10] : memref<128x512xbf16, #tpu.memory_space<vmem>>, vector<128x512xbf16>
    %cst = arith.constant dense<0.000000e+00> : vector<8x512xf32>
    %14 = tpu.matmul %12, %13, %cst {dimension_numbers = #tpu.dot_dimension_numbers<[1], [0], [0], [1], [0, 0, 1, 1], [], []>} : vector<8x128xbf16>, vector<128x512xbf16>, vector<8x512xf32> -> vector<8x512xf32>
    %15 = arith.addf %11, %14 : vector<8x512xf32>
    %16 = vector.extract_strided_slice %15 {offsets = [0, 0], sizes = [8, 128], strides = [1, 1]} : vector<8x512xf32> to vector<8x128xf32>
    %17 = arith.negf %16 : vector<8x128xf32>
    %18 = math.exp %17 : vector<8x128xf32>
    %cst_11 = arith.constant 1.000000e+00 : f32
    %19 = vector.broadcast %cst_11 : f32 to vector<8x128xf32>
    %20 = arith.addf %19, %18 : vector<8x128xf32>
    %21 = arith.divf %19, %20 : vector<8x128xf32>
    %22 = vector.extract_strided_slice %15 {offsets = [0, 128], sizes = [8, 128], strides = [1, 1]} : vector<8x512xf32> to vector<8x128xf32>
    %23 = arith.negf %22 : vector<8x128xf32>
    %24 = math.exp %23 : vector<8x128xf32>
    %cst_12 = arith.constant 1.000000e+00 : f32
    %25 = vector.broadcast %cst_12 : f32 to vector<8x128xf32>
    %26 = arith.addf %25, %24 : vector<8x128xf32>
    %27 = arith.divf %25, %26 : vector<8x128xf32>
    %28 = vector.extract_strided_slice %15 {offsets = [0, 256], sizes = [8, 128], strides = [1, 1]} : vector<8x512xf32> to vector<8x128xf32>
    %29 = math.tanh %28 : vector<8x128xf32>
    %30 = vector.extract_strided_slice %15 {offsets = [0, 384], sizes = [8, 128], strides = [1, 1]} : vector<8x512xf32> to vector<8x128xf32>
    %31 = arith.negf %30 : vector<8x128xf32>
    %32 = math.exp %31 : vector<8x128xf32>
    %cst_13 = arith.constant 1.000000e+00 : f32
    %33 = vector.broadcast %cst_13 : f32 to vector<8x128xf32>
    %34 = arith.addf %33, %32 : vector<8x128xf32>
    %35 = arith.divf %33, %34 : vector<8x128xf32>
    %36 = arith.mulf %27, %5 : vector<8x128xf32>
    %37 = arith.mulf %21, %29 : vector<8x128xf32>
    %38 = arith.addf %36, %37 : vector<8x128xf32>
    %39 = math.tanh %38 : vector<8x128xf32>
    %40 = arith.mulf %35, %39 : vector<8x128xf32>
    %41 = vector.broadcast %7 : i32 to vector<8x1xi32>
    %42 = arith.cmpi slt, %41, %3 : vector<8x1xi32>
    %43 = vector.shape_cast %42 : vector<8x1xi1> to vector<8x1xi1>
    %44 = vector.broadcast %43 : vector<8x1xi1> to vector<8x128xi1>
    %45 = arith.select %44, %40, %4 : vector<8x128xi1>, vector<8x128xf32>
    %46 = arith.select %44, %38, %5 : vector<8x128xi1>, vector<8x128xf32>
    %cst_14 = arith.constant 0.000000e+00 : f32
    %47 = vector.broadcast %cst_14 : f32 to vector<8x128xf32>
    %48 = arith.select %44, %40, %47 : vector<8x128xi1>, vector<8x128xf32>
    %49 = arith.index_cast %c0_i32_6 : i32 to index
    %c0_15 = arith.constant 0 : index
    %c0_16 = arith.constant 0 : index
    %50 = vector.load %arg5[%49, %c0_15, %c0_16] : memref<8x8x128xf32, #tpu.memory_space<vmem>>, vector<1x8x128xf32>
    %51 = vector.shape_cast %50 : vector<1x8x128xf32> to vector<8x128xf32>
    %52 = vector.shape_cast %48 : vector<8x128xf32> to vector<1x8x128xf32>
    tpu.vector_store %arg5[%49, %c0_15, %c0_16], %52 {strides = array<i32>} : memref<8x8x128xf32, #tpu.memory_space<vmem>>, vector<1x8x128xf32>,
    %c1_i32 = arith.constant 1 : i32
    %c8_i32_17 = arith.constant 8 : i32
    %53 = arith.muli %arg1, %c8_i32_17 : i32
    %54 = arith.addi %53, %c1_i32 : i32
    %55 = arith.index_cast %c1_i32 : i32 to index
    %c0_18 = arith.constant 0 : index
    %c0_19 = arith.constant 0 : index
    %56 = vector.load %arg3[%55, %c0_18, %c0_19] : memref<8x8x512xbf16, #tpu.memory_space<vmem>>, vector<1x8x512xbf16>
    %57 = vector.shape_cast %56 : vector<1x8x512xbf16> to vector<8x512xbf16>
    %58 = arith.extf %57 : vector<8x512xbf16> to vector<8x512xf32>
    %59 = arith.truncf %45 : vector<8x128xf32> to vector<8x128xbf16>
    %c0_20 = arith.constant 0 : index
    %c0_21 = arith.constant 0 : index
    %60 = vector.load %arg4[%c0_20, %c0_21] : memref<128x512xbf16, #tpu.memory_space<vmem>>, vector<128x512xbf16>
    %cst_22 = arith.constant dense<0.000000e+00> : vector<8x512xf32>
    %61 = tpu.matmul %59, %60, %cst_22 {dimension_numbers = #tpu.dot_dimension_numbers<[1], [0], [0], [1], [0, 0, 1, 1], [], []>} : vector<8x128xbf16>, vector<128x512xbf16>, vector<8x512xf32> -> vector<8x512xf32>
    %62 = arith.addf %58, %61 : vector<8x512xf32>
    %63 = vector.extract_strided_slice %62 {offsets = [0, 0], sizes = [8, 128], strides = [1, 1]} : vector<8x512xf32> to vector<8x128xf32>
    %64 = arith.negf %63 : vector<8x128xf32>
    %65 = math.exp %64 : vector<8x128xf32>
    %cst_23 = arith.constant 1.000000e+00 : f32
    %66 = vector.broadcast %cst_23 : f32 to vector<8x128xf32>
    %67 = arith.addf %66, %65 : vector<8x128xf32>
    %68 = arith.divf %66, %67 : vector<8x128xf32>
    %69 = vector.extract_strided_slice %62 {offsets = [0, 128], sizes = [8, 128], strides = [1, 1]} : vector<8x512xf32> to vector<8x128xf32>
    %70 = arith.negf %69 : vector<8x128xf32>
    %71 = math.exp %70 : vector<8x128xf32>
    %cst_24 = arith.constant 1.000000e+00 : f32
    %72 = vector.broadcast %cst_24 : f32 to vector<8x128xf32>
    %73 = arith.addf %72, %71 : vector<8x128xf32>
    %74 = arith.divf %72, %73 : vector<8x128xf32>
    %75 = vector.extract_strided_slice %62 {offsets = [0, 256], sizes = [8, 128], strides = [1, 1]} : vector<8x512xf32> to vector<8x128xf32>
    %76 = math.tanh %75 : vector<8x128xf32>
    %77 = vector.extract_strided_slice %62 {offsets = [0, 384], sizes = [8, 128], strides = [1, 1]} : vector<8x512xf32> to vector<8x128xf32>
    %78 = arith.negf %77 : vector<8x128xf32>
    %79 = math.exp %78 : vector<8x128xf32>
    %cst_25 = arith.constant 1.000000e+00 : f32
    %80 = vector.broadcast %cst_25 : f32 to vector<8x128xf32>
    %81 = arith.addf %80, %79 : vector<8x128xf32>
    %82 = arith.divf %80, %81 : vector<8x128xf32>
    %83 = arith.mulf %74, %46 : vector<8x128xf32>
    %84 = arith.mulf %68, %76 : vector<8x128xf32>
    %85 = arith.addf %83, %84 : vector<8x128xf32>
    %86 = math.tanh %85 : vector<8x128xf32>
    %87 = arith.mulf %82, %86 : vector<8x128xf32>
    %88 = vector.broadcast %54 : i32 to vector<8x1xi32>
    %89 = arith.cmpi slt, %88, %3 : vector<8x1xi32>
    %90 = vector.shape_cast %89 : vector<8x1xi1> to vector<8x1xi1>
    %91 = vector.broadcast %90 : vector<8x1xi1> to vector<8x128xi1>
    %92 = arith.select %91, %87, %45 : vector<8x128xi1>, vector<8x128xf32>
    %93 = arith.select %91, %85, %46 : vector<8x128xi1>, vector<8x128xf32>
    %cst_26 = arith.constant 0.000000e+00 : f32
    %94 = vector.broadcast %cst_26 : f32 to vector<8x128xf32>
    %95 = arith.select %91, %87, %94 : vector<8x128xi1>, vector<8x128xf32>
    %96 = arith.index_cast %c1_i32 : i32 to index
    %c0_27 = arith.constant 0 : index
    %c0_28 = arith.constant 0 : index
    %97 = vector.load %arg5[%96, %c0_27, %c0_28] : memref<8x8x128xf32, #tpu.memory_space<vmem>>, vector<1x8x128xf32>
    %98 = vector.shape_cast %97 : vector<1x8x128xf32> to vector<8x128xf32>
    %99 = vector.shape_cast %95 : vector<8x128xf32> to vector<1x8x128xf32>
    tpu.vector_store %arg5[%96, %c0_27, %c0_28], %99 {strides = array<i32>} : memref<8x8x128xf32, #tpu.memory_space<vmem>>, vector<1x8x128xf32>,
    %c2_i32 = arith.constant 2 : i32
    %c8_i32_29 = arith.constant 8 : i32
    %100 = arith.muli %arg1, %c8_i32_29 : i32
    %101 = arith.addi %100, %c2_i32 : i32
    %102 = arith.index_cast %c2_i32 : i32 to index
    %c0_30 = arith.constant 0 : index
    %c0_31 = arith.constant 0 : index
    %103 = vector.load %arg3[%102, %c0_30, %c0_31] : memref<8x8x512xbf16, #tpu.memory_space<vmem>>, vector<1x8x512xbf16>
    %104 = vector.shape_cast %103 : vector<1x8x512xbf16> to vector<8x512xbf16>
    %105 = arith.extf %104 : vector<8x512xbf16> to vector<8x512xf32>
    %106 = arith.truncf %92 : vector<8x128xf32> to vector<8x128xbf16>
    %c0_32 = arith.constant 0 : index
    %c0_33 = arith.constant 0 : index
    %107 = vector.load %arg4[%c0_32, %c0_33] : memref<128x512xbf16, #tpu.memory_space<vmem>>, vector<128x512xbf16>
    %cst_34 = arith.constant dense<0.000000e+00> : vector<8x512xf32>
    %108 = tpu.matmul %106, %107, %cst_34 {dimension_numbers = #tpu.dot_dimension_numbers<[1], [0], [0], [1], [0, 0, 1, 1], [], []>} : vector<8x128xbf16>, vector<128x512xbf16>, vector<8x512xf32> -> vector<8x512xf32>
    %109 = arith.addf %105, %108 : vector<8x512xf32>
    %110 = vector.extract_strided_slice %109 {offsets = [0, 0], sizes = [8, 128], strides = [1, 1]} : vector<8x512xf32> to vector<8x128xf32>
    %111 = arith.negf %110 : vector<8x128xf32>
    %112 = math.exp %111 : vector<8x128xf32>
    %cst_35 = arith.constant 1.000000e+00 : f32
    %113 = vector.broadcast %cst_35 : f32 to vector<8x128xf32>
    %114 = arith.addf %113, %112 : vector<8x128xf32>
    %115 = arith.divf %113, %114 : vector<8x128xf32>
    %116 = vector.extract_strided_slice %109 {offsets = [0, 128], sizes = [8, 128], strides = [1, 1]} : vector<8x512xf32> to vector<8x128xf32>
    %117 = arith.negf %116 : vector<8x128xf32>
    %118 = math.exp %117 : vector<8x128xf32>
    %cst_36 = arith.constant 1.000000e+00 : f32
    %119 = vector.broadcast %cst_36 : f32 to vector<8x128xf32>
    %120 = arith.addf %119, %118 : vector<8x128xf32>
    %121 = arith.divf %119, %120 : vector<8x128xf32>
    %122 = vector.extract_strided_slice %109 {offsets = [0, 256], sizes = [8, 128], strides = [1, 1]} : vector<8x512xf32> to vector<8x128xf32>
    %123 = math.tanh %122 : vector<8x128xf32>
    %124 = vector.extract_strided_slice %109 {offsets = [0, 384], sizes = [8, 128], strides = [1, 1]} : vector<8x512xf32> to vector<8x128xf32>
    %125 = arith.negf %124 : vector<8x128xf32>
    %126 = math.exp %125 : vector<8x128xf32>
    %cst_37 = arith.constant 1.000000e+00 : f32
    %127 = vector.broadcast %cst_37 : f32 to vector<8x128xf32>
    %128 = arith.addf %127, %126 : vector<8x128xf32>
    %129 = arith.divf %127, %128 : vector<8x128xf32>
    %130 = arith.mulf %121, %93 : vector<8x128xf32>
    %131 = arith.mulf %115, %123 : vector<8x128xf32>
    %132 = arith.addf %130, %131 : vector<8x128xf32>
    %133 = math.tanh %132 : vector<8x128xf32>
    %134 = arith.mulf %129, %133 : vector<8x128xf32>
    %135 = vector.broadcast %101 : i32 to vector<8x1xi32>
    %136 = arith.cmpi slt, %135, %3 : vector<8x1xi32>
    %137 = vector.shape_cast %136 : vector<8x1xi1> to vector<8x1xi1>
    %138 = vector.broadcast %137 : vector<8x1xi1> to vector<8x128xi1>
    %139 = arith.select %138, %134, %92 : vector<8x128xi1>, vector<8x128xf32>
    %140 = arith.select %138, %132, %93 : vector<8x128xi1>, vector<8x128xf32>
    %cst_38 = arith.constant 0.000000e+00 : f32
    %141 = vector.broadcast %cst_38 : f32 to vector<8x128xf32>
    %142 = arith.select %138, %134, %141 : vector<8x128xi1>, vector<8x128xf32>
    %143 = arith.index_cast %c2_i32 : i32 to index
    %c0_39 = arith.constant 0 : index
    %c0_40 = arith.constant 0 : index
    %144 = vector.load %arg5[%143, %c0_39, %c0_40] : memref<8x8x128xf32, #tpu.memory_space<vmem>>, vector<1x8x128xf32>
    %145 = vector.shape_cast %144 : vector<1x8x128xf32> to vector<8x128xf32>
    %146 = vector.shape_cast %142 : vector<8x128xf32> to vector<1x8x128xf32>
    tpu.vector_store %arg5[%143, %c0_39, %c0_40], %146 {strides = array<i32>} : memref<8x8x128xf32, #tpu.memory_space<vmem>>, vector<1x8x128xf32>,
    %c3_i32 = arith.constant 3 : i32
    %c8_i32_41 = arith.constant 8 : i32
    %147 = arith.muli %arg1, %c8_i32_41 : i32
    %148 = arith.addi %147, %c3_i32 : i32
    %149 = arith.index_cast %c3_i32 : i32 to index
    %c0_42 = arith.constant 0 : index
    %c0_43 = arith.constant 0 : index
    %150 = vector.load %arg3[%149, %c0_42, %c0_43] : memref<8x8x512xbf16, #tpu.memory_space<vmem>>, vector<1x8x512xbf16>
    %151 = vector.shape_cast %150 : vector<1x8x512xbf16> to vector<8x512xbf16>
    %152 = arith.extf %151 : vector<8x512xbf16> to vector<8x512xf32>
    %153 = arith.truncf %139 : vector<8x128xf32> to vector<8x128xbf16>
    %c0_44 = arith.constant 0 : index
    %c0_45 = arith.constant 0 : index
    %154 = vector.load %arg4[%c0_44, %c0_45] : memref<128x512xbf16, #tpu.memory_space<vmem>>, vector<128x512xbf16>
    %cst_46 = arith.constant dense<0.000000e+00> : vector<8x512xf32>
    %155 = tpu.matmul %153, %154, %cst_46 {dimension_numbers = #tpu.dot_dimension_numbers<[1], [0], [0], [1], [0, 0, 1, 1], [], []>} : vector<8x128xbf16>, vector<128x512xbf16>, vector<8x512xf32> -> vector<8x512xf32>
    %156 = arith.addf %152, %155 : vector<8x512xf32>
    %157 = vector.extract_strided_slice %156 {offsets = [0, 0], sizes = [8, 128], strides = [1, 1]} : vector<8x512xf32> to vector<8x128xf32>
    %158 = arith.negf %157 : vector<8x128xf32>
    %159 = math.exp %158 : vector<8x128xf32>
    %cst_47 = arith.constant 1.000000e+00 : f32
    %160 = vector.broadcast %cst_47 : f32 to vector<8x128xf32>
    %161 = arith.addf %160, %159 : vector<8x128xf32>
    %162 = arith.divf %160, %161 : vector<8x128xf32>
    %163 = vector.extract_strided_slice %156 {offsets = [0, 128], sizes = [8, 128], strides = [1, 1]} : vector<8x512xf32> to vector<8x128xf32>
    %164 = arith.negf %163 : vector<8x128xf32>
    %165 = math.exp %164 : vector<8x128xf32>
    %cst_48 = arith.constant 1.000000e+00 : f32
    %166 = vector.broadcast %cst_48 : f32 to vector<8x128xf32>
    %167 = arith.addf %166, %165 : vector<8x128xf32>
    %168 = arith.divf %166, %167 : vector<8x128xf32>
    %169 = vector.extract_strided_slice %156 {offsets = [0, 256], sizes = [8, 128], strides = [1, 1]} : vector<8x512xf32> to vector<8x128xf32>
    %170 = math.tanh %169 : vector<8x128xf32>
    %171 = vector.extract_strided_slice %156 {offsets = [0, 384], sizes = [8, 128], strides = [1, 1]} : vector<8x512xf32> to vector<8x128xf32>
    %172 = arith.negf %171 : vector<8x128xf32>
    %173 = math.exp %172 : vector<8x128xf32>
    %cst_49 = arith.constant 1.000000e+00 : f32
    %174 = vector.broadcast %cst_49 : f32 to vector<8x128xf32>
    %175 = arith.addf %174, %173 : vector<8x128xf32>
    %176 = arith.divf %174, %175 : vector<8x128xf32>
    %177 = arith.mulf %168, %140 : vector<8x128xf32>
    %178 = arith.mulf %162, %170 : vector<8x128xf32>
    %179 = arith.addf %177, %178 : vector<8x128xf32>
    %180 = math.tanh %179 : vector<8x128xf32>
    %181 = arith.mulf %176, %180 : vector<8x128xf32>
    %182 = vector.broadcast %148 : i32 to vector<8x1xi32>
    %183 = arith.cmpi slt, %182, %3 : vector<8x1xi32>
    %184 = vector.shape_cast %183 : vector<8x1xi1> to vector<8x1xi1>
    %185 = vector.broadcast %184 : vector<8x1xi1> to vector<8x128xi1>
    %186 = arith.select %185, %181, %139 : vector<8x128xi1>, vector<8x128xf32>
    %187 = arith.select %185, %179, %140 : vector<8x128xi1>, vector<8x128xf32>
    %cst_50 = arith.constant 0.000000e+00 : f32
    %188 = vector.broadcast %cst_50 : f32 to vector<8x128xf32>
    %189 = arith.select %185, %181, %188 : vector<8x128xi1>, vector<8x128xf32>
    %190 = arith.index_cast %c3_i32 : i32 to index
    %c0_51 = arith.constant 0 : index
    %c0_52 = arith.constant 0 : index
    %191 = vector.load %arg5[%190, %c0_51, %c0_52] : memref<8x8x128xf32, #tpu.memory_space<vmem>>, vector<1x8x128xf32>
    %192 = vector.shape_cast %191 : vector<1x8x128xf32> to vector<8x128xf32>
    %193 = vector.shape_cast %189 : vector<8x128xf32> to vector<1x8x128xf32>
    tpu.vector_store %arg5[%190, %c0_51, %c0_52], %193 {strides = array<i32>} : memref<8x8x128xf32, #tpu.memory_space<vmem>>, vector<1x8x128xf32>,
    %c4_i32 = arith.constant 4 : i32
    %c8_i32_53 = arith.constant 8 : i32
    %194 = arith.muli %arg1, %c8_i32_53 : i32
    %195 = arith.addi %194, %c4_i32 : i32
    %196 = arith.index_cast %c4_i32 : i32 to index
    %c0_54 = arith.constant 0 : index
    %c0_55 = arith.constant 0 : index
    %197 = vector.load %arg3[%196, %c0_54, %c0_55] : memref<8x8x512xbf16, #tpu.memory_space<vmem>>, vector<1x8x512xbf16>
    %198 = vector.shape_cast %197 : vector<1x8x512xbf16> to vector<8x512xbf16>
    %199 = arith.extf %198 : vector<8x512xbf16> to vector<8x512xf32>
    %200 = arith.truncf %186 : vector<8x128xf32> to vector<8x128xbf16>
    %c0_56 = arith.constant 0 : index
    %c0_57 = arith.constant 0 : index
    %201 = vector.load %arg4[%c0_56, %c0_57] : memref<128x512xbf16, #tpu.memory_space<vmem>>, vector<128x512xbf16>
    %cst_58 = arith.constant dense<0.000000e+00> : vector<8x512xf32>
    %202 = tpu.matmul %200, %201, %cst_58 {dimension_numbers = #tpu.dot_dimension_numbers<[1], [0], [0], [1], [0, 0, 1, 1], [], []>} : vector<8x128xbf16>, vector<128x512xbf16>, vector<8x512xf32> -> vector<8x512xf32>
    %203 = arith.addf %199, %202 : vector<8x512xf32>
    %204 = vector.extract_strided_slice %203 {offsets = [0, 0], sizes = [8, 128], strides = [1, 1]} : vector<8x512xf32> to vector<8x128xf32>
    %205 = arith.negf %204 : vector<8x128xf32>
    %206 = math.exp %205 : vector<8x128xf32>
    %cst_59 = arith.constant 1.000000e+00 : f32
    %207 = vector.broadcast %cst_59 : f32 to vector<8x128xf32>
    %208 = arith.addf %207, %206 : vector<8x128xf32>
    %209 = arith.divf %207, %208 : vector<8x128xf32>
    %210 = vector.extract_strided_slice %203 {offsets = [0, 128], sizes = [8, 128], strides = [1, 1]} : vector<8x512xf32> to vector<8x128xf32>
    %211 = arith.negf %210 : vector<8x128xf32>
    %212 = math.exp %211 : vector<8x128xf32>
    %cst_60 = arith.constant 1.000000e+00 : f32
    %213 = vector.broadcast %cst_60 : f32 to vector<8x128xf32>
    %214 = arith.addf %213, %212 : vector<8x128xf32>
    %215 = arith.divf %213, %214 : vector<8x128xf32>
    %216 = vector.extract_strided_slice %203 {offsets = [0, 256], sizes = [8, 128], strides = [1, 1]} : vector<8x512xf32> to vector<8x128xf32>
    %217 = math.tanh %216 : vector<8x128xf32>
    %218 = vector.extract_strided_slice %203 {offsets = [0, 384], sizes = [8, 128], strides = [1, 1]} : vector<8x512xf32> to vector<8x128xf32>
    %219 = arith.negf %218 : vector<8x128xf32>
    %220 = math.exp %219 : vector<8x128xf32>
    %cst_61 = arith.constant 1.000000e+00 : f32
    %221 = vector.broadcast %cst_61 : f32 to vector<8x128xf32>
    %222 = arith.addf %221, %220 : vector<8x128xf32>
    %223 = arith.divf %221, %222 : vector<8x128xf32>
    %224 = arith.mulf %215, %187 : vector<8x128xf32>
    %225 = arith.mulf %209, %217 : vector<8x128xf32>
    %226 = arith.addf %224, %225 : vector<8x128xf32>
    %227 = math.tanh %226 : vector<8x128xf32>
    %228 = arith.mulf %223, %227 : vector<8x128xf32>
    %229 = vector.broadcast %195 : i32 to vector<8x1xi32>
    %230 = arith.cmpi slt, %229, %3 : vector<8x1xi32>
    %231 = vector.shape_cast %230 : vector<8x1xi1> to vector<8x1xi1>
    %232 = vector.broadcast %231 : vector<8x1xi1> to vector<8x128xi1>
    %233 = arith.select %232, %228, %186 : vector<8x128xi1>, vector<8x128xf32>
    %234 = arith.select %232, %226, %187 : vector<8x128xi1>, vector<8x128xf32>
    %cst_62 = arith.constant 0.000000e+00 : f32
    %235 = vector.broadcast %cst_62 : f32 to vector<8x128xf32>
    %236 = arith.select %232, %228, %235 : vector<8x128xi1>, vector<8x128xf32>
    %237 = arith.index_cast %c4_i32 : i32 to index
    %c0_63 = arith.constant 0 : index
    %c0_64 = arith.constant 0 : index
    %238 = vector.load %arg5[%237, %c0_63, %c0_64] : memref<8x8x128xf32, #tpu.memory_space<vmem>>, vector<1x8x128xf32>
    %239 = vector.shape_cast %238 : vector<1x8x128xf32> to vector<8x128xf32>
    %240 = vector.shape_cast %236 : vector<8x128xf32> to vector<1x8x128xf32>
    tpu.vector_store %arg5[%237, %c0_63, %c0_64], %240 {strides = array<i32>} : memref<8x8x128xf32, #tpu.memory_space<vmem>>, vector<1x8x128xf32>,
    %c5_i32 = arith.constant 5 : i32
    %c8_i32_65 = arith.constant 8 : i32
    %241 = arith.muli %arg1, %c8_i32_65 : i32
    %242 = arith.addi %241, %c5_i32 : i32
    %243 = arith.index_cast %c5_i32 : i32 to index
    %c0_66 = arith.constant 0 : index
    %c0_67 = arith.constant 0 : index
    %244 = vector.load %arg3[%243, %c0_66, %c0_67] : memref<8x8x512xbf16, #tpu.memory_space<vmem>>, vector<1x8x512xbf16>
    %245 = vector.shape_cast %244 : vector<1x8x512xbf16> to vector<8x512xbf16>
    %246 = arith.extf %245 : vector<8x512xbf16> to vector<8x512xf32>
    %247 = arith.truncf %233 : vector<8x128xf32> to vector<8x128xbf16>
    %c0_68 = arith.constant 0 : index
    %c0_69 = arith.constant 0 : index
    %248 = vector.load %arg4[%c0_68, %c0_69] : memref<128x512xbf16, #tpu.memory_space<vmem>>, vector<128x512xbf16>
    %cst_70 = arith.constant dense<0.000000e+00> : vector<8x512xf32>
    %249 = tpu.matmul %247, %248, %cst_70 {dimension_numbers = #tpu.dot_dimension_numbers<[1], [0], [0], [1], [0, 0, 1, 1], [], []>} : vector<8x128xbf16>, vector<128x512xbf16>, vector<8x512xf32> -> vector<8x512xf32>
    %250 = arith.addf %246, %249 : vector<8x512xf32>
    %251 = vector.extract_strided_slice %250 {offsets = [0, 0], sizes = [8, 128], strides = [1, 1]} : vector<8x512xf32> to vector<8x128xf32>
    %252 = arith.negf %251 : vector<8x128xf32>
    %253 = math.exp %252 : vector<8x128xf32>
    %cst_71 = arith.constant 1.000000e+00 : f32
    %254 = vector.broadcast %cst_71 : f32 to vector<8x128xf32>
    %255 = arith.addf %254, %253 : vector<8x128xf32>
    %256 = arith.divf %254, %255 : vector<8x128xf32>
    %257 = vector.extract_strided_slice %250 {offsets = [0, 128], sizes = [8, 128], strides = [1, 1]} : vector<8x512xf32> to vector<8x128xf32>
    %258 = arith.negf %257 : vector<8x128xf32>
    %259 = math.exp %258 : vector<8x128xf32>
    %cst_72 = arith.constant 1.000000e+00 : f32
    %260 = vector.broadcast %cst_72 : f32 to vector<8x128xf32>
    %261 = arith.addf %260, %259 : vector<8x128xf32>
    %262 = arith.divf %260, %261 : vector<8x128xf32>
    %263 = vector.extract_strided_slice %250 {offsets = [0, 256], sizes = [8, 128], strides = [1, 1]} : vector<8x512xf32> to vector<8x128xf32>
    %264 = math.tanh %263 : vector<8x128xf32>
    %265 = vector.extract_strided_slice %250 {offsets = [0, 384], sizes = [8, 128], strides = [1, 1]} : vector<8x512xf32> to vector<8x128xf32>
    %266 = arith.negf %265 : vector<8x128xf32>
    %267 = math.exp %266 : vector<8x128xf32>
    %cst_73 = arith.constant 1.000000e+00 : f32
    %268 = vector.broadcast %cst_73 : f32 to vector<8x128xf32>
    %269 = arith.addf %268, %267 : vector<8x128xf32>
    %270 = arith.divf %268, %269 : vector<8x128xf32>
    %271 = arith.mulf %262, %234 : vector<8x128xf32>
    %272 = arith.mulf %256, %264 : vector<8x128xf32>
    %273 = arith.addf %271, %272 : vector<8x128xf32>
    %274 = math.tanh %273 : vector<8x128xf32>
    %275 = arith.mulf %270, %274 : vector<8x128xf32>
    %276 = vector.broadcast %242 : i32 to vector<8x1xi32>
    %277 = arith.cmpi slt, %276, %3 : vector<8x1xi32>
    %278 = vector.shape_cast %277 : vector<8x1xi1> to vector<8x1xi1>
    %279 = vector.broadcast %278 : vector<8x1xi1> to vector<8x128xi1>
    %280 = arith.select %279, %275, %233 : vector<8x128xi1>, vector<8x128xf32>
    %281 = arith.select %279, %273, %234 : vector<8x128xi1>, vector<8x128xf32>
    %cst_74 = arith.constant 0.000000e+00 : f32
    %282 = vector.broadcast %cst_74 : f32 to vector<8x128xf32>
    %283 = arith.select %279, %275, %282 : vector<8x128xi1>, vector<8x128xf32>
    %284 = arith.index_cast %c5_i32 : i32 to index
    %c0_75 = arith.constant 0 : index
    %c0_76 = arith.constant 0 : index
    %285 = vector.load %arg5[%284, %c0_75, %c0_76] : memref<8x8x128xf32, #tpu.memory_space<vmem>>, vector<1x8x128xf32>
    %286 = vector.shape_cast %285 : vector<1x8x128xf32> to vector<8x128xf32>
    %287 = vector.shape_cast %283 : vector<8x128xf32> to vector<1x8x128xf32>
    tpu.vector_store %arg5[%284, %c0_75, %c0_76], %287 {strides = array<i32>} : memref<8x8x128xf32, #tpu.memory_space<vmem>>, vector<1x8x128xf32>,
    %c6_i32 = arith.constant 6 : i32
    %c8_i32_77 = arith.constant 8 : i32
    %288 = arith.muli %arg1, %c8_i32_77 : i32
    %289 = arith.addi %288, %c6_i32 : i32
    %290 = arith.index_cast %c6_i32 : i32 to index
    %c0_78 = arith.constant 0 : index
    %c0_79 = arith.constant 0 : index
    %291 = vector.load %arg3[%290, %c0_78, %c0_79] : memref<8x8x512xbf16, #tpu.memory_space<vmem>>, vector<1x8x512xbf16>
    %292 = vector.shape_cast %291 : vector<1x8x512xbf16> to vector<8x512xbf16>
    %293 = arith.extf %292 : vector<8x512xbf16> to vector<8x512xf32>
    %294 = arith.truncf %280 : vector<8x128xf32> to vector<8x128xbf16>
    %c0_80 = arith.constant 0 : index
    %c0_81 = arith.constant 0 : index
    %295 = vector.load %arg4[%c0_80, %c0_81] : memref<128x512xbf16, #tpu.memory_space<vmem>>, vector<128x512xbf16>
    %cst_82 = arith.constant dense<0.000000e+00> : vector<8x512xf32>
    %296 = tpu.matmul %294, %295, %cst_82 {dimension_numbers = #tpu.dot_dimension_numbers<[1], [0], [0], [1], [0, 0, 1, 1], [], []>} : vector<8x128xbf16>, vector<128x512xbf16>, vector<8x512xf32> -> vector<8x512xf32>
    %297 = arith.addf %293, %296 : vector<8x512xf32>
    %298 = vector.extract_strided_slice %297 {offsets = [0, 0], sizes = [8, 128], strides = [1, 1]} : vector<8x512xf32> to vector<8x128xf32>
    %299 = arith.negf %298 : vector<8x128xf32>
    %300 = math.exp %299 : vector<8x128xf32>
    %cst_83 = arith.constant 1.000000e+00 : f32
    %301 = vector.broadcast %cst_83 : f32 to vector<8x128xf32>
    %302 = arith.addf %301, %300 : vector<8x128xf32>
    %303 = arith.divf %301, %302 : vector<8x128xf32>
    %304 = vector.extract_strided_slice %297 {offsets = [0, 128], sizes = [8, 128], strides = [1, 1]} : vector<8x512xf32> to vector<8x128xf32>
    %305 = arith.negf %304 : vector<8x128xf32>
    %306 = math.exp %305 : vector<8x128xf32>
    %cst_84 = arith.constant 1.000000e+00 : f32
    %307 = vector.broadcast %cst_84 : f32 to vector<8x128xf32>
    %308 = arith.addf %307, %306 : vector<8x128xf32>
    %309 = arith.divf %307, %308 : vector<8x128xf32>
    %310 = vector.extract_strided_slice %297 {offsets = [0, 256], sizes = [8, 128], strides = [1, 1]} : vector<8x512xf32> to vector<8x128xf32>
    %311 = math.tanh %310 : vector<8x128xf32>
    %312 = vector.extract_strided_slice %297 {offsets = [0, 384], sizes = [8, 128], strides = [1, 1]} : vector<8x512xf32> to vector<8x128xf32>
    %313 = arith.negf %312 : vector<8x128xf32>
    %314 = math.exp %313 : vector<8x128xf32>
    %cst_85 = arith.constant 1.000000e+00 : f32
    %315 = vector.broadcast %cst_85 : f32 to vector<8x128xf32>
    %316 = arith.addf %315, %314 : vector<8x128xf32>
    %317 = arith.divf %315, %316 : vector<8x128xf32>
    %318 = arith.mulf %309, %281 : vector<8x128xf32>
    %319 = arith.mulf %303, %311 : vector<8x128xf32>
    %320 = arith.addf %318, %319 : vector<8x128xf32>
    %321 = math.tanh %320 : vector<8x128xf32>
    %322 = arith.mulf %317, %321 : vector<8x128xf32>
    %323 = vector.broadcast %289 : i32 to vector<8x1xi32>
    %324 = arith.cmpi slt, %323, %3 : vector<8x1xi32>
    %325 = vector.shape_cast %324 : vector<8x1xi1> to vector<8x1xi1>
    %326 = vector.broadcast %325 : vector<8x1xi1> to vector<8x128xi1>
    %327 = arith.select %326, %322, %280 : vector<8x128xi1>, vector<8x128xf32>
    %328 = arith.select %326, %320, %281 : vector<8x128xi1>, vector<8x128xf32>
    %cst_86 = arith.constant 0.000000e+00 : f32
    %329 = vector.broadcast %cst_86 : f32 to vector<8x128xf32>
    %330 = arith.select %326, %322, %329 : vector<8x128xi1>, vector<8x128xf32>
    %331 = arith.index_cast %c6_i32 : i32 to index
    %c0_87 = arith.constant 0 : index
    %c0_88 = arith.constant 0 : index
    %332 = vector.load %arg5[%331, %c0_87, %c0_88] : memref<8x8x128xf32, #tpu.memory_space<vmem>>, vector<1x8x128xf32>
    %333 = vector.shape_cast %332 : vector<1x8x128xf32> to vector<8x128xf32>
    %334 = vector.shape_cast %330 : vector<8x128xf32> to vector<1x8x128xf32>
    tpu.vector_store %arg5[%331, %c0_87, %c0_88], %334 {strides = array<i32>} : memref<8x8x128xf32, #tpu.memory_space<vmem>>, vector<1x8x128xf32>,
    %c7_i32 = arith.constant 7 : i32
    %c8_i32_89 = arith.constant 8 : i32
    %335 = arith.muli %arg1, %c8_i32_89 : i32
    %336 = arith.addi %335, %c7_i32 : i32
    %337 = arith.index_cast %c7_i32 : i32 to index
    %c0_90 = arith.constant 0 : index
    %c0_91 = arith.constant 0 : index
    %338 = vector.load %arg3[%337, %c0_90, %c0_91] : memref<8x8x512xbf16, #tpu.memory_space<vmem>>, vector<1x8x512xbf16>
    %339 = vector.shape_cast %338 : vector<1x8x512xbf16> to vector<8x512xbf16>
    %340 = arith.extf %339 : vector<8x512xbf16> to vector<8x512xf32>
    %341 = arith.truncf %327 : vector<8x128xf32> to vector<8x128xbf16>
    %c0_92 = arith.constant 0 : index
    %c0_93 = arith.constant 0 : index
    %342 = vector.load %arg4[%c0_92, %c0_93] : memref<128x512xbf16, #tpu.memory_space<vmem>>, vector<128x512xbf16>
    %cst_94 = arith.constant dense<0.000000e+00> : vector<8x512xf32>
    %343 = tpu.matmul %341, %342, %cst_94 {dimension_numbers = #tpu.dot_dimension_numbers<[1], [0], [0], [1], [0, 0, 1, 1], [], []>} : vector<8x128xbf16>, vector<128x512xbf16>, vector<8x512xf32> -> vector<8x512xf32>
    %344 = arith.addf %340, %343 : vector<8x512xf32>
    %345 = vector.extract_strided_slice %344 {offsets = [0, 0], sizes = [8, 128], strides = [1, 1]} : vector<8x512xf32> to vector<8x128xf32>
    %346 = arith.negf %345 : vector<8x128xf32>
    %347 = math.exp %346 : vector<8x128xf32>
    %cst_95 = arith.constant 1.000000e+00 : f32
    %348 = vector.broadcast %cst_95 : f32 to vector<8x128xf32>
    %349 = arith.addf %348, %347 : vector<8x128xf32>
    %350 = arith.divf %348, %349 : vector<8x128xf32>
    %351 = vector.extract_strided_slice %344 {offsets = [0, 128], sizes = [8, 128], strides = [1, 1]} : vector<8x512xf32> to vector<8x128xf32>
    %352 = arith.negf %351 : vector<8x128xf32>
    %353 = math.exp %352 : vector<8x128xf32>
    %cst_96 = arith.constant 1.000000e+00 : f32
    %354 = vector.broadcast %cst_96 : f32 to vector<8x128xf32>
    %355 = arith.addf %354, %353 : vector<8x128xf32>
    %356 = arith.divf %354, %355 : vector<8x128xf32>
    %357 = vector.extract_strided_slice %344 {offsets = [0, 256], sizes = [8, 128], strides = [1, 1]} : vector<8x512xf32> to vector<8x128xf32>
    %358 = math.tanh %357 : vector<8x128xf32>
    %359 = vector.extract_strided_slice %344 {offsets = [0, 384], sizes = [8, 128], strides = [1, 1]} : vector<8x512xf32> to vector<8x128xf32>
    %360 = arith.negf %359 : vector<8x128xf32>
    %361 = math.exp %360 : vector<8x128xf32>
    %cst_97 = arith.constant 1.000000e+00 : f32
    %362 = vector.broadcast %cst_97 : f32 to vector<8x128xf32>
    %363 = arith.addf %362, %361 : vector<8x128xf32>
    %364 = arith.divf %362, %363 : vector<8x128xf32>
    %365 = arith.mulf %356, %328 : vector<8x128xf32>
    %366 = arith.mulf %350, %358 : vector<8x128xf32>
    %367 = arith.addf %365, %366 : vector<8x128xf32>
    %368 = math.tanh %367 : vector<8x128xf32>
    %369 = arith.mulf %364, %368 : vector<8x128xf32>
    %370 = vector.broadcast %336 : i32 to vector<8x1xi32>
    %371 = arith.cmpi slt, %370, %3 : vector<8x1xi32>
    %372 = vector.shape_cast %371 : vector<8x1xi1> to vector<8x1xi1>
    %373 = vector.broadcast %372 : vector<8x1xi1> to vector<8x128xi1>
    %374 = arith.select %373, %369, %327 : vector<8x128xi1>, vector<8x128xf32>
    %375 = arith.select %373, %367, %328 : vector<8x128xi1>, vector<8x128xf32>
    %cst_98 = arith.constant 0.000000e+00 : f32
    %376 = vector.broadcast %cst_98 : f32 to vector<8x128xf32>
    %377 = arith.select %373, %369, %376 : vector<8x128xi1>, vector<8x128xf32>
    %378 = arith.index_cast %c7_i32 : i32 to index
    %c0_99 = arith.constant 0 : index
    %c0_100 = arith.constant 0 : index
    %379 = vector.load %arg5[%378, %c0_99, %c0_100] : memref<8x8x128xf32, #tpu.memory_space<vmem>>, vector<1x8x128xf32>
    %380 = vector.shape_cast %379 : vector<1x8x128xf32> to vector<8x128xf32>
    %381 = vector.shape_cast %377 : vector<8x128xf32> to vector<1x8x128xf32>
    tpu.vector_store %arg5[%378, %c0_99, %c0_100], %381 {strides = array<i32>} : memref<8x8x128xf32, #tpu.memory_space<vmem>>, vector<1x8x128xf32>,
    %c8_i32_101 = arith.constant 8 : i32
    %c0_102 = arith.constant 0 : index
    %c0_103 = arith.constant 0 : index
    %382 = vector.load %arg6[%c0_102, %c0_103] : memref<8x128xf32, #tpu.memory_space<vmem>>, vector<8x128xf32>
    tpu.vector_store %arg6[%c0_102, %c0_103], %374 {strides = array<i32>} : memref<8x128xf32, #tpu.memory_space<vmem>>, vector<8x128xf32>,
    %c0_104 = arith.constant 0 : index
    %c0_105 = arith.constant 0 : index
    %383 = vector.load %arg7[%c0_104, %c0_105] : memref<8x128xf32, #tpu.memory_space<vmem>>, vector<8x128xf32>
    tpu.vector_store %arg7[%c0_104, %c0_105], %375 {strides = array<i32>} : memref<8x128xf32, #tpu.memory_space<vmem>>, vector<8x128xf32>,
    return
  }
  func.func @transform_0(%arg0: i32, %arg1: i32) -> (i32, i32) {
    %c0_i32 = arith.constant 0 : i32
    %c0_i32_0 = arith.constant 0 : i32
    return %arg0, %c0_i32 : i32, i32
  }
  func.func @transform_1(%arg0: i32, %arg1: i32) -> (i32, i32, i32) {
    %c0_i32 = arith.constant 0 : i32
    %c0_i32_0 = arith.constant 0 : i32
    return %arg1, %arg0, %c0_i32 : i32, i32, i32
  }
  func.func @transform_2(%arg0: i32, %arg1: i32) -> (i32, i32) {
    %c0_i32 = arith.constant 0 : i32
    %c0_i32_0 = arith.constant 0 : i32
    %c0_i32_1 = arith.constant 0 : i32
    return %c0_i32, %c0_i32_0 : i32, i32
  }
  func.func @transform_3(%arg0: i32, %arg1: i32) -> (i32, i32, i32) {
    %c0_i32 = arith.constant 0 : i32
    %c0_i32_0 = arith.constant 0 : i32
    return %arg1, %arg0, %c0_i32 : i32, i32, i32
  }
  func.func @transform_4(%arg0: i32, %arg1: i32) -> (i32, i32) {
    %c0_i32 = arith.constant 0 : i32
    %c0_i32_0 = arith.constant 0 : i32
    return %arg0, %c0_i32 : i32, i32
  }
  func.func @transform_5(%arg0: i32, %arg1: i32) -> (i32, i32) {
    %c0_i32 = arith.constant 0 : i32
    %c0_i32_0 = arith.constant 0 : i32
    return %arg0, %c0_i32 : i32, i32
  }
}

</mosaic_0001>

<bundles_post_ra>
// kernel: encoder_forward.1
= control target key start
LH: loop header
LB: loop body
LE: loop exit
PB: predicated region body
PF: predicated region fallthrough
CT: control target
= control target key end

     0   :  { %s5978_s0 = inlined_call_operand.vmem [shape: s32[8,1], index: 0, kind: input, shape index: {}]   ;;  %s5979_s1 = inlined_call_operand.vmem [shape: bf16[8,8,512], index: 1, kind: input, shape index: {}]   ;;  %s5980_s2 = inlined_call_operand.vmem [shape: bf16[128,512], index: 2, kind: input, shape index: {}]   ;;  %s5981_s3 = inlined_call_operand.hbm [shape: f32[8,8,128], index: 3, kind: output, shape index: {0}]   ;;  %s5982_s4 = inlined_call_operand.vmem [shape: f32[8,128], index: 4, kind: output, shape index: {1}]   ;;  %s5983_s5 = inlined_call_operand.vmem [shape: f32[8,128], index: 5, kind: output, shape index: {2}]  }
   0x1   :  { %v2823_v0 = vld [vmem:[%s5980_s2 + $0xe0] sm:$0xf]  ;;  %v3809_v1 = vld [vmem:[%s5980_s2 + $0xec] sm:$0xf0]  ;;  %v3807_v2 = vld [vmem:[%s5980_s2 + $0xe4] sm:$0xf] }
   0x2   :  { %v2824_v3 = vor.u32 %v3809_v1, %v2823_v0  ;;  %v2825_v4 = vld [vmem:[%s5980_s2 + $0xf0] sm:$0xf0]  ;;  %v3808_v5 = vld [vmem:[%s5980_s2 + $0xec] sm:$0xf]  ;;  %v2833_v6 = vld [vmem:[%s5980_s2 + $0xf8] sm:$0xf0] }
   0x3   :  { %v2828_v7 = vor.u32 %v3807_v2, %v2825_v4  ;;  %v2836_v8 = vor.u32 %v3808_v5, %v2833_v6  ;;  %v2807_v9 = vld [vmem:[%s5980_s2 + $0xc0] sm:$0xf]  ;;  %v3805_v10 = vld [vmem:[%s5980_s2 + $0xcc] sm:$0xf0]  ;;  %v3803_v11 = vld [vmem:[%s5980_s2 + $0xc4] sm:$0xf] }
   0x4   :  { %227 = vmatpush.bf16.msra.mxu0 %v2824_v3  ;;  %v2808_v12 = vor.u32 %v3805_v10, %v2807_v9  ;;  %v2809_v13 = vld [vmem:[%s5980_s2 + $0xd0] sm:$0xf0]  ;;  %v3804_v14 = vld [vmem:[%s5980_s2 + $0xcc] sm:$0xf]  ;;  %v2817_v15 = vld [vmem:[%s5980_s2 + $0xd8] sm:$0xf0] }
   0x5   :  { %240 = vmatpush.bf16.msra.mxu1 %v2828_v7  ;;  %266 = vmatpush.bf16.msra.mxu3 %v2836_v8  ;;  %v2812_v16 = vor.u32 %v3803_v11, %v2809_v13  ;;  %v2820_v17 = vor.u32 %v3804_v14, %v2817_v15  ;;  %v2831_v18 = vld [vmem:[%s5980_s2 + $0xe8] sm:$0xf]  ;;  %v3810_v19 = vld [vmem:[%s5980_s2 + $0xf4] sm:$0xf0]  ;;  %v2791_v20 = vld [vmem:[%s5980_s2 + $0xa0] sm:$0xf] }
   0x6   :  { %v2832_v21 = vor.u32 %v3810_v19, %v2831_v18  ;;  %v3801_v22 = vld [vmem:[%s5980_s2 + $0xac] sm:$0xf0]  ;;  %v3799_v23 = vld [vmem:[%s5980_s2 + $0xa4] sm:$0xf]  ;;  %v2793_v24 = vld [vmem:[%s5980_s2 + $0xb0] sm:$0xf0] }
   0x7   :  { %v3800_v25 = vld [vmem:[%s5980_s2 + $0xac] sm:$0xf]  ;;  %v2801_v26 = vld [vmem:[%s5980_s2 + $0xb8] sm:$0xf0]  ;;  %v2815_v27 = vld [vmem:[%s5980_s2 + $0xc8] sm:$0xf]  ;;  %v2792_v28 = vor.u32 %v3801_v22, %v2791_v20  ;;  %v2796_v32 = vor.u32 %v3799_v23, %v2793_v24 }
   0x8   :  { %228 = vmatpush.bf16.msra.mxu0 %v2808_v12  ;;  %253 = vmatpush.bf16.msra.mxu2 %v2832_v21  ;;  %v3806_v29 = vld [vmem:[%s5980_s2 + $0xd4] sm:$0xf0]  ;;  %v2775_v30 = vld [vmem:[%s5980_s2 + $0x80] sm:$0xf]  ;;  %v3797_v31 = vld [vmem:[%s5980_s2 + $0x8c] sm:$0xf0]  ;;  %v2804_v33 = vor.u32 %v3800_v25, %v2801_v26 }
   0x9   :  { %241 = vmatpush.bf16.msra.mxu1 %v2812_v16  ;;  %267 = vmatpush.bf16.msra.mxu3 %v2820_v17  ;;  %v2816_v34 = vor.u32 %v3806_v29, %v2815_v27  ;;  %v3795_v35 = vld [vmem:[%s5980_s2 + $0x84] sm:$0xf]  ;;  %v2777_v36 = vld [vmem:[%s5980_s2 + $0x90] sm:$0xf0]  ;;  %v3796_v37 = vld [vmem:[%s5980_s2 + $0x8c] sm:$0xf]  ;;  %v2776_v41 = vor.u32 %v3797_v31, %v2775_v30 }
   0xa   :  { %v2785_v38 = vld [vmem:[%s5980_s2 + $0x98] sm:$0xf0]  ;;  %v2799_v39 = vld [vmem:[%s5980_s2 + $0xa8] sm:$0xf]  ;;  %v3802_v40 = vld [vmem:[%s5980_s2 + $0xb4] sm:$0xf0]  ;;  %v2780_v45 = vor.u32 %v3795_v35, %v2777_v36 }
   0xb   :  { %v2800_v42 = vor.u32 %v3802_v40, %v2799_v39  ;;  %v2759_v43 = vld [vmem:[%s5980_s2 + $0x60] sm:$0xf]  ;;  %v3793_v44 = vld [vmem:[%s5980_s2 + $0x6c] sm:$0xf0]  ;;  %v2788_v46 = vor.u32 %v3796_v37, %v2785_v38  ;;  %v3791_v47 = vld [vmem:[%s5980_s2 + $0x64] sm:$0xf] }
   0xc   :  { %229 = vmatpush.bf16.msra.mxu0 %v2792_v28  ;;  %254 = vmatpush.bf16.msra.mxu2 %v2816_v34  ;;  %v2783_v48 = vld [vmem:[%s5980_s2 + $0x88] sm:$0xf]  ;;  %v3798_v49 = vld [vmem:[%s5980_s2 + $0x94] sm:$0xf0]  ;;  %v2761_v50 = vld [vmem:[%s5980_s2 + $0x70] sm:$0xf0]  ;;  %v2760_v53 = vor.u32 %v3793_v44, %v2759_v43 }
   0xd   :  { %242 = vmatpush.bf16.msra.mxu1 %v2796_v32  ;;  %268 = vmatpush.bf16.msra.mxu3 %v2804_v33  ;;  %v3792_v51 = vld [vmem:[%s5980_s2 + $0x6c] sm:$0xf]  ;;  %v2769_v52 = vld [vmem:[%s5980_s2 + $0x78] sm:$0xf0]  ;;  %v2784_v54 = vor.u32 %v3798_v49, %v2783_v48  ;;  %v2743_v55 = vld [vmem:[%s5980_s2 + $0x40] sm:$0xf]  ;;  %v2764_v57 = vor.u32 %v3791_v47, %v2761_v50 }
   0xe   :  { %v3789_v56 = vld [vmem:[%s5980_s2 + $0x4c] sm:$0xf0]  ;;  %v2772_v58 = vor.u32 %v3792_v51, %v2769_v52  ;;  %v3787_v59 = vld [vmem:[%s5980_s2 + $0x44] sm:$0xf]  ;;  %v2767_v60 = vld [vmem:[%s5980_s2 + $0x68] sm:$0xf] }
   0xf   :  { %v3794_v61 = vld [vmem:[%s5980_s2 + $0x74] sm:$0xf0]  ;;  %v2745_v62 = vld [vmem:[%s5980_s2 + $0x50] sm:$0xf0]  ;;  %v3788_v63 = vld [vmem:[%s5980_s2 + $0x4c] sm:$0xf]  ;;  %v2744_v2 = vor.u32 %v3789_v56, %v2743_v55 }
  0x10   :  { %230 = vmatpush.bf16.msra.mxu0 %v2776_v41  ;;  %255 = vmatpush.bf16.msra.mxu2 %v2800_v42  ;;  %v2753_v0 = vld [vmem:[%s5980_s2 + $0x58] sm:$0xf0]  ;;  %v2727_v1 = vld [vmem:[%s5980_s2 + $0x20] sm:$0xf]  ;;  %v2768_v3 = vor.u32 %v3794_v61, %v2767_v60  ;;  %v3785_v4 = vld [vmem:[%s5980_s2 + $0x2c] sm:$0xf0]  ;;  %v2748_v7 = vor.u32 %v3787_v59, %v2745_v62 }
  0x11   :  { %243 = vmatpush.bf16.msra.mxu1 %v2780_v45  ;;  %269 = vmatpush.bf16.msra.mxu3 %v2788_v46  ;;  %v3783_v5 = vld [vmem:[%s5980_s2 + $0x24] sm:$0xf]  ;;  %v2729_v6 = vld [vmem:[%s5980_s2 + $0x30] sm:$0xf0]  ;;  %v2756_v8 = vor.u32 %v3788_v63, %v2753_v0  ;;  %v2751_v9 = vld [vmem:[%s5980_s2 + $0x48] sm:$0xf] }
  0x12   :  { %v3790_v10 = vld [vmem:[%s5980_s2 + $0x54] sm:$0xf0]  ;;  %v3784_v11 = vld [vmem:[%s5980_s2 + $0x2c] sm:$0xf]  ;;  %v2737_v12 = vld [vmem:[%s5980_s2 + $0x38] sm:$0xf0] }
  0x13   :  { %v4210_v13 = vmov 0   ;;  %v4411_v14 = vld [vmem:[%s5978_s0] sm:$0xff] }
  0x14   :  { %231 = vmatpush.bf16.msra.mxu0 %v2760_v53  ;;  %256 = vmatpush.bf16.msra.mxu2 %v2784_v54  ;;  %vm2840_vm0 = vcmp.gt.s32.totalorder %v4411_v14, 0 }
  0x15   :  { %244 = vmatpush.bf16.msra.mxu1 %v2764_v57  ;;  %270 = vmatpush.bf16.msra.mxu3 %v2772_v58 }
  0x16   :  { %4040 = vset.pattern.permute.xlu0 %v4210_v13  ;;  %4041 = vset.pattern.permute.xlu1 %v4210_v13 }
  0x17   :  { %4042 = vset.pattern.permute.xlu2 %v4210_v13 }
  0x18   :  { %11 = vsyncpa [#allocation3], 0  ;;  %232 = vmatpush.bf16.msra.mxu0 %v2744_v2  ;;  %257 = vmatpush.bf16.msra.mxu2 %v2768_v3  ;;  %v2728_v15 = vor.u32 %v3785_v4, %v2727_v1  ;;  %v2752_v16 = vor.u32 %v3790_v10, %v2751_v9  ;;  %v2711_v17 = vld [vmem:[%s5980_s2] sm:$0xf]  ;;  %v3781_v18 = vld [vmem:[%s5980_s2 + $0xc] sm:$0xf0]  ;;  %v2732_v20 = vor.u32 %v3783_v5, %v2729_v6 }
  0x19   :  { %v348_v19 = vsel %vm2840_vm0, 1, %v4210_v13  ;;  %245 = vmatpush.bf16.msra.mxu1 %v2748_v7  ;;  %271 = vmatpush.bf16.msra.mxu3 %v2756_v8  ;;  %v2740_v21 = vor.u32 %v3784_v11, %v2737_v12  ;;  %v3779_v22 = vld [vmem:[%s5980_s2 + $0x4] sm:$0xf]  ;;  %v2735_v23 = vld [vmem:[%s5980_s2 + $0x28] sm:$0xf]  ;;  %v2712_v28 = vor.u32 %v3781_v18, %v2711_v17  ;;  %vm2974_vm1 = vcmp.gt.s32.totalorder %v4411_v14, 1 }
  0x1a   :  { %v3786_v24 = vld [vmem:[%s5980_s2 + $0x34] sm:$0xf0]  ;;  %v2713_v25 = vld [vmem:[%s5980_s2 + $0x10] sm:$0xf0]  ;;  %v3780_v26 = vld [vmem:[%s5980_s2 + $0xc] sm:$0xf]  ;;  %350 = vperm.xlu0 %4040, %v348_v19  }
  0x1b   :  { %v2721_v27 = vld [vmem:[%s5980_s2 + $0x18] sm:$0xf0]  ;;  %v2736_v29 = vor.u32 %v3786_v24, %v2735_v23  ;;  %v2716_v30 = vor.u32 %v3779_v22, %v2713_v25  ;;  %v2719_v32 = vld [vmem:[%s5980_s2 + $0x8] sm:$0xf]  ;;  %v3782_v33 = vld [vmem:[%s5980_s2 + $0x14] sm:$0xf0] }
  0x1c   :  { %233 = vmatpush.bf16.msra.mxu0 %v2728_v15  ;;  %258 = vmatpush.bf16.msra.mxu2 %v2752_v16  ;;  %v2724_v31 = vor.u32 %v3780_v26, %v2721_v27  ;;  %v679_v34 = vsel %vm2974_vm1, 1, %v4210_v13  ;;  %v2720_v35 = vor.u32 %v3782_v33, %v2719_v32  ;;  %v4211_v36 = vmov 0.0|0.0   ;;  %v2957_v38 = vld [vmem:[%s5980_s2 + $0xe0] sm:$0xf]  ;;  %v3841_v39 = vld [vmem:[%s5980_s2 + $0xec] sm:$0xf0] }
  0x1d   :  { %246 = vmatpush.bf16.msra.mxu1 %v2732_v20  ;;  %272 = vmatpush.bf16.msra.mxu3 %v2740_v21  ;;  %vm3644_vm2 = vcmp.gt.s32.totalorder %v4411_v14, 6  ;;  %v3839_v40 = vld [vmem:[%s5980_s2 + $0xe4] sm:$0xf]  ;;  %v2958_v41 = vor.u32 %v3841_v39, %v2957_v38  ;;  %v2959_v42 = vld [vmem:[%s5980_s2 + $0xf0] sm:$0xf0]  ;;  %vm3108_vm1 = vcmp.gt.s32.totalorder %v4411_v14, 2 }
  0x1e   :  { %v2339_v37 = vsel %vm3644_vm2, 1, %v4210_v13  ;;  %v2965_v43 = vld [vmem:[%s5980_s2 + $0xe8] sm:$0xf]  ;;  %v3842_v44 = vld [vmem:[%s5980_s2 + $0xf4] sm:$0xf0]  ;;  %v2962_v45 = vor.u32 %v3839_v40, %v2959_v42  ;;  %v28_v9 = vld [vmem:[%s5979_s1] sm:$0xff] }
  0x1f   :  { %v2966_v46 = vor.u32 %v3842_v44, %v2965_v43  ;;  %v3840_v47 = vld [vmem:[%s5980_s2 + $0xec] sm:$0xf]  ;;  %v2967_v48 = vld [vmem:[%s5980_s2 + $0xf8] sm:$0xf0]  ;;  %v2941_v50 = vld [vmem:[%s5980_s2 + $0xc0] sm:$0xf]  ;;  %v30_v24 = vunpack.c.l.bf16 %v28_v9  ;;  %v31_v26 = vunpack.c.h.bf16 %v28_v9 }
  0x20   :  { %234 = vmatpush.bf16.msra.mxu0 %v2712_v28  ;;  %259 = vmatpush.bf16.msra.mxu2 %v2736_v29  ;;  %v2970_v49 = vor.u32 %v3840_v47, %v2967_v48  ;;  %v3837_v51 = vld [vmem:[%s5980_s2 + $0xcc] sm:$0xf0]  ;;  %v3835_v52 = vld [vmem:[%s5980_s2 + $0xc4] sm:$0xf]  ;;  %v2943_v54 = vld [vmem:[%s5980_s2 + $0xd0] sm:$0xf0] }
  0x21   :  { %247 = vmatpush.bf16.msra.mxu1 %v2716_v30  ;;  %273 = vmatpush.bf16.msra.mxu3 %v2724_v31  ;;  %v2942_v53 = vor.u32 %v3837_v51, %v2941_v50  ;;  %v2949_v55 = vld [vmem:[%s5980_s2 + $0xc8] sm:$0xf]  ;;  %v3838_v56 = vld [vmem:[%s5980_s2 + $0xd4] sm:$0xf0]  ;;  %v2946_v57 = vor.u32 %v3835_v52, %v2943_v54  ;;  %v3836_v59 = vld [vmem:[%s5980_s2 + $0xcc] sm:$0xf] }
  0x22   :  { %681 = vperm.xlu0 %4040, %v679_v34   ;;  %v2950_v58 = vor.u32 %v3838_v56, %v2949_v55  ;;  %v2951_v60 = vld [vmem:[%s5980_s2 + $0xd8] sm:$0xf0]  ;;  %v2925_v62 = vld [vmem:[%s5980_s2 + $0xa0] sm:$0xf]  ;;  %v3833_v63 = vld [vmem:[%s5980_s2 + $0xac] sm:$0xf0] }
  0x23   :  { %235 = vmatmul.bf16.vlgmr.msra.gmra.mxu0 %v4211_v36  ;;  %v2954_v61 = vor.u32 %v3836_v59, %v2951_v60  ;;  %v3831_v0 = vld [vmem:[%s5980_s2 + $0xa4] sm:$0xf]  ;;  %v2926_v1 = vor.u32 %v3833_v63, %v2925_v62  ;;  %v2927_v2 = vld [vmem:[%s5980_s2 + $0xb0] sm:$0xf0]  ;;  %v2933_v3 = vld [vmem:[%s5980_s2 + $0xa8] sm:$0xf] }
  0x24   :  { %248 = vmatmul.bf16.vlgmr.msra.gmra.mxu1 %v4211_v36  ;;  %274 = vmatmul.bf16.vlgmr.msra.gmra.mxu3 %v4211_v36  ;;  %v3834_v4 = vld [vmem:[%s5980_s2 + $0xb4] sm:$0xf0]  ;;  %v2930_v5 = vor.u32 %v3831_v0, %v2927_v2  ;;  %v3832_v7 = vld [vmem:[%s5980_s2 + $0xac] sm:$0xf]  ;;  %v2935_v8 = vld [vmem:[%s5980_s2 + $0xb8] sm:$0xf0] }
  0x25   :  { %260 = vmatpush.bf16.msra.mxu2 %v2720_v35  ;;  %558 = vmatpush.bf16.msrb.mxu0 %v2958_v41  ;;  %v2934_v6 = vor.u32 %v3834_v4, %v2933_v3  ;;  %v2938_v10 = vor.u32 %v3832_v7, %v2935_v8  ;;  %v2909_v11 = vld [vmem:[%s5980_s2 + $0x80] sm:$0xf]  ;;  %v3829_v12 = vld [vmem:[%s5980_s2 + $0x8c] sm:$0xf0]  ;;  %v3827_v15 = vld [vmem:[%s5980_s2 + $0x84] sm:$0xf] }
  0x26   :  { %571 = vmatpush.bf16.msrb.mxu1 %v2962_v45  ;;  %597 = vmatpush.bf16.msrb.mxu3 %v2970_v49  ;;  %v2910_v16 = vor.u32 %v3829_v12, %v2909_v11  ;;  %v2911_v17 = vld [vmem:[%s5980_s2 + $0x90] sm:$0xf0]  ;;  %v2917_v18 = vld [vmem:[%s5980_s2 + $0x88] sm:$0xf]  ;;  %v3830_v19 = vld [vmem:[%s5980_s2 + $0x94] sm:$0xf0] }
  0x27   :  { %v2914_v20 = vor.u32 %v3827_v15, %v2911_v17  ;;  %v2918_v21 = vor.u32 %v3830_v19, %v2917_v18  ;;  %v3828_v22 = vld [vmem:[%s5980_s2 + $0x8c] sm:$0xf]  ;;  %v2919_v23 = vld [vmem:[%s5980_s2 + $0x98] sm:$0xf0]  ;;  %v2893_v27 = vld [vmem:[%s5980_s2 + $0x60] sm:$0xf] }
  0x28   :  { %261 = vmatmul.bf16.vlgmr.msra.gmra.mxu2 %v4211_v36  ;;  %v2922_v25 = vor.u32 %v3828_v22, %v2919_v23  ;;  %v3825_v28 = vld [vmem:[%s5980_s2 + $0x6c] sm:$0xf0]  ;;  %v3823_v29 = vld [vmem:[%s5980_s2 + $0x64] sm:$0xf]  ;;  %v2895_v31 = vld [vmem:[%s5980_s2 + $0x70] sm:$0xf0] }
  0x29   :  { %584 = vmatpush.bf16.msrb.mxu2 %v2966_v46  ;;  %559 = vmatpush.bf16.msrb.mxu0 %v2942_v53  ;;  %v2894_v30 = vor.u32 %v3825_v28, %v2893_v27  ;;  %v2901_v32 = vld [vmem:[%s5980_s2 + $0x68] sm:$0xf]  ;;  %v3826_v33 = vld [vmem:[%s5980_s2 + $0x74] sm:$0xf0]  ;;  %v2898_v35 = vor.u32 %v3823_v29, %v2895_v31  ;;  %v2903_v38 = vld [vmem:[%s5980_s2 + $0x78] sm:$0xf0] }
  0x2a   :  { %2341 = vperm.xlu0 %4040, %v2339_v37   ;;  %572 = vmatpush.bf16.msrb.mxu1 %v2946_v57  ;;  %v2902_v36 = vor.u32 %v3826_v33, %v2901_v32  ;;  %v3824_v37 = vld [vmem:[%s5980_s2 + $0x6c] sm:$0xf]  ;;  %v2877_v44 = vld [vmem:[%s5980_s2 + $0x40] sm:$0xf]  ;;  %v3821_v45 = vld [vmem:[%s5980_s2 + $0x4c] sm:$0xf0] }
  0x2b   :  { %598 = vmatpush.bf16.msrb.mxu3 %v2954_v61  ;;  %v4577_v41 = vld [vmem:[%s5979_s1 + $0x8] sm:$0xff]  ;;  %v2906_v42 = vor.u32 %v3824_v37, %v2903_v38  ;;  %v3819_v46 = vld [vmem:[%s5980_s2 + $0x44] sm:$0xf]  ;;  %v2878_v48 = vor.u32 %v3821_v45, %v2877_v44  ;;  %v2879_v49 = vld [vmem:[%s5980_s2 + $0x50] sm:$0xf0]  ;;  %vm3242_vm2 = vcmp.gt.s32.totalorder %v4411_v14, 3 }
  0x2c   :  { %v33_v51 = vunpack.c.h.bf16 %v4577_v41  ;;  %v2882_v52 = vor.u32 %v3819_v46, %v2879_v49  ;;  %v2885_v53 = vld [vmem:[%s5980_s2 + $0x48] sm:$0xf]  ;;  %v3822_v54 = vld [vmem:[%s5980_s2 + $0x54] sm:$0xf0]  ;;  %v3820_v56 = vld [vmem:[%s5980_s2 + $0x4c] sm:$0xf] }
  0x2d   :  { %585 = vmatpush.bf16.msrb.mxu2 %v2950_v58  ;;  %560 = vmatpush.bf16.msrb.mxu0 %v2926_v1  ;;  %v2886_v55 = vor.u32 %v3822_v54, %v2885_v53  ;;  %v2887_v57 = vld [vmem:[%s5980_s2 + $0x58] sm:$0xf0]  ;;  %v2861_v59 = vld [vmem:[%s5980_s2 + $0x20] sm:$0xf]  ;;  %v3817_v60 = vld [vmem:[%s5980_s2 + $0x2c] sm:$0xf0] }
  0x2e   :  { %573 = vmatpush.bf16.msrb.mxu1 %v2930_v5  ;;  %v2890_v58 = vor.u32 %v3820_v56, %v2887_v57  ;;  %v3815_v61 = vld [vmem:[%s5980_s2 + $0x24] sm:$0xf]  ;;  %v2862_v63 = vor.u32 %v3817_v60, %v2861_v59  ;;  %v2863_v0 = vld [vmem:[%s5980_s2 + $0x30] sm:$0xf0]  ;;  %v2869_v1 = vld [vmem:[%s5980_s2 + $0x28] sm:$0xf] }
  0x2f   :  { %599 = vmatpush.bf16.msrb.mxu3 %v2938_v10  ;;  %v3818_v2 = vld [vmem:[%s5980_s2 + $0x34] sm:$0xf0]  ;;  %v2866_v5 = vor.u32 %v3815_v61, %v2863_v0  ;;  %v3816_v7 = vld [vmem:[%s5980_s2 + $0x2c] sm:$0xf]  ;;  %v2871_v8 = vld [vmem:[%s5980_s2 + $0x38] sm:$0xf0] }
  0x30   :  { %v2874_v10 = vor.u32 %v3816_v7, %v2871_v8  ;;  %v2845_v12 = vld [vmem:[%s5980_s2] sm:$0xf]  ;;  %v3813_v15 = vld [vmem:[%s5980_s2 + $0xc] sm:$0xf0]  ;;  %v3811_v19 = vld [vmem:[%s5980_s2 + $0x4] sm:$0xf] }
  0x31   :  { %586 = vmatpush.bf16.msrb.mxu2 %v2934_v6  ;;  %561 = vmatpush.bf16.msrb.mxu0 %v2910_v16  ;;  %v2870_v6 = vor.u32 %v3818_v2, %v2869_v1  ;;  %v2846_v18 = vor.u32 %v3813_v15, %v2845_v12  ;;  %v3812_v28 = vld [vmem:[%s5980_s2 + $0xc] sm:$0xf]  ;;  %v2855_v29 = vld [vmem:[%s5980_s2 + $0x18] sm:$0xf0]  ;;  %v3091_v15 = vld [vmem:[%s5980_s2 + $0xe0] sm:$0xf] }
  0x32   :  { %574 = vmatpush.bf16.msrb.mxu1 %v2914_v20  ;;  %v2847_v20 = vld [vmem:[%s5980_s2 + $0x10] sm:$0xf0]  ;;  %v2858_v32 = vor.u32 %v3812_v28, %v2855_v29  ;;  %v3869_v28 = vld [vmem:[%s5980_s2 + $0xcc] sm:$0xf0]  ;;  %v3867_v29 = vld [vmem:[%s5980_s2 + $0xc4] sm:$0xf] }
  0x33   :  { %600 = vmatpush.bf16.msrb.mxu3 %v2922_v25  ;;  %s4212_s12 = smov [#allocation2]   ;;  %s2689_s16 = sshll.u32 %s5981_s3, 4  ;;  %s2690_s16 = int_to_ptr.hbm [resolvable:$true] %s2689_s16 }
  0x34   :  { %s2687_s13 = sshll.u32 %s4212_s12, 4  ;;  %s4213_s18 = smov 128   ;;  %s2688_s13 = int_to_ptr.vmem [resolvable:$true] %s2687_s13 }
  0x35   :  { %587 = vmatpush.bf16.msrb.mxu2 %v2918_v21  ;;  %562 = vmatpush.bf16.msrb.mxu0 %v2894_v30  ;;  %v2853_v21 = vld [vmem:[%s5980_s2 + $0x8] sm:$0xf]  ;;  %v32_v30 = vunpack.c.l.bf16 %v4577_v41  ;;  %s4214_s19 = smov 8  }
  0x36   :  { %575 = vmatpush.bf16.msrb.mxu1 %v2898_v35 }
  0x37   :  { %601 = vmatpush.bf16.msrb.mxu3 %v2906_v42 }
  0x39   :  { %588 = vmatpush.bf16.msrb.mxu2 %v2902_v36  ;;  %563 = vmatpush.bf16.msrb.mxu0 %v2878_v48 }
  0x3a   :  { %576 = vmatpush.bf16.msrb.mxu1 %v2882_v52 }
  0x3b   :  { %602 = vmatpush.bf16.msrb.mxu3 %v2890_v58 }
  0x3d   :  { %589 = vmatpush.bf16.msrb.mxu2 %v2886_v55  ;;  %564 = vmatpush.bf16.msrb.mxu0 %v2862_v63 }
  0x3e   :  { %577 = vmatpush.bf16.msrb.mxu1 %v2866_v5 }
  0x3f   :  { %603 = vmatpush.bf16.msrb.mxu3 %v2874_v10 }
  0x41   :  { %590 = vmatpush.bf16.msrb.mxu2 %v2870_v6  ;;  %565 = vmatpush.bf16.msrb.mxu0 %v2846_v18 }
  0x43   :  { %604 = vmatpush.bf16.msrb.mxu3 %v2858_v32  ;;  %v3083_v32 = vld [vmem:[%s5980_s2 + $0xc8] sm:$0xf] }
  0xa0   :  { %v236_v34 = vpop.f32.mrf.mxu0 }
  0xa1   :  { %v279_v39 = vadd.f32 %v236_v34, %v30_v24  ;;  %v249_v40 = vpop.f32.mrf.mxu1  ;;  %v3814_v24 = vld [vmem:[%s5980_s2 + $0x14] sm:$0xf0] }
  0xa2   :  { %v280_v43 = vadd.f32 %v249_v40, %v31_v26  ;;  %v2850_v26 = vor.u32 %v3811_v19, %v2847_v20  ;;  %v2854_v27 = vor.u32 %v3814_v24, %v2853_v21  ;;  %v3093_v19 = vld [vmem:[%s5980_s2 + $0xf0] sm:$0xf0]  ;;  %v3099_v20 = vld [vmem:[%s5980_s2 + $0xe8] sm:$0xf]  ;;  %v3874_v21 = vld [vmem:[%s5980_s2 + $0xf4] sm:$0xf0] }
  0xa3   :  { %v2837_v47 = vmul.f32 -1.442695, %v279_v39  ;;  %v3872_v24 = vld [vmem:[%s5980_s2 + $0xec] sm:$0xf] }
  0xa4   :  { %v2838_v50 = vmul.f32 -1.442695, %v280_v43  ;;  %578 = vmatpush.bf16.msrb.mxu1 %v2850_v26  ;;  %591 = vmatpush.bf16.msrb.mxu2 %v2854_v27  ;;  %v3075_v27 = vld [vmem:[%s5980_s2 + $0xc0] sm:$0xf] }
  0xa5   :  { %4043 = vpow2.f32 %v2837_v47 }
  0xa6   :  { %4045 = vpow2.f32 %v2838_v50 }
  0xa7   :  { %v275_v62 = vpop.f32.mrf.mxu3 }
  0xa8   :  { %v282_v3 = vadd.f32 %v275_v62, %v33_v51  ;;  %v238_v4 = vpop.f32.mrf.mxu0  ;;  %v351_v62 = vpop.permute.xlu0 %350 }
  0xa9   :  { %v251_v9 = vpop.f32.mrf.mxu1  ;;  %vm352_vm11 = vcmp.eq.s32.totalorder %v351_v62, 1 }
  0xaa   :  { %v2839_v11 = vmul.f32 -1.442695, %v282_v3  ;;  %vm4172_vm0 = vmpackc.low %vm352_vm11, %vm352_vm11 }
  0xab   :  { %v4044_v16 = vpop.eup %4043  ;;  %v262_v17 = vpop.f32.mrf.mxu2 }
  0xac   :  { %v4046_v22 = vpop.eup %4045  ;;  %v286_v23 = vadd.f32 1.0, %v4044_v16  ;;  %4047 = vpow2.f32 %v2839_v11  ;;  %v281_v34 = vadd.f32 %v262_v17, %v32_v30  ;;  %v3873_v16 = vld [vmem:[%s5980_s2 + $0xec] sm:$0xf0]  ;;  %v3871_v17 = vld [vmem:[%s5980_s2 + $0xe4] sm:$0xf]  ;;  %v3076_v30 = vor.u32 %v3869_v28, %v3075_v27 }
  0xad   :  { %v305_v25 = vadd.f32 1.0, %v4046_v22  ;;  %v3092_v18 = vor.u32 %v3873_v16, %v3091_v15  ;;  %v3096_v22 = vor.u32 %v3871_v17, %v3093_v19  ;;  %v4782_v17 = vld [vmem:[%s5979_s1 + $0x18] sm:$0xff]  ;;  %v3853_v27 = vld [vmem:[%s5980_s2 + $0x4c] sm:$0xf0]  ;;  %v3851_v28 = vld [vmem:[%s5980_s2 + $0x44] sm:$0xf] }
  0xae   :  { %4049 = vrcp.f32 %v286_v23  ;;  %v298_v44 = vand.u32 2147483648, %v286_v23  ;;  %v296_v45 = vand.u32 2147483647, %v286_v23  ;;  %vm292_vm5 = vweird.f32 %v286_v23 }
  0xaf   :  { %4051 = vrcp.f32 %v305_v25  ;;  %v277_v31 = vpop.f32.mrf.mxu3  ;;  %v317_v46 = vand.u32 2147483648, %v305_v25  ;;  %v315_v48 = vand.u32 2147483647, %v305_v25  ;;  %vm311_vm7 = vweird.f32 %v305_v25  ;;  %890 = vmatpush.bf16.msra.mxu0 %v3092_v18  ;;  %903 = vmatpush.bf16.msra.mxu1 %v3096_v22 }
  0xb0   :  { %v299_v53 = vor.u32 1.1754944e-38, %v298_v44  ;;  %vm297_vm8 = vcmp.eq.f32.partialorder %v296_v45, 8.507059e+37  ;;  %v3077_v31 = vld [vmem:[%s5980_s2 + $0xd0] sm:$0xf0]  ;;  %v3866_v45 = vld [vmem:[%s5980_s2 + $0xb4] sm:$0xf0] }
  0xb1   :  { %v318_v56 = vor.u32 1.1754944e-38, %v317_v46  ;;  %vm316_vm10 = vcmp.eq.f32.partialorder %v315_v48, 8.507059e+37  ;;  %v3061_v44 = vld [vmem:[%s5980_s2 + $0xb0] sm:$0xf0]  ;;  %v3864_v48 = vld [vmem:[%s5980_s2 + $0xac] sm:$0xf] }
  0xb2   :  { %v4048_v33 = vpop.eup %4047 }
  0xb3   :  { %v325_v35 = vadd.f32 1.0, %v4048_v33  ;;  %v264_v36 = vpop.f32.mrf.mxu2  ;;  %v3870_v33 = vld [vmem:[%s5980_s2 + $0xd4] sm:$0xf0]  ;;  %891 = vmatpush.bf16.msra.mxu0 %v3076_v30 }
  0xb4   :  { %v4050_v37 = vpop.eup %4049  ;;  %v3868_v36 = vld [vmem:[%s5980_s2 + $0xcc] sm:$0xf] }
  0xb5   :  { %v4052_v38 = vpop.eup %4051  ;;  %v288_v39 = vmul.f32 %v4050_v37, %v286_v23  ;;  %4053 = vrcp.f32 %v325_v35  ;;  %vm293_vm3 = vweird.f32 %v4050_v37  ;;  %v337_v3 = vand.u32 2147483648, %v325_v35 }
  0xb6   :  { %v307_v40 = vmul.f32 %v4052_v38, %v305_v25  ;;  %4055 = vtanh.f32 %v281_v34  ;;  %vm312_vm4 = vweird.f32 %v4052_v38  ;;  %vm294_vm6 = vmor %vm292_vm5, %vm293_vm3  ;;  %vm331_vm13 = vweird.f32 %v325_v35  ;;  %v3101_v25 = vld [vmem:[%s5980_s2 + $0xf8] sm:$0xf0] }
  0xb7   :  { %v289_v42 = vsub.f32 1.0, %v288_v39  ;;  %vm313_vm9 = vmor %vm311_vm7, %vm312_vm4  ;;  %v335_v5 = vand.u32 2147483647, %v325_v35  ;;  %v338_v7 = vor.u32 1.1754944e-38, %v337_v3  ;;  %v3100_v23 = vor.u32 %v3874_v21, %v3099_v20  ;;  %v3059_v39 = vld [vmem:[%s5980_s2 + $0xa0] sm:$0xf] }
  0xb8   :  { %v308_v43 = vsub.f32 1.0, %v307_v40  ;;  %v3104_v26 = vor.u32 %v3872_v24, %v3101_v25  ;;  %v3080_v34 = vor.u32 %v3867_v29, %v3077_v31  ;;  %v3865_v40 = vld [vmem:[%s5980_s2 + $0xac] sm:$0xf0]  ;;  %v3856_v20 = vld [vmem:[%s5980_s2 + $0x6c] sm:$0xf] }
  0xb9   :  { %v290_v41 = vmul.f32 %v4050_v37, %v289_v42  ;;  %vm336_vm15 = vcmp.eq.f32.partialorder %v335_v5, 8.507059e+37  ;;  %916 = vmatpush.bf16.msra.mxu2 %v3100_v23  ;;  %v3863_v42 = vld [vmem:[%s5980_s2 + $0xa4] sm:$0xf]  ;;  %v3857_v3 = vld [vmem:[%s5980_s2 + $0x6c] sm:$0xf0] }
  0xba   :  { %v309_v47 = vmul.f32 %v4052_v38, %v308_v43  ;;  %929 = vmatpush.bf16.msra.mxu3 %v3104_v26  ;;  %904 = vmatpush.bf16.msra.mxu1 %v3080_v34  ;;  %v3060_v43 = vor.u32 %v3865_v40, %v3059_v39  ;;  %v3064_v46 = vor.u32 %v3863_v42, %v3061_v44  ;;  %v3855_v5 = vld [vmem:[%s5980_s2 + $0x64] sm:$0xf]  ;;  %v3037_v21 = vld [vmem:[%s5980_s2 + $0x78] sm:$0xf0]  ;;  %v3011_v25 = vld [vmem:[%s5980_s2 + $0x40] sm:$0xf]  ;;  %v364_v26 = vunpack.c.h.bf16 %v4782_v17 }
  0xbb   :  { %v4054_v49 = vpop.eup %4053  ;;  %v291_v50 = vadd.f32 %v4050_v37, %v290_v41  ;;  %v3067_v41 = vld [vmem:[%s5980_s2 + $0xa8] sm:$0xf]  ;;  %v3040_v22 = vor.u32 %v3856_v20, %v3037_v21  ;;  %v3013_v29 = vld [vmem:[%s5980_s2 + $0x50] sm:$0xf0]  ;;  %v3012_v30 = vor.u32 %v3853_v27, %v3011_v25  ;;  %v3852_v34 = vld [vmem:[%s5980_s2 + $0x4c] sm:$0xf] }
  0xbc   :  { %v4056_v51 = vpop.eup %4055  ;;  %v327_v52 = vmul.f32 %v4054_v49, %v325_v35  ;;  %v310_v54 = vadd.f32 %v4052_v38, %v309_v47  ;;  %vm332_vm12 = vweird.f32 %v4054_v49  ;;  %v3084_v35 = vor.u32 %v3870_v33, %v3083_v32  ;;  %892 = vmatpush.bf16.msra.mxu0 %v3060_v43  ;;  %v3019_v32 = vld [vmem:[%s5980_s2 + $0x48] sm:$0xf]  ;;  %v3854_v33 = vld [vmem:[%s5980_s2 + $0x54] sm:$0xf0]  ;;  %v3847_v44 = vld [vmem:[%s5980_s2 + $0x24] sm:$0xf] }
  0xbd   :  { %v295_v55 = vsel %vm294_vm6, %v4050_v37, %v291_v50  ;;  %vm333_vm14 = vmor %vm331_vm13, %vm332_vm12  ;;  %v3085_v37 = vld [vmem:[%s5980_s2 + $0xd8] sm:$0xf0]  ;;  %v3068_v47 = vor.u32 %v3866_v45, %v3067_v41  ;;  %v2841_v50 = vld [vmem:[%s5979_s1 + $0x10] sm:$0xff]  ;;  %v3016_v31 = vor.u32 %v3851_v28, %v3013_v29 }
  0xbe   :  { %v328_v57 = vsub.f32 1.0, %v327_v52  ;;  %v300_v58 = vsel %vm297_vm8, %v299_v53, %v295_v55  ;;  %v314_v59 = vsel %vm313_vm9, %v4052_v38, %v310_v54  ;;  %v3088_v38 = vor.u32 %v3868_v36, %v3085_v37  ;;  %917 = vmatpush.bf16.msra.mxu2 %v3084_v35  ;;  %905 = vmatpush.bf16.msra.mxu1 %v3064_v46  ;;  %v3043_v52 = vld [vmem:[%s5980_s2 + $0x80] sm:$0xf]  ;;  %v3861_v53 = vld [vmem:[%s5980_s2 + $0x8c] sm:$0xf0] }
  0xbf   :  { %v342_v60 = vmul.f32 %v4056_v51, %v300_v58  ;;  %v319_v61 = vsel %vm316_vm10, %v318_v56, %v314_v59  ;;  %v3859_v54 = vld [vmem:[%s5980_s2 + $0x84] sm:$0xf]  ;;  %v3044_v55 = vor.u32 %v3861_v53, %v3043_v52  ;;  %v3045_v56 = vld [vmem:[%s5980_s2 + $0x90] sm:$0xf0]  ;;  %v3862_v58 = vld [vmem:[%s5980_s2 + $0x94] sm:$0xf0]  ;;  %v361_v59 = vunpack.c.l.bf16 %v2841_v50 }
  0xc0   :  { %v329_v63 = vmul.f32 %v4054_v49, %v328_v57  ;;  %v341_v0 = vmul.f32 0.0, %v319_v61  ;;  %930 = vmatpush.bf16.msra.mxu3 %v3088_v38  ;;  %v3051_v57 = vld [vmem:[%s5980_s2 + $0x88] sm:$0xf]  ;;  %v3048_v61 = vor.u32 %v3859_v54, %v3045_v56  ;;  %v3020_v35 = vor.u32 %v3854_v33, %v3019_v32  ;;  %v3021_v36 = vld [vmem:[%s5980_s2 + $0x58] sm:$0xf0] }
  0xc1   :  { %v3052_v62 = vor.u32 %v3862_v58, %v3051_v57  ;;  %893 = vmatpush.bf16.msra.mxu0 %v3044_v55  ;;  %v2995_v37 = vld [vmem:[%s5980_s2 + $0x20] sm:$0xf]  ;;  %v3849_v38 = vld [vmem:[%s5980_s2 + $0x2c] sm:$0xf0]  ;;  %v3024_v42 = vor.u32 %v3852_v34, %v3021_v36  ;;  %v2997_v41 = vld [vmem:[%s5980_s2 + $0x30] sm:$0xf0] }
  0xc2   :  { %v343_v1 = vadd.f32 %v342_v60, %v341_v0  ;;  %v330_v2 = vadd.f32 %v4054_v49, %v329_v63  ;;  %918 = vmatpush.bf16.msra.mxu2 %v3068_v47  ;;  %v362_v60 = vunpack.c.h.bf16 %v2841_v50  ;;  %v3860_v63 = vld [vmem:[%s5980_s2 + $0x8c] sm:$0xf]  ;;  %v3053_v0 = vld [vmem:[%s5980_s2 + $0x98] sm:$0xf0]  ;;  %906 = vmatpush.bf16.msra.mxu1 %v3048_v61  ;;  %v2996_v43 = vor.u32 %v3849_v38, %v2995_v37  ;;  %v3003_v45 = vld [vmem:[%s5980_s2 + $0x28] sm:$0xf] }
  0xc3   :  { %v3850_v50 = vld [vmem:[%s5980_s2 + $0x34] sm:$0xf0]  ;;  %v3005_v52 = vld [vmem:[%s5980_s2 + $0x38] sm:$0xf0]  ;;  %v2979_v55 = vld [vmem:[%s5980_s2] sm:$0xf] }
  0xc4   :  { %4057 = vtanh.f32 %v343_v1  ;;  %v4654_v4 = vsel %vm352_vm11, %v343_v1, 0.0  ;;  %v334_v6 = vsel %vm333_vm14, %v4054_v49, %v330_v2  ;;  %v3069_v49 = vld [vmem:[%s5980_s2 + $0xb8] sm:$0xf0]  ;;  %v3056_v1 = vor.u32 %v3860_v63, %v3053_v0  ;;  %v3027_v2 = vld [vmem:[%s5980_s2 + $0x60] sm:$0xf] }
  0xc5   :  { %v339_v9 = vsel %vm336_vm15, %v338_v7, %v334_v6  ;;  %v3072_v51 = vor.u32 %v3864_v48, %v3069_v49  ;;  %v3000_v49 = vor.u32 %v3847_v44, %v2997_v41  ;;  %v3004_v53 = vor.u32 %v3850_v50, %v3003_v45  ;;  %v3845_v56 = vld [vmem:[%s5980_s2 + $0xc] sm:$0xf0]  ;;  %v3843_v57 = vld [vmem:[%s5980_s2 + $0x4] sm:$0xf]  ;;  %v3846_v0 = vld [vmem:[%s5980_s2 + $0x14] sm:$0xf0] }
  0xc6   :  { %919 = vmatpush.bf16.msra.mxu2 %v3052_v62  ;;  %v2980_v62 = vor.u32 %v3845_v56, %v2979_v55  ;;  %vm3778_vm10 = vcmp.gt.s32.totalorder %v4411_v14, 7 }
  0xc7   :  { %931 = vmatpush.bf16.msra.mxu3 %v3072_v51  ;;  %v3848_v51 = vld [vmem:[%s5980_s2 + $0x2c] sm:$0xf] }
  0xc8   :  { %v3008_v54 = vor.u32 %v3848_v51, %v3005_v52 }
  0xca   :  { %v4058_v8 = vpop.eup %4057 }
  0xcb   :  { %v345_v10 = vmul.f32 %v4058_v8, %v339_v9  ;;  %932 = vmatpush.bf16.msra.mxu3 %v3056_v1  ;;  %v3028_v8 = vor.u32 %v3857_v3, %v3027_v2  ;;  %v3029_v9 = vld [vmem:[%s5980_s2 + $0x70] sm:$0xf0]  ;;  %v3844_v1 = vld [vmem:[%s5980_s2 + $0xc] sm:$0xf]  ;;  %v2989_v2 = vld [vmem:[%s5980_s2 + $0x18] sm:$0xf0] }
  0xcc   :  { %v3032_v18 = vor.u32 %v3855_v5, %v3029_v9 }
  0xcd   :  { %v4657_v11 = vsel %vm352_vm11, %v345_v10, 0.0  ;;  %v4173_v12 = vpack.c.bf16 %v345_v10, %v345_v10  ;;  %v3035_v10 = vld [vmem:[%s5980_s2 + $0x68] sm:$0xf]  ;;  %894 = vmatpush.bf16.msra.mxu0 %v3028_v8  ;;  %v2992_v8 = vor.u32 %v3844_v1, %v2989_v2  ;;  %v3906_v1 = vld [vmem:[%s5980_s2 + $0xf4] sm:$0xf0] }
  0xce   :  { %356 = vst [vmem:[#allocation2] sm:$0xff] %v4657_v11  ;;  %907 = vmatpush.bf16.msra.mxu1 %v3032_v18 }
  0xcf   :  { %4174 = vmatmul.msk.bf16.vlgmr.msrb.gmra.mxu0 %vm4172_vm0, %v4173_v12  ;;  %4177 = vmatmul.msk.bf16.vlgmr.msrb.gmra.mxu1 %vm4172_vm0, %v4173_v12 }
  0xd0   :  { %4180 = vmatmul.msk.bf16.vlgmr.msrb.gmra.mxu2 %vm4172_vm0, %v4173_v12  ;;  %4183 = vmatmul.msk.bf16.vlgmr.msrb.gmra.mxu3 %vm4172_vm0, %v4173_v12  ;;  %v3858_v12 = vld [vmem:[%s5980_s2 + $0x74] sm:$0xf0] }
  0xd1   :  { %v3036_v19 = vor.u32 %v3858_v12, %v3035_v10  ;;  %933 = vmatpush.bf16.msra.mxu3 %v3040_v22  ;;  %895 = vmatpush.bf16.msra.mxu0 %v3012_v30  ;;  %v363_v12 = vunpack.c.l.bf16 %v4782_v17 }
  0xd2   :  { %908 = vmatpush.bf16.msra.mxu1 %v3016_v31 }
  0xd3   :  { %920 = vmatpush.bf16.msra.mxu2 %v3036_v19 }
  0xd5   :  { %934 = vmatpush.bf16.msra.mxu3 %v3024_v42  ;;  %896 = vmatpush.bf16.msra.mxu0 %v2996_v43 }
  0xd6   :  { %909 = vmatpush.bf16.msra.mxu1 %v3000_v49 }
  0xd7   :  { %921 = vmatpush.bf16.msra.mxu2 %v3020_v35 }
  0xd9   :  { %935 = vmatpush.bf16.msra.mxu3 %v3008_v54  ;;  %897 = vmatpush.bf16.msra.mxu0 %v2980_v62 }
  0xdb   :  { %922 = vmatpush.bf16.msra.mxu2 %v3004_v53 }
  0xdd   :  { %936 = vmatpush.bf16.msra.mxu3 %v2992_v8  ;;  %v3209_v8 = vld [vmem:[%s5980_s2 + $0xc0] sm:$0xf] }
 0x14c   :  { %v567_v6 = vpop.f32.mrf.mxu0  ;;  %v580_v7 = vpop.f32.mrf.mxu1 }
 0x14d   :  { %v610_v15 = vadd.f32 %v567_v6, %v361_v59  ;;  %v611_v16 = vadd.f32 %v580_v7, %v362_v60  ;;  %v2981_v59 = vld [vmem:[%s5980_s2 + $0x10] sm:$0xf0]  ;;  %v2987_v60 = vld [vmem:[%s5980_s2 + $0x8] sm:$0xf] }
 0x14e   :  { %v2984_v63 = vor.u32 %v3843_v57, %v2981_v59  ;;  %v2988_v6 = vor.u32 %v3846_v0, %v2987_v60  ;;  %v3225_v60 = vld [vmem:[%s5980_s2 + $0xe0] sm:$0xf]  ;;  %v3233_v0 = vld [vmem:[%s5980_s2 + $0xe8] sm:$0xf] }
 0x14f   :  { %v2971_v23 = vmul.f32 -1.442695, %v610_v15  ;;  %v2972_v24 = vmul.f32 -1.442695, %v611_v16  ;;  %v1011_v16 = vsel %vm3108_vm1, 1, %v4210_v13 }
 0x150   :  { %910 = vmatpush.bf16.msra.mxu1 %v2984_v63  ;;  %923 = vmatpush.bf16.msra.mxu2 %v2988_v6  ;;  %v3227_v63 = vld [vmem:[%s5980_s2 + $0xf0] sm:$0xf0]  ;;  %v3235_v6 = vld [vmem:[%s5980_s2 + $0xf8] sm:$0xf0] }
 0x151   :  { %4059 = vpow2.f32 %v2971_v23  ;;  %1013 = vperm.xlu1 %4041, %v1011_v16   ;;  %v3217_v16 = vld [vmem:[%s5980_s2 + $0xc8] sm:$0xf] }
 0x152   :  { %4061 = vpow2.f32 %v2972_v24 }
 0x153   :  { %v593_v39 = vpop.f32.mrf.mxu2  ;;  %v606_v40 = vpop.f32.mrf.mxu3 }
 0x154   :  { %v613_v46 = vadd.f32 %v606_v40, %v364_v26  ;;  %v569_v47 = vpop.f32.mrf.mxu0  ;;  %v582_v48 = vpop.f32.mrf.mxu1  ;;  %v612_v20 = vadd.f32 %v593_v39, %v363_v12  ;;  %v1343_v26 = vsel %vm3242_vm2, 1, %v4210_v13 }
 0x155   :  { %v2671_v47 = vsel %vm3778_vm10, 1, %v4210_v13  ;;  %v682_v48 = vpop.permute.xlu0 %681 }
 0x156   :  { %v2973_v58 = vmul.f32 -1.442695, %v613_v46  ;;  %vm683_vm12 = vcmp.eq.s32.totalorder %v682_v48, 1  ;;  %v3187_v48 = vld [vmem:[%s5980_s2 + $0x98] sm:$0xf0] }
 0x157   :  { %v4060_v61 = vpop.eup %4059 }
 0x158   :  { %v4062_v3 = vpop.eup %4061  ;;  %v617_v5 = vadd.f32 1.0, %v4060_v61  ;;  %4063 = vpow2.f32 %v2973_v58  ;;  %v3905_v61 = vld [vmem:[%s5980_s2 + $0xec] sm:$0xf0] }
 0x159   :  { %v636_v7 = vadd.f32 1.0, %v4062_v3  ;;  %1345 = vperm.xlu1 %4041, %v1343_v26   ;;  %v3226_v62 = vor.u32 %v3905_v61, %v3225_v60  ;;  %v3234_v3 = vor.u32 %v3906_v1, %v3233_v0  ;;  %v5002_v61 = vld [vmem:[%s5979_s1 + $0x28] sm:$0xff]  ;;  %v3171_v0 = vld [vmem:[%s5980_s2 + $0x78] sm:$0xf0] }
 0x15a   :  { %4065 = vrcp.f32 %v617_v5  ;;  %v629_v17 = vand.u32 2147483648, %v617_v5  ;;  %v627_v29 = vand.u32 2147483647, %v617_v5  ;;  %vm623_vm5 = vweird.f32 %v617_v5 }
 0x15b   :  { %4067 = vrcp.f32 %v636_v7  ;;  %v595_v9 = vpop.f32.mrf.mxu2  ;;  %v608_v10 = vpop.f32.mrf.mxu3  ;;  %v648_v27 = vand.u32 2147483648, %v636_v7  ;;  %v646_v31 = vand.u32 2147483647, %v636_v7  ;;  %vm642_vm6 = vweird.f32 %v636_v7  ;;  %1222 = vmatpush.bf16.msrb.mxu0 %v3226_v62  ;;  %1248 = vmatpush.bf16.msrb.mxu2 %v3234_v3 }
 0x15c   :  { %v630_v34 = vor.u32 1.1754944e-38, %v629_v17  ;;  %vm628_vm9 = vcmp.eq.f32.partialorder %v627_v29, 8.507059e+37  ;;  %v3901_v9 = vld [vmem:[%s5980_s2 + $0xcc] sm:$0xf0]  ;;  %v3899_v10 = vld [vmem:[%s5980_s2 + $0xc4] sm:$0xf] }
 0x15d   :  { %v649_v37 = vor.u32 1.1754944e-38, %v648_v27  ;;  %vm647_vm11 = vcmp.eq.f32.partialorder %v646_v31, 8.507059e+37  ;;  %v3210_v12 = vor.u32 %v3901_v9, %v3209_v8  ;;  %v3895_v17 = vld [vmem:[%s5980_s2 + $0xa4] sm:$0xf]  ;;  %v3195_v27 = vld [vmem:[%s5980_s2 + $0xb0] sm:$0xf0] }
 0x15e   :  { %v4064_v15 = vpop.eup %4063  ;;  %v3898_v29 = vld [vmem:[%s5980_s2 + $0xb4] sm:$0xf0]  ;;  %v3883_v8 = vld [vmem:[%s5980_s2 + $0x44] sm:$0xf] }
 0x15f   :  { %v656_v18 = vadd.f32 1.0, %v4064_v15  ;;  %v3211_v15 = vld [vmem:[%s5980_s2 + $0xd0] sm:$0xf0]  ;;  %1223 = vmatpush.bf16.msrb.mxu0 %v3210_v12  ;;  %v3153_v12 = vld [vmem:[%s5980_s2 + $0x48] sm:$0xf] }
 0x160   :  { %v4066_v19 = vpop.eup %4065 }
 0x161   :  { %v4068_v21 = vpop.eup %4067  ;;  %v619_v22 = vmul.f32 %v4066_v19, %v617_v5  ;;  %4069 = vrcp.f32 %v656_v18  ;;  %vm624_vm3 = vweird.f32 %v4066_v19  ;;  %2673 = vperm.xlu1 %4041, %v2671_v47   ;;  %v668_v14 = vand.u32 2147483648, %v656_v18  ;;  %v3904_v5 = vld [vmem:[%s5980_s2 + $0xec] sm:$0xf] }
 0x162   :  { %v638_v23 = vmul.f32 %v4068_v21, %v636_v7  ;;  %4071 = vtanh.f32 %v612_v20  ;;  %vm643_vm4 = vweird.f32 %v4068_v21  ;;  %vm625_vm7 = vmor %vm623_vm5, %vm624_vm3  ;;  %vm662_vm14 = vweird.f32 %v656_v18  ;;  %v3892_v47 = vld [vmem:[%s5980_s2 + $0x8c] sm:$0xf] }
 0x163   :  { %v620_v24 = vsub.f32 1.0, %v619_v22  ;;  %vm644_vm8 = vmor %vm642_vm6, %vm643_vm4  ;;  %v666_v52 = vand.u32 2147483647, %v656_v18  ;;  %v669_v54 = vor.u32 1.1754944e-38, %v668_v14  ;;  %v3238_v7 = vor.u32 %v3904_v5, %v3235_v6  ;;  %v3219_v22 = vld [vmem:[%s5980_s2 + $0xd8] sm:$0xf0] }
 0x164   :  { %v639_v25 = vsub.f32 1.0, %v638_v23  ;;  %v3889_v14 = vld [vmem:[%s5980_s2 + $0x6c] sm:$0xf0]  ;;  %v3145_v5 = vld [vmem:[%s5980_s2 + $0x40] sm:$0xf]  ;;  %v696_v6 = vunpack.c.h.bf16 %v5002_v61 }
 0x165   :  { %v621_v28 = vmul.f32 %v4066_v19, %v620_v24  ;;  %vm667_vm0 = vcmp.eq.f32.partialorder %v666_v52, 8.507059e+37  ;;  %1261 = vmatpush.bf16.msrb.mxu3 %v3238_v7  ;;  %v3193_v24 = vld [vmem:[%s5980_s2 + $0xa0] sm:$0xf]  ;;  %v3887_v52 = vld [vmem:[%s5980_s2 + $0x64] sm:$0xf] }
 0x166   :  { %v640_v30 = vmul.f32 %v4068_v21, %v639_v25  ;;  %v3897_v25 = vld [vmem:[%s5980_s2 + $0xac] sm:$0xf0] }
 0x167   :  { %v4070_v32 = vpop.eup %4069  ;;  %v622_v33 = vadd.f32 %v4066_v19, %v621_v28  ;;  %v3194_v26 = vor.u32 %v3897_v25, %v3193_v24  ;;  %v3201_v28 = vld [vmem:[%s5980_s2 + $0xa8] sm:$0xf]  ;;  %v3885_v7 = vld [vmem:[%s5980_s2 + $0x4c] sm:$0xf0]  ;;  %v3129_v24 = vld [vmem:[%s5980_s2 + $0x20] sm:$0xf] }
 0x168   :  { %v641_v35 = vadd.f32 %v4068_v21, %v640_v30  ;;  %v658_v36 = vmul.f32 %v4070_v32, %v656_v18  ;;  %v4072_v39 = vpop.eup %4071  ;;  %vm663_vm13 = vweird.f32 %v4070_v32  ;;  %v3902_v18 = vld [vmem:[%s5980_s2 + $0xd4] sm:$0xf0]  ;;  %v3198_v30 = vor.u32 %v3895_v17, %v3195_v27  ;;  %v3881_v25 = vld [vmem:[%s5980_s2 + $0x2c] sm:$0xf0]  ;;  %v3879_v17 = vld [vmem:[%s5980_s2 + $0x24] sm:$0xf] }
 0x169   :  { %v626_v38 = vsel %vm625_vm7, %v4066_v19, %v622_v33  ;;  %vm664_vm15 = vmor %vm662_vm14, %vm663_vm13  ;;  %v3214_v19 = vor.u32 %v3899_v10, %v3211_v15  ;;  %v3218_v20 = vor.u32 %v3902_v18, %v3217_v16  ;;  %v3202_v31 = vor.u32 %v3898_v29, %v3201_v28  ;;  %v3203_v33 = vld [vmem:[%s5980_s2 + $0xb8] sm:$0xf0]  ;;  %1224 = vmatpush.bf16.msrb.mxu0 %v3194_v26  ;;  %v3147_v10 = vld [vmem:[%s5980_s2 + $0x50] sm:$0xf0] }
 0x16a   :  { %v631_v40 = vsel %vm628_vm9, %v630_v34, %v626_v38  ;;  %v645_v42 = vsel %vm644_vm8, %v4068_v21, %v641_v35  ;;  %v659_v43 = vsub.f32 1.0, %v658_v36  ;;  %v3900_v21 = vld [vmem:[%s5980_s2 + $0xcc] sm:$0xf]  ;;  %v2975_v35 = vld [vmem:[%s5979_s1 + $0x20] sm:$0xff]  ;;  %v3146_v9 = vor.u32 %v3885_v7, %v3145_v5  ;;  %v3886_v15 = vld [vmem:[%s5980_s2 + $0x54] sm:$0xf0] }
 0x16b   :  { %v650_v44 = vsel %vm647_vm11, %v649_v37, %v645_v42  ;;  %v673_v41 = vmul.f32 %v4072_v39, %v631_v40  ;;  %v3222_v23 = vor.u32 %v3900_v21, %v3219_v22  ;;  %1249 = vmatpush.bf16.msrb.mxu2 %v3218_v20  ;;  %v3177_v36 = vld [vmem:[%s5980_s2 + $0x80] sm:$0xf]  ;;  %v3893_v37 = vld [vmem:[%s5980_s2 + $0x8c] sm:$0xf0]  ;;  %v3891_v38 = vld [vmem:[%s5980_s2 + $0x84] sm:$0xf]  ;;  %v3150_v16 = vor.u32 %v3883_v8, %v3147_v10 }
 0x16c   :  { %v672_v45 = vmul.f32 %v650_v44, %v4654_v4  ;;  %v660_v46 = vmul.f32 %v4070_v32, %v659_v43  ;;  %v3178_v39 = vor.u32 %v3893_v37, %v3177_v36  ;;  %v3179_v40 = vld [vmem:[%s5980_s2 + $0x90] sm:$0xf0]  ;;  %v3185_v42 = vld [vmem:[%s5980_s2 + $0x88] sm:$0xf]  ;;  %v3894_v43 = vld [vmem:[%s5980_s2 + $0x94] sm:$0xf0]  ;;  %v693_v44 = vunpack.c.l.bf16 %v2975_v35 }
 0x16d   :  { %1262 = vmatpush.bf16.msrb.mxu3 %v3222_v23  ;;  %v3154_v18 = vor.u32 %v3886_v15, %v3153_v12  ;;  %v3155_v20 = vld [vmem:[%s5980_s2 + $0x58] sm:$0xf0]  ;;  %v3130_v29 = vor.u32 %v3881_v25, %v3129_v24 }
 0x16e   :  { %v674_v49 = vadd.f32 %v673_v41, %v672_v45  ;;  %v661_v50 = vadd.f32 %v4070_v32, %v660_v46  ;;  %v694_v41 = vunpack.c.h.bf16 %v2975_v35  ;;  %v3182_v45 = vor.u32 %v3891_v38, %v3179_v40  ;;  %1225 = vmatpush.bf16.msrb.mxu0 %v3178_v39  ;;  %v3880_v35 = vld [vmem:[%s5980_s2 + $0x2c] sm:$0xf]  ;;  %v3139_v36 = vld [vmem:[%s5980_s2 + $0x38] sm:$0xf0]  ;;  %v3113_v40 = vld [vmem:[%s5980_s2] sm:$0xf] }
 0x16f   :  { %1250 = vmatpush.bf16.msrb.mxu2 %v3202_v31  ;;  %v3186_v46 = vor.u32 %v3894_v43, %v3185_v42  ;;  %v3137_v31 = vld [vmem:[%s5980_s2 + $0x28] sm:$0xf]  ;;  %v3142_v38 = vor.u32 %v3880_v35, %v3139_v36  ;;  %v3877_v42 = vld [vmem:[%s5980_s2 + $0xc] sm:$0xf0]  ;;  %v3875_v43 = vld [vmem:[%s5980_s2 + $0x4] sm:$0xf] }
 0x170   :  { %4073 = vtanh.f32 %v674_v49  ;;  %v4873_v51 = vsel %vm683_vm12, %v674_v49, %v4654_v4  ;;  %v665_v53 = vsel %vm664_vm15, %v4070_v32, %v661_v50  ;;  %v3896_v32 = vld [vmem:[%s5980_s2 + $0xac] sm:$0xf]  ;;  %v3190_v49 = vor.u32 %v3892_v47, %v3187_v48  ;;  %v3161_v50 = vld [vmem:[%s5980_s2 + $0x60] sm:$0xf] }
 0x171   :  { %v670_v56 = vsel %vm667_vm0, %v669_v54, %v665_v53  ;;  %v3206_v34 = vor.u32 %v3896_v32, %v3203_v33  ;;  %v3882_v32 = vld [vmem:[%s5980_s2 + $0x34] sm:$0xf0] }
 0x173   :  { %1263 = vmatpush.bf16.msrb.mxu3 %v3206_v34  ;;  %1251 = vmatpush.bf16.msrb.mxu2 %v3186_v46  ;;  %v3138_v34 = vor.u32 %v3882_v32, %v3137_v31  ;;  %v3115_v46 = vld [vmem:[%s5980_s2 + $0x10] sm:$0xf0] }
 0x174   :  { %v3118_v48 = vor.u32 %v3875_v43, %v3115_v46 }
 0x176   :  { %v4074_v55 = vpop.eup %4073 }
 0x177   :  { %v676_v57 = vmul.f32 %v4074_v55, %v670_v56  ;;  %1264 = vmatpush.bf16.msrb.mxu3 %v3190_v49  ;;  %v3162_v55 = vor.u32 %v3889_v14, %v3161_v50  ;;  %v3163_v56 = vld [vmem:[%s5980_s2 + $0x70] sm:$0xf0]  ;;  %v3121_v49 = vld [vmem:[%s5980_s2 + $0x8] sm:$0xf]  ;;  %v3878_v50 = vld [vmem:[%s5980_s2 + $0x14] sm:$0xf0] }
 0x178   :  { %v3876_v14 = vld [vmem:[%s5980_s2 + $0xc] sm:$0xf] }
 0x179   :  { %v4877_v58 = vsel %vm683_vm12, %v676_v57, %v4657_v11  ;;  %v686_v59 = vsel %vm683_vm12, %v676_v57, 0.0  ;;  %v3903_v11 = vld [vmem:[%s5980_s2 + $0xe4] sm:$0xf]  ;;  %v3169_v57 = vld [vmem:[%s5980_s2 + $0x68] sm:$0xf]  ;;  %1226 = vmatpush.bf16.msrb.mxu0 %v3162_v55  ;;  %v695_v55 = vunpack.c.l.bf16 %v5002_v61 }
 0x17a   :  { %688 = vst [vmem:[#allocation2 + $0x8] sm:$0xff] %v686_v59  ;;  %v697_v4 = vpack.c.bf16 %v4877_v58, %v4877_v58  ;;  %v3230_v2 = vor.u32 %v3903_v11, %v3227_v63  ;;  %v3890_v59 = vld [vmem:[%s5980_s2 + $0x74] sm:$0xf0]  ;;  %v3166_v11 = vor.u32 %v3887_v52, %v3163_v56  ;;  %v3888_v63 = vld [vmem:[%s5980_s2 + $0x6c] sm:$0xf]  ;;  %v3122_v56 = vor.u32 %v3878_v50, %v3121_v49 }
 0x17b   :  { %v3170_v62 = vor.u32 %v3890_v59, %v3169_v57  ;;  %v3174_v1 = vor.u32 %v3888_v63, %v3171_v0  ;;  %v3369_v49 = vld [vmem:[%s5980_s2 + $0xf8] sm:$0xf0] }
 0x17c   :  { %898 = vmatmul.bf16.vlgmr.msra.gmra.mxu0 %v697_v4  ;;  %911 = vmatmul.bf16.vlgmr.msra.gmra.mxu1 %v697_v4 }
 0x17d   :  { %924 = vmatmul.bf16.vlgmr.msra.gmra.mxu2 %v697_v4  ;;  %937 = vmatmul.bf16.vlgmr.msra.gmra.mxu3 %v697_v4 }
 0x17e   :  { %1235 = vmatpush.bf16.msrb.mxu1 %v3230_v2  ;;  %1252 = vmatpush.bf16.msrb.mxu2 %v3170_v62 }
 0x17f   :  { %1265 = vmatpush.bf16.msrb.mxu3 %v3174_v1  ;;  %1227 = vmatpush.bf16.msrb.mxu0 %v3146_v9 }
 0x182   :  { %1236 = vmatpush.bf16.msrb.mxu1 %v3214_v19  ;;  %v3884_v19 = vld [vmem:[%s5980_s2 + $0x4c] sm:$0xf]  ;;  %1253 = vmatpush.bf16.msrb.mxu2 %v3154_v18 }
 0x183   :  { %v3158_v23 = vor.u32 %v3884_v19, %v3155_v20  ;;  %1228 = vmatpush.bf16.msrb.mxu0 %v3130_v29 }
 0x185   :  { %1266 = vmatpush.bf16.msrb.mxu3 %v3158_v23 }
 0x186   :  { %1237 = vmatpush.bf16.msrb.mxu1 %v3198_v30  ;;  %v3131_v30 = vld [vmem:[%s5980_s2 + $0x30] sm:$0xf0]  ;;  %1254 = vmatpush.bf16.msrb.mxu2 %v3138_v34 }
 0x187   :  { %v3134_v33 = vor.u32 %v3879_v17, %v3131_v30 }
 0x189   :  { %1267 = vmatpush.bf16.msrb.mxu3 %v3142_v38 }
 0x18a   :  { %1238 = vmatpush.bf16.msrb.mxu1 %v3182_v45  ;;  %v3114_v45 = vor.u32 %v3877_v42, %v3113_v40  ;;  %1255 = vmatpush.bf16.msrb.mxu2 %v3122_v56  ;;  %v3359_v40 = vld [vmem:[%s5980_s2 + $0xe0] sm:$0xf]  ;;  %v3937_v42 = vld [vmem:[%s5980_s2 + $0xec] sm:$0xf0]  ;;  %v3351_v56 = vld [vmem:[%s5980_s2 + $0xc8] sm:$0xf] }
 0x18b   :  { %v3360_v43 = vor.u32 %v3937_v42, %v3359_v40  ;;  %v5216_v42 = vld [vmem:[%s5979_s1 + $0x38] sm:$0xff] }
 0x18c   :  { %1229 = vmatpush.bf16.msrb.mxu0 %v3114_v45  ;;  %v3938_v45 = vld [vmem:[%s5980_s2 + $0xf4] sm:$0xf0] }
 0x18e   :  { %1239 = vmatpush.bf16.msrb.mxu1 %v3166_v11 }
 0x190   :  { %1554 = vmatpush.bf16.msra.mxu0 %v3360_v43 }
 0x192   :  { %1240 = vmatpush.bf16.msrb.mxu1 %v3150_v16 }
 0x196   :  { %1241 = vmatpush.bf16.msrb.mxu1 %v3134_v33 }
 0x19a   :  { %1242 = vmatpush.bf16.msrb.mxu1 %v3118_v48  ;;  %v3936_v48 = vld [vmem:[%s5980_s2 + $0xec] sm:$0xf] }
 0x19b   :  { %v3372_v50 = vor.u32 %v3936_v48, %v3369_v49  ;;  %v3279_v48 = vld [vmem:[%s5980_s2 + $0x40] sm:$0xf]  ;;  %v1028_v49 = vunpack.c.h.bf16 %v5216_v42 }
 0x1c3   :  { %v1014_v17 = vpop.permute.xlu1 %1013 }
 0x1c4   :  { %vm1015_vm9 = vcmp.eq.s32.totalorder %v1014_v17, 1 }
 0x1f9   :  { %v899_v53 = vpop.f32.mrf.mxu0  ;;  %v912_v54 = vpop.f32.mrf.mxu1 }
 0x1fa   :  { %v942_v4 = vadd.f32 %v899_v53, %v693_v44  ;;  %v943_v60 = vadd.f32 %v912_v54, %v694_v41  ;;  %v3123_v54 = vld [vmem:[%s5980_s2 + $0x18] sm:$0xf0] }
 0x1fb   :  { %v3126_v57 = vor.u32 %v3876_v14, %v3123_v54  ;;  %v3343_v14 = vld [vmem:[%s5980_s2 + $0xc0] sm:$0xf] }
 0x1fc   :  { %v3105_v2 = vmul.f32 -1.442695, %v942_v4  ;;  %v3106_v3 = vmul.f32 -1.442695, %v943_v60 }
 0x1fd   :  { %1268 = vmatpush.bf16.msrb.mxu3 %v3126_v57  ;;  %v3934_v57 = vld [vmem:[%s5980_s2 + $0xd4] sm:$0xf0] }
 0x1fe   :  { %4075 = vpow2.f32 %v3105_v2 }
 0x1ff   :  { %4077 = vpow2.f32 %v3106_v3 }
 0x200   :  { %v925_v21 = vpop.f32.mrf.mxu2  ;;  %v938_v22 = vpop.f32.mrf.mxu3 }
 0x201   :  { %v945_v26 = vadd.f32 %v938_v22, %v696_v6  ;;  %v901_v27 = vpop.f32.mrf.mxu0  ;;  %v914_v28 = vpop.f32.mrf.mxu1  ;;  %v944_v11 = vadd.f32 %v925_v21, %v695_v55  ;;  %1593 = vmatpush.bf16.msra.mxu3 %v3372_v50  ;;  %v3345_v55 = vld [vmem:[%s5980_s2 + $0xd0] sm:$0xf0]  ;;  %v3917_v50 = vld [vmem:[%s5980_s2 + $0x4c] sm:$0xf0] }
 0x203   :  { %v3107_v37 = vmul.f32 -1.442695, %v945_v26 }
 0x204   :  { %v4076_v39 = vpop.eup %4075 }
 0x205   :  { %v4078_v44 = vpop.eup %4077  ;;  %v949_v41 = vadd.f32 1.0, %v4076_v39  ;;  %4079 = vpow2.f32 %v3107_v37 }
 0x206   :  { %v968_v47 = vadd.f32 1.0, %v4078_v44  ;;  %v3361_v44 = vld [vmem:[%s5980_s2 + $0xf0] sm:$0xf0] }
 0x207   :  { %4081 = vrcp.f32 %v949_v41  ;;  %v961_v3 = vand.u32 2147483648, %v949_v41  ;;  %v959_v61 = vand.u32 2147483647, %v949_v41  ;;  %vm955_vm3 = vweird.f32 %v949_v41 }
 0x208   :  { %4083 = vrcp.f32 %v968_v47  ;;  %v927_v52 = vpop.f32.mrf.mxu2  ;;  %v940_v53 = vpop.f32.mrf.mxu3  ;;  %v980_v6 = vand.u32 2147483648, %v968_v47  ;;  %v978_v8 = vand.u32 2147483647, %v968_v47  ;;  %vm974_vm5 = vweird.f32 %v968_v47 }
 0x209   :  { %v962_v12 = vor.u32 1.1754944e-38, %v961_v3  ;;  %vm960_vm6 = vcmp.eq.f32.partialorder %v959_v61, 8.507059e+37  ;;  %v3933_v52 = vld [vmem:[%s5980_s2 + $0xcc] sm:$0xf0]  ;;  %v3931_v53 = vld [vmem:[%s5980_s2 + $0xc4] sm:$0xf] }
 0x20a   :  { %v981_v19 = vor.u32 1.1754944e-38, %v980_v6  ;;  %vm979_vm8 = vcmp.eq.f32.partialorder %v978_v8, 8.507059e+37  ;;  %v3344_v54 = vor.u32 %v3933_v52, %v3343_v14  ;;  %v3329_v3 = vld [vmem:[%s5980_s2 + $0xb0] sm:$0xf0]  ;;  %v3930_v61 = vld [vmem:[%s5980_s2 + $0xb4] sm:$0xf0] }
 0x20b   :  { %v4080_v59 = vpop.eup %4079  ;;  %v3928_v8 = vld [vmem:[%s5980_s2 + $0xac] sm:$0xf]  ;;  %v3915_v14 = vld [vmem:[%s5980_s2 + $0x44] sm:$0xf]  ;;  %v3281_v52 = vld [vmem:[%s5980_s2 + $0x50] sm:$0xf0] }
 0x20c   :  { %v988_v4 = vadd.f32 1.0, %v4080_v59  ;;  %v3348_v59 = vor.u32 %v3931_v53, %v3345_v55  ;;  %1555 = vmatpush.bf16.msra.mxu0 %v3344_v54  ;;  %v3280_v53 = vor.u32 %v3917_v50, %v3279_v48  ;;  %v3284_v54 = vor.u32 %v3915_v14, %v3281_v52  ;;  %v3287_v55 = vld [vmem:[%s5980_s2 + $0x48] sm:$0xf] }
 0x20d   :  { %v4082_v60 = vpop.eup %4081 }
 0x20e   :  { %v4084_v62 = vpop.eup %4083  ;;  %v951_v63 = vmul.f32 %v4082_v60, %v949_v41  ;;  %4085 = vrcp.f32 %v988_v4  ;;  %vm956_vm1 = vweird.f32 %v4082_v60  ;;  %v1000_v30 = vand.u32 2147483648, %v988_v4  ;;  %v3367_v41 = vld [vmem:[%s5980_s2 + $0xe8] sm:$0xf] }
 0x20f   :  { %v970_v0 = vmul.f32 %v4084_v62, %v968_v47  ;;  %4087 = vtanh.f32 %v944_v11  ;;  %vm975_vm2 = vweird.f32 %v4084_v62  ;;  %vm957_vm4 = vmor %vm955_vm3, %vm956_vm1  ;;  %vm994_vm11 = vweird.f32 %v988_v4  ;;  %v3353_v11 = vld [vmem:[%s5980_s2 + $0xd8] sm:$0xf0] }
 0x210   :  { %v952_v1 = vsub.f32 1.0, %v951_v63  ;;  %vm976_vm7 = vmor %vm974_vm5, %vm975_vm2  ;;  %v998_v32 = vand.u32 2147483647, %v988_v4  ;;  %v1001_v34 = vor.u32 1.1754944e-38, %v1000_v30  ;;  %v3368_v47 = vor.u32 %v3938_v45, %v3367_v41  ;;  %v3327_v63 = vld [vmem:[%s5980_s2 + $0xa0] sm:$0xf] }
 0x211   :  { %v971_v2 = vsub.f32 1.0, %v970_v0  ;;  %v3929_v0 = vld [vmem:[%s5980_s2 + $0xac] sm:$0xf0]  ;;  %v3305_v41 = vld [vmem:[%s5980_s2 + $0x78] sm:$0xf0] }
 0x212   :  { %v953_v5 = vmul.f32 %v4082_v60, %v952_v1  ;;  %vm999_vm13 = vcmp.eq.f32.partialorder %v998_v32, 8.507059e+37  ;;  %1580 = vmatpush.bf16.msra.mxu2 %v3368_v47  ;;  %v3927_v1 = vld [vmem:[%s5980_s2 + $0xa4] sm:$0xf]  ;;  %v3921_v30 = vld [vmem:[%s5980_s2 + $0x6c] sm:$0xf0] }
 0x213   :  { %v972_v7 = vmul.f32 %v4084_v62, %v971_v2  ;;  %v3328_v2 = vor.u32 %v3929_v0, %v3327_v63  ;;  %v3332_v6 = vor.u32 %v3927_v1, %v3329_v3  ;;  %v3919_v32 = vld [vmem:[%s5980_s2 + $0x64] sm:$0xf]  ;;  %v3265_v3 = vld [vmem:[%s5980_s2 + $0x30] sm:$0xf0] }
 0x214   :  { %v4086_v9 = vpop.eup %4085  ;;  %v954_v10 = vadd.f32 %v4082_v60, %v953_v5  ;;  %v3335_v5 = vld [vmem:[%s5980_s2 + $0xa8] sm:$0xf] }
 0x215   :  { %v990_v15 = vmul.f32 %v4086_v9, %v988_v4  ;;  %v973_v16 = vadd.f32 %v4084_v62, %v972_v7  ;;  %v4088_v20 = vpop.eup %4087  ;;  %vm995_vm10 = vweird.f32 %v4086_v9  ;;  %v3352_v4 = vor.u32 %v3934_v57, %v3351_v56  ;;  %1556 = vmatpush.bf16.msra.mxu0 %v3328_v2  ;;  %v3918_v56 = vld [vmem:[%s5980_s2 + $0x54] sm:$0xf0]  ;;  %v3916_v57 = vld [vmem:[%s5980_s2 + $0x4c] sm:$0xf]  ;;  %v3911_v2 = vld [vmem:[%s5980_s2 + $0x24] sm:$0xf] }
 0x216   :  { %v958_v18 = vsel %vm957_vm4, %v4082_v60, %v954_v10  ;;  %vm996_vm12 = vmor %vm994_vm11, %vm995_vm10  ;;  %v3932_v60 = vld [vmem:[%s5980_s2 + $0xcc] sm:$0xf]  ;;  %v3336_v7 = vor.u32 %v3930_v61, %v3335_v5  ;;  %v3109_v10 = vld [vmem:[%s5979_s1 + $0x30] sm:$0xff] }
 0x217   :  { %v963_v21 = vsel %vm960_vm6, %v962_v12, %v958_v18  ;;  %v991_v22 = vsub.f32 1.0, %v990_v15  ;;  %v977_v23 = vsel %vm976_vm7, %v4084_v62, %v973_v16  ;;  %v3356_v62 = vor.u32 %v3932_v60, %v3353_v11  ;;  %1581 = vmatpush.bf16.msra.mxu2 %v3352_v4  ;;  %v3311_v15 = vld [vmem:[%s5980_s2 + $0x80] sm:$0xf]  ;;  %v3925_v16 = vld [vmem:[%s5980_s2 + $0x8c] sm:$0xf0] }
 0x218   :  { %v1005_v24 = vmul.f32 %v4088_v20, %v963_v21  ;;  %v982_v25 = vsel %vm979_vm8, %v981_v19, %v977_v23  ;;  %v3923_v18 = vld [vmem:[%s5980_s2 + $0x84] sm:$0xf]  ;;  %v3312_v19 = vor.u32 %v3925_v16, %v3311_v15  ;;  %v3313_v20 = vld [vmem:[%s5980_s2 + $0x90] sm:$0xf0]  ;;  %v3319_v21 = vld [vmem:[%s5980_s2 + $0x88] sm:$0xf]  ;;  %v1025_v23 = vunpack.c.l.bf16 %v3109_v10 }
 0x219   :  { %v992_v26 = vmul.f32 %v4086_v9, %v991_v22  ;;  %v1004_v27 = vmul.f32 %v982_v25, %v4873_v51  ;;  %1594 = vmatpush.bf16.msra.mxu3 %v3356_v62  ;;  %v3926_v22 = vld [vmem:[%s5980_s2 + $0x94] sm:$0xf0]  ;;  %v3316_v25 = vor.u32 %v3923_v18, %v3313_v20  ;;  %v3289_v4 = vld [vmem:[%s5980_s2 + $0x58] sm:$0xf0]  ;;  %v3263_v60 = vld [vmem:[%s5980_s2 + $0x20] sm:$0xf] }
 0x21a   :  { %v3320_v17 = vor.u32 %v3926_v22, %v3319_v21  ;;  %1557 = vmatpush.bf16.msra.mxu0 %v3312_v19  ;;  %v3913_v11 = vld [vmem:[%s5980_s2 + $0x2c] sm:$0xf0]  ;;  %v3292_v0 = vor.u32 %v3916_v57, %v3289_v4  ;;  %v3271_v5 = vld [vmem:[%s5980_s2 + $0x28] sm:$0xf]  ;;  %v3247_v18 = vld [vmem:[%s5980_s2] sm:$0xf] }
 0x21b   :  { %v1006_v28 = vadd.f32 %v1005_v24, %v1004_v27  ;;  %v993_v29 = vadd.f32 %v4086_v9, %v992_v26  ;;  %1582 = vmatpush.bf16.msra.mxu2 %v3336_v7  ;;  %v1026_v24 = vunpack.c.h.bf16 %v3109_v10  ;;  %v3924_v26 = vld [vmem:[%s5980_s2 + $0x8c] sm:$0xf]  ;;  %v3321_v27 = vld [vmem:[%s5980_s2 + $0x98] sm:$0xf0]  ;;  %v3264_v1 = vor.u32 %v3913_v11, %v3263_v60  ;;  %v3909_v19 = vld [vmem:[%s5980_s2 + $0xc] sm:$0xf0] }
 0x21c   :  { %v3912_v10 = vld [vmem:[%s5980_s2 + $0x2c] sm:$0xf]  ;;  %v3907_v20 = vld [vmem:[%s5980_s2 + $0x4] sm:$0xf]  ;;  %v3249_v22 = vld [vmem:[%s5980_s2 + $0x10] sm:$0xf0] }
 0x21d   :  { %4089 = vtanh.f32 %v1006_v28  ;;  %v5087_v31 = vsel %vm1015_vm9, %v1006_v28, %v4873_v51  ;;  %v997_v33 = vsel %vm996_vm12, %v4086_v9, %v993_v29  ;;  %v3337_v9 = vld [vmem:[%s5980_s2 + $0xb8] sm:$0xf0]  ;;  %v3324_v28 = vor.u32 %v3924_v26, %v3321_v27  ;;  %v3295_v29 = vld [vmem:[%s5980_s2 + $0x60] sm:$0xf]  ;;  %v3910_v26 = vld [vmem:[%s5980_s2 + $0x14] sm:$0xf0] }
 0x21e   :  { %v1002_v36 = vsel %vm999_vm13, %v1001_v34, %v997_v33  ;;  %v3340_v12 = vor.u32 %v3928_v8, %v3337_v9  ;;  %v3268_v8 = vor.u32 %v3911_v2, %v3265_v3  ;;  %v3914_v9 = vld [vmem:[%s5980_s2 + $0x34] sm:$0xf0]  ;;  %v3908_v27 = vld [vmem:[%s5980_s2 + $0xc] sm:$0xf] }
 0x21f   :  { %1583 = vmatpush.bf16.msra.mxu2 %v3320_v17  ;;  %v3272_v15 = vor.u32 %v3914_v9, %v3271_v5  ;;  %v3252_v17 = vor.u32 %v3907_v20, %v3249_v22  ;;  %v3493_v22 = vld [vmem:[%s5980_s2 + $0xe0] sm:$0xf] }
 0x220   :  { %1595 = vmatpush.bf16.msra.mxu3 %v3340_v12  ;;  %v3273_v12 = vld [vmem:[%s5980_s2 + $0x38] sm:$0xf0] }
 0x221   :  { %v3276_v16 = vor.u32 %v3912_v10, %v3273_v12 }
 0x223   :  { %v4090_v35 = vpop.eup %4089 }
 0x224   :  { %v1008_v37 = vmul.f32 %v4090_v35, %v1002_v36  ;;  %1596 = vmatpush.bf16.msra.mxu3 %v3324_v28  ;;  %v3296_v35 = vor.u32 %v3921_v30, %v3295_v29  ;;  %v3297_v36 = vld [vmem:[%s5980_s2 + $0x70] sm:$0xf0]  ;;  %v3257_v28 = vld [vmem:[%s5980_s2 + $0x18] sm:$0xf0] }
 0x226   :  { %v5091_v38 = vsel %vm1015_vm9, %v1008_v37, %v4877_v58  ;;  %v1018_v39 = vsel %vm1015_vm9, %v1008_v37, 0.0  ;;  %v3935_v58 = vld [vmem:[%s5980_s2 + $0xe4] sm:$0xf]  ;;  %v3303_v37 = vld [vmem:[%s5980_s2 + $0x68] sm:$0xf]  ;;  %1558 = vmatpush.bf16.msra.mxu0 %v3296_v35 }
 0x227   :  { %1020 = vst [vmem:[#allocation2 + $0x10] sm:$0xff] %v1018_v39  ;;  %v1029_v51 = vpack.c.bf16 %v5091_v38, %v5091_v38  ;;  %v3364_v46 = vor.u32 %v3935_v58, %v3361_v44  ;;  %v3922_v39 = vld [vmem:[%s5980_s2 + $0x74] sm:$0xf0]  ;;  %v3300_v58 = vor.u32 %v3919_v32, %v3297_v36  ;;  %v3920_v44 = vld [vmem:[%s5980_s2 + $0x6c] sm:$0xf] }
 0x228   :  { %v3304_v43 = vor.u32 %v3922_v39, %v3303_v37  ;;  %v3308_v45 = vor.u32 %v3920_v44, %v3305_v41  ;;  %v1027_v37 = vunpack.c.l.bf16 %v5216_v42  ;;  %v4171_v39 = vld [vmem:[%s5978_s0] sm:$0xff] }
 0x229   :  { %1230 = vmatmul.bf16.vlgmr.msrb.gmra.mxu0 %v1029_v51  ;;  %1243 = vmatmul.bf16.vlgmr.msrb.gmra.mxu1 %v1029_v51  ;;  %vm3376_vm14 = vcmp.gt.s32.totalorder %v4171_v39, 4  ;;  %vm3510_vm15 = vcmp.gt.s32.totalorder %v4171_v39, 5  ;;  %v3485_v39 = vld [vmem:[%s5980_s2 + $0xc8] sm:$0xf] }
 0x22a   :  { %1256 = vmatmul.bf16.vlgmr.msrb.gmra.mxu2 %v1029_v51  ;;  %1269 = vmatmul.bf16.vlgmr.msrb.gmra.mxu3 %v1029_v51 }
 0x22b   :  { %1567 = vmatpush.bf16.msra.mxu1 %v3364_v46  ;;  %1584 = vmatpush.bf16.msra.mxu2 %v3304_v43 }
 0x22c   :  { %1597 = vmatpush.bf16.msra.mxu3 %v3308_v45  ;;  %1559 = vmatpush.bf16.msra.mxu0 %v3280_v53 }
 0x22f   :  { %1568 = vmatpush.bf16.msra.mxu1 %v3348_v59  ;;  %v3288_v59 = vor.u32 %v3918_v56, %v3287_v55 }
 0x230   :  { %1598 = vmatpush.bf16.msra.mxu3 %v3292_v0  ;;  %1560 = vmatpush.bf16.msra.mxu0 %v3264_v1 }
 0x231   :  { %1585 = vmatpush.bf16.msra.mxu2 %v3288_v59 }
 0x233   :  { %1569 = vmatpush.bf16.msra.mxu1 %v3332_v6 }
 0x234   :  { %1599 = vmatpush.bf16.msra.mxu3 %v3276_v16 }
 0x235   :  { %1586 = vmatpush.bf16.msra.mxu2 %v3272_v15 }
 0x237   :  { %1570 = vmatpush.bf16.msra.mxu1 %v3316_v25  ;;  %v3248_v25 = vor.u32 %v3909_v19, %v3247_v18 }
 0x239   :  { %1561 = vmatpush.bf16.msra.mxu0 %v3248_v25  ;;  %v3495_v25 = vld [vmem:[%s5980_s2 + $0xf0] sm:$0xf0] }
 0x23b   :  { %1571 = vmatpush.bf16.msra.mxu1 %v3300_v58 }
 0x23f   :  { %1572 = vmatpush.bf16.msra.mxu1 %v3284_v54 }
 0x243   :  { %1573 = vmatpush.bf16.msra.mxu1 %v3268_v8 }
 0x247   :  { %1574 = vmatpush.bf16.msra.mxu1 %v3252_v17  ;;  %v3501_v17 = vld [vmem:[%s5980_s2 + $0xe8] sm:$0xf] }
 0x2a6   :  { %v1231_v33 = vpop.f32.mrf.mxu0  ;;  %v1244_v34 = vpop.f32.mrf.mxu1 }
 0x2a7   :  { %v1274_v51 = vadd.f32 %v1231_v33, %v1025_v23  ;;  %v1275_v40 = vadd.f32 %v1244_v34, %v1026_v24  ;;  %v3255_v23 = vld [vmem:[%s5980_s2 + $0x8] sm:$0xf]  ;;  %v3260_v34 = vor.u32 %v3908_v27, %v3257_v28 }
 0x2a8   :  { %v3256_v32 = vor.u32 %v3910_v26, %v3255_v23  ;;  %v3969_v23 = vld [vmem:[%s5980_s2 + $0xec] sm:$0xf0]  ;;  %v3970_v26 = vld [vmem:[%s5980_s2 + $0xf4] sm:$0xf0] }
 0x2a9   :  { %v3239_v46 = vmul.f32 -1.442695, %v1274_v51  ;;  %v3240_v47 = vmul.f32 -1.442695, %v1275_v40  ;;  %1600 = vmatpush.bf16.msra.mxu3 %v3260_v34  ;;  %v1675_v40 = vsel %vm3376_vm14, 1, %v4210_v13  ;;  %v3502_v28 = vor.u32 %v3970_v26, %v3501_v17 }
 0x2aa   :  { %1587 = vmatpush.bf16.msra.mxu2 %v3256_v32  ;;  %1677 = vperm.xlu2 %4042, %v1675_v40   ;;  %v3965_v34 = vld [vmem:[%s5980_s2 + $0xcc] sm:$0xf0] }
 0x2ab   :  { %4091 = vpow2.f32 %v3239_v46 }
 0x2ac   :  { %4093 = vpow2.f32 %v3240_v47 }
 0x2ad   :  { %v1257_v62 = vpop.f32.mrf.mxu2  ;;  %v1270_v63 = vpop.f32.mrf.mxu3 }
 0x2ae   :  { %v1277_v61 = vadd.f32 %v1270_v63, %v1028_v49  ;;  %v1233_v6 = vpop.f32.mrf.mxu0  ;;  %v1246_v7 = vpop.f32.mrf.mxu1  ;;  %v1276_v44 = vadd.f32 %v1257_v62, %v1027_v37  ;;  %v2007_v49 = vsel %vm3510_vm15, 1, %v4210_v13  ;;  %1912 = vmatpush.bf16.msrb.mxu2 %v3502_v28  ;;  %v3479_v37 = vld [vmem:[%s5980_s2 + $0xd0] sm:$0xf0]  ;;  %v3413_v28 = vld [vmem:[%s5980_s2 + $0x40] sm:$0xf] }
 0x2b0   :  { %v3241_v21 = vmul.f32 -1.442695, %v1277_v61  ;;  %v1346_v61 = vpop.permute.xlu1 %1345 }
 0x2b1   :  { %v4092_v24 = vpop.eup %4091  ;;  %vm1347_vm8 = vcmp.eq.s32.totalorder %v1346_v61, 1 }
 0x2b2   :  { %v4094_v29 = vpop.eup %4093  ;;  %v1281_v30 = vadd.f32 1.0, %v4092_v24  ;;  %4095 = vpow2.f32 %v3241_v21  ;;  %2009 = vperm.xlu2 %4042, %v2007_v49   ;;  %v3494_v24 = vor.u32 %v3969_v23, %v3493_v22  ;;  %v3469_v49 = vld [vmem:[%s5980_s2 + $0xa8] sm:$0xf]  ;;  %v3952_v22 = vld [vmem:[%s5980_s2 + $0x6c] sm:$0xf] }
 0x2b3   :  { %v1300_v33 = vadd.f32 1.0, %v4094_v29  ;;  %v3968_v29 = vld [vmem:[%s5980_s2 + $0xec] sm:$0xf]  ;;  %v3439_v23 = vld [vmem:[%s5980_s2 + $0x78] sm:$0xf0] }
 0x2b4   :  { %4097 = vrcp.f32 %v1281_v30  ;;  %v1293_v48 = vand.u32 2147483648, %v1281_v30  ;;  %v1291_v52 = vand.u32 2147483647, %v1281_v30  ;;  %vm1287_vm2 = vweird.f32 %v1281_v30  ;;  %1886 = vmatpush.bf16.msrb.mxu0 %v3494_v24 }
 0x2b5   :  { %4099 = vrcp.f32 %v1300_v33  ;;  %v1259_v35 = vpop.f32.mrf.mxu2  ;;  %v1272_v36 = vpop.f32.mrf.mxu3  ;;  %v1312_v50 = vand.u32 2147483648, %v1300_v33  ;;  %v1310_v54 = vand.u32 2147483647, %v1300_v33  ;;  %vm1306_vm3 = vweird.f32 %v1300_v33 }
 0x2b6   :  { %v1294_v57 = vor.u32 1.1754944e-38, %v1293_v48  ;;  %vm1292_vm6 = vcmp.eq.f32.partialorder %v1291_v52, 8.507059e+37  ;;  %v3963_v35 = vld [vmem:[%s5980_s2 + $0xc4] sm:$0xf]  ;;  %v3463_v48 = vld [vmem:[%s5980_s2 + $0xb0] sm:$0xf0]  ;;  %v3442_v17 = vor.u32 %v3952_v22, %v3439_v23 }
 0x2b7   :  { %v1313_v60 = vor.u32 1.1754944e-38, %v1312_v50  ;;  %vm1311_vm7 = vcmp.eq.f32.partialorder %v1310_v54, 8.507059e+37  ;;  %v3482_v40 = vor.u32 %v3963_v35, %v3479_v37  ;;  %v3962_v50 = vld [vmem:[%s5980_s2 + $0xb4] sm:$0xf0]  ;;  %v3471_v54 = vld [vmem:[%s5980_s2 + $0xb8] sm:$0xf0] }
 0x2b8   :  { %v4096_v51 = vpop.eup %4095  ;;  %v3470_v52 = vor.u32 %v3962_v50, %v3469_v49  ;;  %v3421_v35 = vld [vmem:[%s5980_s2 + $0x48] sm:$0xf]  ;;  %v3399_v50 = vld [vmem:[%s5980_s2 + $0x30] sm:$0xf0] }
 0x2b9   :  { %v1320_v58 = vadd.f32 1.0, %v4096_v51  ;;  %v3966_v51 = vld [vmem:[%s5980_s2 + $0xd4] sm:$0xf0] }
 0x2ba   :  { %v4098_v43 = vpop.eup %4097 }
 0x2bb   :  { %v4100_v41 = vpop.eup %4099  ;;  %v1283_v45 = vmul.f32 %v4098_v43, %v1281_v30  ;;  %4101 = vrcp.f32 %v1320_v58  ;;  %vm1288_vm0 = vweird.f32 %v4098_v43  ;;  %v1332_v8 = vand.u32 2147483648, %v1320_v58  ;;  %v3503_v30 = vld [vmem:[%s5980_s2 + $0xf8] sm:$0xf0] }
 0x2bc   :  { %v1302_v46 = vmul.f32 %v4100_v41, %v1300_v33  ;;  %4103 = vtanh.f32 %v1276_v44  ;;  %vm1307_vm1 = vweird.f32 %v4100_v41  ;;  %vm1289_vm4 = vmor %vm1287_vm2, %vm1288_vm0  ;;  %vm1326_vm10 = vweird.f32 %v1320_v58  ;;  %v3477_v33 = vld [vmem:[%s5980_s2 + $0xc0] sm:$0xf]  ;;  %v3487_v44 = vld [vmem:[%s5980_s2 + $0xd8] sm:$0xf0] }
 0x2bd   :  { %v1284_v42 = vsub.f32 1.0, %v1283_v45  ;;  %vm1308_vm5 = vmor %vm1306_vm3, %vm1307_vm1  ;;  %v1330_v10 = vand.u32 2147483647, %v1320_v58  ;;  %v1333_v15 = vor.u32 1.1754944e-38, %v1332_v8  ;;  %v3506_v32 = vor.u32 %v3968_v29, %v3503_v30  ;;  %v3461_v45 = vld [vmem:[%s5980_s2 + $0xa0] sm:$0xf] }
 0x2be   :  { %v1303_v47 = vsub.f32 1.0, %v1302_v46  ;;  %v3478_v36 = vor.u32 %v3965_v34, %v3477_v33  ;;  %v3961_v46 = vld [vmem:[%s5980_s2 + $0xac] sm:$0xf0]  ;;  %v3951_v8 = vld [vmem:[%s5980_s2 + $0x64] sm:$0xf] }
 0x2bf   :  { %v1285_v14 = vmul.f32 %v4098_v43, %v1284_v42  ;;  %vm1331_vm12 = vcmp.eq.f32.partialorder %v1330_v10, 8.507059e+37  ;;  %1925 = vmatpush.bf16.msrb.mxu3 %v3506_v32  ;;  %v3959_v42 = vld [vmem:[%s5980_s2 + $0xa4] sm:$0xf]  ;;  %v3949_v30 = vld [vmem:[%s5980_s2 + $0x4c] sm:$0xf0] }
 0x2c0   :  { %v1304_v53 = vmul.f32 %v4100_v41, %v1303_v47  ;;  %1887 = vmatpush.bf16.msrb.mxu0 %v3478_v36  ;;  %v3462_v47 = vor.u32 %v3961_v46, %v3461_v45  ;;  %v3947_v32 = vld [vmem:[%s5980_s2 + $0x44] sm:$0xf]  ;;  %v3414_v33 = vor.u32 %v3949_v30, %v3413_v28  ;;  %v3415_v34 = vld [vmem:[%s5980_s2 + $0x50] sm:$0xf0]  ;;  %v3950_v36 = vld [vmem:[%s5980_s2 + $0x54] sm:$0xf0] }
 0x2c1   :  { %v4102_v55 = vpop.eup %4101  ;;  %v1286_v56 = vadd.f32 %v4098_v43, %v1285_v14  ;;  %v3466_v14 = vor.u32 %v3959_v42, %v3463_v48  ;;  %v3418_v37 = vor.u32 %v3947_v32, %v3415_v34  ;;  %v3945_v45 = vld [vmem:[%s5980_s2 + $0x2c] sm:$0xf0]  ;;  %v3943_v46 = vld [vmem:[%s5980_s2 + $0x24] sm:$0xf] }
 0x2c2   :  { %v1305_v59 = vadd.f32 %v4100_v41, %v1304_v53  ;;  %v1322_v4 = vmul.f32 %v4102_v55, %v1320_v58  ;;  %v4104_v13 = vpop.eup %4103  ;;  %vm1327_vm9 = vweird.f32 %v4102_v55  ;;  %v3486_v58 = vor.u32 %v3966_v51, %v3485_v39  ;;  %v3960_v53 = vld [vmem:[%s5980_s2 + $0xac] sm:$0xf] }
 0x2c3   :  { %v1290_v11 = vsel %vm1289_vm4, %v4098_v43, %v1286_v56  ;;  %vm1328_vm11 = vmor %vm1326_vm10, %vm1327_vm9  ;;  %v3964_v43 = vld [vmem:[%s5980_s2 + $0xcc] sm:$0xf]  ;;  %v3474_v56 = vor.u32 %v3960_v53, %v3471_v54  ;;  %v3422_v39 = vor.u32 %v3950_v36, %v3421_v35  ;;  %v3402_v53 = vor.u32 %v3943_v46, %v3399_v50 }
 0x2c4   :  { %v1295_v62 = vsel %vm1292_vm6, %v1294_v57, %v1290_v11  ;;  %v1309_v63 = vsel %vm1308_vm5, %v4100_v41, %v1305_v59  ;;  %v1323_v0 = vsub.f32 1.0, %v1322_v4  ;;  %v3490_v41 = vor.u32 %v3964_v43, %v3487_v44  ;;  %1913 = vmatpush.bf16.msrb.mxu2 %v3486_v58  ;;  %1888 = vmatpush.bf16.msrb.mxu0 %v3462_v47  ;;  %v3445_v57 = vld [vmem:[%s5980_s2 + $0x80] sm:$0xf]  ;;  %v3957_v59 = vld [vmem:[%s5980_s2 + $0x8c] sm:$0xf0] }
 0x2c5   :  { %v1314_v1 = vsel %vm1311_vm7, %v1313_v60, %v1309_v63  ;;  %v1337_v2 = vmul.f32 %v4104_v13, %v1295_v62  ;;  %v3955_v4 = vld [vmem:[%s5980_s2 + $0x84] sm:$0xf]  ;;  %v3446_v60 = vor.u32 %v3957_v59, %v3445_v57  ;;  %v3447_v11 = vld [vmem:[%s5980_s2 + $0x90] sm:$0xf0]  ;;  %v3453_v13 = vld [vmem:[%s5980_s2 + $0x88] sm:$0xf] }
 0x2c6   :  { %v1336_v3 = vmul.f32 %v1314_v1, %v5087_v31  ;;  %v1324_v5 = vmul.f32 %v4102_v55, %v1323_v0  ;;  %1926 = vmatpush.bf16.msrb.mxu3 %v3490_v41  ;;  %v3958_v62 = vld [vmem:[%s5980_s2 + $0x94] sm:$0xf0]  ;;  %v3450_v63 = vor.u32 %v3955_v4, %v3447_v11  ;;  %v3956_v1 = vld [vmem:[%s5980_s2 + $0x8c] sm:$0xf]  ;;  %v3397_v41 = vld [vmem:[%s5980_s2 + $0x20] sm:$0xf] }
 0x2c7   :  { %v3454_v0 = vor.u32 %v3958_v62, %v3453_v13  ;;  %v3948_v51 = vld [vmem:[%s5980_s2 + $0x4c] sm:$0xf]  ;;  %v3398_v49 = vor.u32 %v3945_v45, %v3397_v41  ;;  %v3941_v11 = vld [vmem:[%s5980_s2 + $0xc] sm:$0xf0]  ;;  %v3939_v13 = vld [vmem:[%s5980_s2 + $0x4] sm:$0xf] }
 0x2c8   :  { %v1338_v6 = vadd.f32 %v1337_v2, %v1336_v3  ;;  %v1325_v7 = vadd.f32 %v4102_v55, %v1324_v5  ;;  %1914 = vmatpush.bf16.msrb.mxu2 %v3470_v52  ;;  %v3455_v2 = vld [vmem:[%s5980_s2 + $0x98] sm:$0xf0]  ;;  %1889 = vmatpush.bf16.msrb.mxu0 %v3446_v60  ;;  %v3946_v52 = vld [vmem:[%s5980_s2 + $0x34] sm:$0xf0]  ;;  %v3381_v60 = vld [vmem:[%s5980_s2] sm:$0xf] }
 0x2c9   :  { %v3458_v61 = vor.u32 %v3956_v1, %v3455_v2  ;;  %v3383_v1 = vld [vmem:[%s5980_s2 + $0x10] sm:$0xf0]  ;;  %v3389_v2 = vld [vmem:[%s5980_s2 + $0x8] sm:$0xf] }
 0x2ca   :  { %4105 = vtanh.f32 %v1338_v6  ;;  %v5306_v9 = vsel %vm1347_vm8, %v1338_v6, %v5087_v31  ;;  %v1329_v12 = vsel %vm1328_vm11, %v4102_v55, %v1325_v7  ;;  %v3243_v55 = vld [vmem:[%s5979_s1 + $0x40] sm:$0xff]  ;;  %1927 = vmatpush.bf16.msrb.mxu3 %v3474_v56  ;;  %v3953_v7 = vld [vmem:[%s5980_s2 + $0x6c] sm:$0xf0]  ;;  %v3407_v56 = vld [vmem:[%s5980_s2 + $0x38] sm:$0xf0] }
 0x2cb   :  { %v1334_v18 = vsel %vm1331_vm12, %v1333_v15, %v1329_v12  ;;  %v1357_v3 = vunpack.c.l.bf16 %v3243_v55  ;;  %v1358_v5 = vunpack.c.h.bf16 %v3243_v55  ;;  %v3429_v6 = vld [vmem:[%s5980_s2 + $0x60] sm:$0xf]  ;;  %v3431_v12 = vld [vmem:[%s5980_s2 + $0x70] sm:$0xf0]  ;;  %v3437_v15 = vld [vmem:[%s5980_s2 + $0x68] sm:$0xf] }
 0x2cc   :  { %1915 = vmatpush.bf16.msrb.mxu2 %v3454_v0  ;;  %v3430_v10 = vor.u32 %v3953_v7, %v3429_v6  ;;  %v3944_v55 = vld [vmem:[%s5980_s2 + $0x2c] sm:$0xf]  ;;  %v3382_v0 = vor.u32 %v3941_v11, %v3381_v60  ;;  %v3391_v7 = vld [vmem:[%s5980_s2 + $0x18] sm:$0xf0]  ;;  %v4001_v60 = vld [vmem:[%s5980_s2 + $0xec] sm:$0xf0] }
 0x2cd   :  { %v3410_v59 = vor.u32 %v3944_v55, %v3407_v56  ;;  %v3940_v6 = vld [vmem:[%s5980_s2 + $0xc] sm:$0xf] }
 0x2ce   :  { %1928 = vmatpush.bf16.msrb.mxu3 %v3458_v61  ;;  %1890 = vmatpush.bf16.msrb.mxu0 %v3430_v10  ;;  %v3942_v61 = vld [vmem:[%s5980_s2 + $0x14] sm:$0xf0] }
 0x2d0   :  { %v4106_v16 = vpop.eup %4105 }
 0x2d1   :  { %v1340_v19 = vmul.f32 %v4106_v16, %v1334_v18  ;;  %v3954_v16 = vld [vmem:[%s5980_s2 + $0x74] sm:$0xf0] }
 0x2d2   :  { %1929 = vmatpush.bf16.msrb.mxu3 %v3442_v17  ;;  %1891 = vmatpush.bf16.msrb.mxu0 %v3414_v33 }
 0x2d3   :  { %v5310_v20 = vsel %vm1347_vm8, %v1340_v19, %v5091_v38  ;;  %v1350_v21 = vsel %vm1347_vm8, %v1340_v19, 0.0  ;;  %v3967_v38 = vld [vmem:[%s5980_s2 + $0xe4] sm:$0xf] }
 0x2d4   :  { %1352 = vst [vmem:[#allocation2 + $0x18] sm:$0xff] %v1350_v21  ;;  %v1361_v31 = vpack.c.bf16 %v5310_v20, %v5310_v20  ;;  %v3498_v27 = vor.u32 %v3967_v38, %v3495_v25  ;;  %v3434_v21 = vor.u32 %v3951_v8, %v3431_v12  ;;  %v5441_v25 = vld [vmem:[%s5979_s1 + $0x48] sm:$0xff] }
 0x2d5   :  { %v1360_v29 = vunpack.c.h.bf16 %v5441_v25  ;;  %v1359_v12 = vunpack.c.l.bf16 %v5441_v25 }
 0x2d6   :  { %1562 = vmatmul.bf16.vlgmr.msra.gmra.mxu0 %v1361_v31  ;;  %1575 = vmatmul.bf16.vlgmr.msra.gmra.mxu1 %v1361_v31 }
 0x2d7   :  { %1588 = vmatmul.bf16.vlgmr.msra.gmra.mxu2 %v1361_v31  ;;  %1601 = vmatmul.bf16.vlgmr.msra.gmra.mxu3 %v1361_v31  ;;  %v3438_v31 = vor.u32 %v3954_v16, %v3437_v15  ;;  %v3390_v15 = vor.u32 %v3942_v61, %v3389_v2  ;;  %v3394_v16 = vor.u32 %v3940_v6, %v3391_v7  ;;  %v4000_v2 = vld [vmem:[%s5980_s2 + $0xec] sm:$0xf]  ;;  %v3611_v61 = vld [vmem:[%s5980_s2 + $0xc0] sm:$0xf]  ;;  %v3997_v6 = vld [vmem:[%s5980_s2 + $0xcc] sm:$0xf0] }
 0x2d8   :  { %1899 = vmatpush.bf16.msrb.mxu1 %v3498_v27  ;;  %1892 = vmatpush.bf16.msrb.mxu0 %v3398_v49  ;;  %v3995_v7 = vld [vmem:[%s5980_s2 + $0xc4] sm:$0xf] }
 0x2d9   :  { %1916 = vmatpush.bf16.msrb.mxu2 %v3438_v31 }
 0x2dc   :  { %1900 = vmatpush.bf16.msrb.mxu1 %v3482_v40  ;;  %v3423_v40 = vld [vmem:[%s5980_s2 + $0x58] sm:$0xf0]  ;;  %1893 = vmatpush.bf16.msrb.mxu0 %v3382_v0 }
 0x2dd   :  { %v3426_v44 = vor.u32 %v3948_v51, %v3423_v40  ;;  %1917 = vmatpush.bf16.msrb.mxu2 %v3422_v39 }
 0x2df   :  { %1930 = vmatpush.bf16.msrb.mxu3 %v3426_v44 }
 0x2e0   :  { %1901 = vmatpush.bf16.msrb.mxu1 %v3466_v14  ;;  %v3405_v14 = vld [vmem:[%s5980_s2 + $0x28] sm:$0xf] }
 0x2e1   :  { %v3406_v54 = vor.u32 %v3946_v52, %v3405_v14 }
 0x2e3   :  { %1918 = vmatpush.bf16.msrb.mxu2 %v3406_v54  ;;  %1931 = vmatpush.bf16.msrb.mxu3 %v3410_v59 }
 0x2e4   :  { %1902 = vmatpush.bf16.msrb.mxu1 %v3450_v63 }
 0x2e7   :  { %1919 = vmatpush.bf16.msrb.mxu2 %v3390_v15  ;;  %1932 = vmatpush.bf16.msrb.mxu3 %v3394_v16  ;;  %v3998_v15 = vld [vmem:[%s5980_s2 + $0xd4] sm:$0xf0] }
 0x2e8   :  { %1903 = vmatpush.bf16.msrb.mxu1 %v3434_v21 }
 0x2ec   :  { %1904 = vmatpush.bf16.msrb.mxu1 %v3418_v37 }
 0x2f0   :  { %1905 = vmatpush.bf16.msrb.mxu1 %v3402_v53 }
 0x353   :  { %v1563_v18 = vpop.f32.mrf.mxu0  ;;  %v1576_v19 = vpop.f32.mrf.mxu1 }
 0x354   :  { %v1606_v38 = vadd.f32 %v1563_v18, %v1357_v3  ;;  %v1607_v24 = vadd.f32 %v1576_v19, %v1358_v5  ;;  %v3386_v5 = vor.u32 %v3939_v13, %v3383_v1  ;;  %v3629_v13 = vld [vmem:[%s5980_s2 + $0xf0] sm:$0xf0] }
 0x356   :  { %v3373_v26 = vmul.f32 -1.442695, %v1606_v38  ;;  %v3374_v27 = vmul.f32 -1.442695, %v1607_v24  ;;  %1906 = vmatpush.bf16.msrb.mxu1 %v3386_v5 }
 0x358   :  { %4107 = vpow2.f32 %v3373_v26 }
 0x359   :  { %4109 = vpow2.f32 %v3374_v27 }
 0x35a   :  { %v1589_v58 = vpop.f32.mrf.mxu2  ;;  %v1602_v43 = vpop.f32.mrf.mxu3 }
 0x35b   :  { %v1609_v42 = vadd.f32 %v1602_v43, %v1360_v29  ;;  %v1565_v47 = vpop.f32.mrf.mxu0  ;;  %v1578_v48 = vpop.f32.mrf.mxu1  ;;  %v1608_v31 = vadd.f32 %v1589_v58, %v1359_v12  ;;  %v3619_v12 = vld [vmem:[%s5980_s2 + $0xc8] sm:$0xf] }
 0x35c   :  { %v1678_v43 = vpop.permute.xlu2 %1677 }
 0x35d   :  { %v3375_v57 = vmul.f32 -1.442695, %v1609_v42  ;;  %vm1679_vm5 = vcmp.eq.s32.totalorder %v1678_v43, 1 }
 0x35e   :  { %v4108_v4 = vpop.eup %4107 }
 0x35f   :  { %v4110_v62 = vpop.eup %4109  ;;  %v1613_v63 = vadd.f32 1.0, %v4108_v4  ;;  %4111 = vpow2.f32 %v3375_v57  ;;  %v3627_v4 = vld [vmem:[%s5980_s2 + $0xe0] sm:$0xf] }
 0x360   :  { %v1632_v3 = vadd.f32 1.0, %v4110_v62  ;;  %v3628_v11 = vor.u32 %v4001_v60, %v3627_v4  ;;  %v3635_v62 = vld [vmem:[%s5980_s2 + $0xe8] sm:$0xf]  ;;  %v5649_v4 = vld [vmem:[%s5979_s1 + $0x58] sm:$0xff] }
 0x361   :  { %4113 = vrcp.f32 %v1613_v63  ;;  %v1625_v26 = vand.u32 2147483648, %v1613_v63  ;;  %v1623_v25 = vand.u32 2147483647, %v1613_v63  ;;  %vm1619_vm15 = vweird.f32 %v1613_v63 }
 0x362   :  { %4115 = vrcp.f32 %v1632_v3  ;;  %v1591_v8 = vpop.f32.mrf.mxu2  ;;  %v1604_v10 = vpop.f32.mrf.mxu3  ;;  %v1644_v28 = vand.u32 2147483648, %v1632_v3  ;;  %v1642_v30 = vand.u32 2147483647, %v1632_v3  ;;  %vm1638_vm1 = vweird.f32 %v1632_v3  ;;  %2218 = vmatpush.bf16.msra.mxu0 %v3628_v11  ;;  %v3984_v11 = vld [vmem:[%s5980_s2 + $0x6c] sm:$0xf] }
 0x363   :  { %v1626_v34 = vor.u32 1.1754944e-38, %v1625_v26  ;;  %vm1624_vm2 = vcmp.eq.f32.partialorder %v1623_v25, 8.507059e+37  ;;  %v3612_v8 = vor.u32 %v3997_v6, %v3611_v61  ;;  %v3613_v10 = vld [vmem:[%s5980_s2 + $0xd0] sm:$0xf0]  ;;  %v3603_v26 = vld [vmem:[%s5980_s2 + $0xa8] sm:$0xf] }
 0x364   :  { %v1645_v39 = vor.u32 1.1754944e-38, %v1644_v28  ;;  %vm1643_vm4 = vcmp.eq.f32.partialorder %v1642_v30, 8.507059e+37  ;;  %v3616_v16 = vor.u32 %v3995_v7, %v3613_v10  ;;  %v3605_v30 = vld [vmem:[%s5980_s2 + $0xb8] sm:$0xf0]  ;;  %v3549_v61 = vld [vmem:[%s5980_s2 + $0x50] sm:$0xf0] }
 0x365   :  { %v4112_v18 = vpop.eup %4111  ;;  %v3982_v10 = vld [vmem:[%s5980_s2 + $0x54] sm:$0xf0] }
 0x366   :  { %v1652_v19 = vadd.f32 1.0, %v4112_v18  ;;  %v3620_v18 = vor.u32 %v3998_v15, %v3619_v12  ;;  %2219 = vmatpush.bf16.msra.mxu0 %v3612_v8  ;;  %v3555_v8 = vld [vmem:[%s5980_s2 + $0x48] sm:$0xf]  ;;  %v3980_v12 = vld [vmem:[%s5980_s2 + $0x4c] sm:$0xf] }
 0x367   :  { %v4114_v21 = vpop.eup %4113  ;;  %v3556_v15 = vor.u32 %v3982_v10, %v3555_v8 }
 0x368   :  { %v4116_v22 = vpop.eup %4115  ;;  %v1615_v23 = vmul.f32 %v4114_v21, %v1613_v63  ;;  %4117 = vrcp.f32 %v1652_v19  ;;  %vm1620_vm13 = vweird.f32 %v4114_v21  ;;  %v1664_v49 = vand.u32 2147483648, %v1652_v19  ;;  %v4002_v63 = vld [vmem:[%s5980_s2 + $0xf4] sm:$0xf0] }
 0x369   :  { %v1634_v38 = vmul.f32 %v4116_v22, %v1632_v3  ;;  %4119 = vtanh.f32 %v1608_v31  ;;  %vm1639_vm14 = vweird.f32 %v4116_v22  ;;  %vm1621_vm0 = vmor %vm1619_vm15, %vm1620_vm13  ;;  %vm1658_vm7 = vweird.f32 %v1652_v19  ;;  %v3637_v3 = vld [vmem:[%s5980_s2 + $0xf8] sm:$0xf0] }
 0x36a   :  { %v1616_v24 = vsub.f32 1.0, %v1615_v23  ;;  %vm1640_vm3 = vmor %vm1638_vm1, %vm1639_vm14  ;;  %v1662_v14 = vand.u32 2147483647, %v1652_v19  ;;  %v1665_v53 = vor.u32 1.1754944e-38, %v1664_v49  ;;  %v3636_v1 = vor.u32 %v4002_v63, %v3635_v62  ;;  %v3993_v23 = vld [vmem:[%s5980_s2 + $0xac] sm:$0xf0] }
 0x36b   :  { %v1635_v17 = vsub.f32 1.0, %v1634_v38  ;;  %v3640_v5 = vor.u32 %v4000_v2, %v3637_v3  ;;  %v3991_v38 = vld [vmem:[%s5980_s2 + $0xa4] sm:$0xf]  ;;  %v1692_v2 = vunpack.c.h.bf16 %v5649_v4  ;;  %v3981_v3 = vld [vmem:[%s5980_s2 + $0x4c] sm:$0xf0] }
 0x36c   :  { %v1617_v27 = vmul.f32 %v4114_v21, %v1616_v24  ;;  %vm1663_vm9 = vcmp.eq.f32.partialorder %v1662_v14, 8.507059e+37  ;;  %2244 = vmatpush.bf16.msra.mxu2 %v3636_v1  ;;  %v3983_v49 = vld [vmem:[%s5980_s2 + $0x64] sm:$0xf]  ;;  %v3547_v1 = vld [vmem:[%s5980_s2 + $0x40] sm:$0xf] }
 0x36d   :  { %v1636_v29 = vmul.f32 %v4116_v22, %v1635_v17  ;;  %2257 = vmatpush.bf16.msra.mxu3 %v3640_v5  ;;  %v3597_v17 = vld [vmem:[%s5980_s2 + $0xb0] sm:$0xf0]  ;;  %v3979_v5 = vld [vmem:[%s5980_s2 + $0x44] sm:$0xf]  ;;  %v3548_v6 = vor.u32 %v3981_v3, %v3547_v1 }
 0x36e   :  { %v4118_v32 = vpop.eup %4117  ;;  %v1618_v33 = vadd.f32 %v4114_v21, %v1617_v27  ;;  %v3994_v27 = vld [vmem:[%s5980_s2 + $0xb4] sm:$0xf0]  ;;  %v3600_v25 = vor.u32 %v3991_v38, %v3597_v17  ;;  %v3552_v7 = vor.u32 %v3979_v5, %v3549_v61  ;;  %v3975_v38 = vld [vmem:[%s5980_s2 + $0x24] sm:$0xf]  ;;  %v3539_v17 = vld [vmem:[%s5980_s2 + $0x28] sm:$0xf] }
 0x36f   :  { %v1654_v35 = vmul.f32 %v4118_v32, %v1652_v19  ;;  %v1637_v36 = vadd.f32 %v4116_v22, %v1636_v29  ;;  %v4120_v51 = vpop.eup %4119  ;;  %vm1659_vm6 = vweird.f32 %v4118_v32  ;;  %v3996_v19 = vld [vmem:[%s5980_s2 + $0xcc] sm:$0xf]  ;;  %v3604_v28 = vor.u32 %v3994_v27, %v3603_v26 }
 0x370   :  { %v1622_v37 = vsel %vm1621_vm0, %v4114_v21, %v1618_v33  ;;  %vm1660_vm8 = vmor %vm1658_vm7, %vm1659_vm6  ;;  %v3621_v21 = vld [vmem:[%s5980_s2 + $0xd8] sm:$0xf0]  ;;  %2245 = vmatpush.bf16.msra.mxu2 %v3620_v18  ;;  %v3992_v29 = vld [vmem:[%s5980_s2 + $0xac] sm:$0xf] }
 0x371   :  { %v1627_v40 = vsel %vm1624_vm2, %v1626_v34, %v1622_v37  ;;  %v1655_v58 = vsub.f32 1.0, %v1654_v35  ;;  %v1641_v44 = vsel %vm1640_vm3, %v4116_v22, %v1637_v36  ;;  %v3624_v31 = vor.u32 %v3996_v19, %v3621_v21  ;;  %v3595_v22 = vld [vmem:[%s5980_s2 + $0xa0] sm:$0xf]  ;;  %v3989_v35 = vld [vmem:[%s5980_s2 + $0x8c] sm:$0xf0] }
 0x372   :  { %v1669_v41 = vmul.f32 %v4120_v51, %v1627_v40  ;;  %v1646_v45 = vsel %vm1643_vm4, %v1645_v39, %v1641_v44  ;;  %v3596_v24 = vor.u32 %v3993_v23, %v3595_v22  ;;  %v3608_v33 = vor.u32 %v3992_v29, %v3605_v30  ;;  %v3579_v34 = vld [vmem:[%s5980_s2 + $0x80] sm:$0xf]  ;;  %v3987_v36 = vld [vmem:[%s5980_s2 + $0x84] sm:$0xf]  ;;  %v3581_v39 = vld [vmem:[%s5980_s2 + $0x90] sm:$0xf0] }
 0x373   :  { %v1656_v46 = vmul.f32 %v4118_v32, %v1655_v58  ;;  %v1668_v42 = vmul.f32 %v1646_v45, %v5306_v9  ;;  %2258 = vmatpush.bf16.msra.mxu3 %v3624_v31  ;;  %v3580_v37 = vor.u32 %v3989_v35, %v3579_v34  ;;  %v3587_v51 = vld [vmem:[%s5980_s2 + $0x88] sm:$0xf]  ;;  %v3990_v40 = vld [vmem:[%s5980_s2 + $0x94] sm:$0xf0]  ;;  %v3584_v44 = vor.u32 %v3987_v36, %v3581_v39  ;;  %v3988_v45 = vld [vmem:[%s5980_s2 + $0x8c] sm:$0xf] }
 0x374   :  { %2220 = vmatpush.bf16.msra.mxu0 %v3596_v24  ;;  %2246 = vmatpush.bf16.msra.mxu2 %v3604_v28  ;;  %v3531_v18 = vld [vmem:[%s5980_s2 + $0x20] sm:$0xf]  ;;  %v3977_v19 = vld [vmem:[%s5980_s2 + $0x2c] sm:$0xf0]  ;;  %v3533_v24 = vld [vmem:[%s5980_s2 + $0x30] sm:$0xf0] }
 0x375   :  { %v1670_v47 = vadd.f32 %v1669_v41, %v1668_v42  ;;  %v1657_v48 = vadd.f32 %v4118_v32, %v1656_v46  ;;  %v3588_v41 = vor.u32 %v3990_v40, %v3587_v51  ;;  %v3589_v46 = vld [vmem:[%s5980_s2 + $0x98] sm:$0xf0]  ;;  %v3532_v23 = vor.u32 %v3977_v19, %v3531_v18  ;;  %v3978_v29 = vld [vmem:[%s5980_s2 + $0x34] sm:$0xf0]  ;;  %v3976_v30 = vld [vmem:[%s5980_s2 + $0x2c] sm:$0xf] }
 0x376   :  { %v3592_v42 = vor.u32 %v3988_v45, %v3589_v46  ;;  %v3536_v28 = vor.u32 %v3975_v38, %v3533_v24  ;;  %v3515_v35 = vld [vmem:[%s5980_s2] sm:$0xf]  ;;  %v3973_v36 = vld [vmem:[%s5980_s2 + $0xc] sm:$0xf0]  ;;  %v3517_v51 = vld [vmem:[%s5980_s2 + $0x10] sm:$0xf0] }
 0x377   :  { %4121 = vtanh.f32 %v1670_v47  ;;  %v5520_v50 = vsel %vm1679_vm5, %v1670_v47, %v5306_v9  ;;  %v1661_v52 = vsel %vm1660_vm8, %v4118_v32, %v1657_v48  ;;  %v3377_v32 = vld [vmem:[%s5979_s1 + $0x50] sm:$0xff]  ;;  %2259 = vmatpush.bf16.msra.mxu3 %v3608_v33  ;;  %v3563_v47 = vld [vmem:[%s5980_s2 + $0x60] sm:$0xf]  ;;  %v3540_v33 = vor.u32 %v3978_v29, %v3539_v17  ;;  %v3523_v40 = vld [vmem:[%s5980_s2 + $0x8] sm:$0xf] }
 0x378   :  { %v1666_v55 = vsel %vm1663_vm9, %v1665_v53, %v1661_v52  ;;  %v1689_v58 = vunpack.c.l.bf16 %v3377_v32  ;;  %v1690_v43 = vunpack.c.h.bf16 %v3377_v32  ;;  %2221 = vmatpush.bf16.msra.mxu0 %v3580_v37  ;;  %2247 = vmatpush.bf16.msra.mxu2 %v3588_v41  ;;  %v3985_v48 = vld [vmem:[%s5980_s2 + $0x6c] sm:$0xf0]  ;;  %v3541_v32 = vld [vmem:[%s5980_s2 + $0x38] sm:$0xf0]  ;;  %v3971_v37 = vld [vmem:[%s5980_s2 + $0x4] sm:$0xf] }
 0x379   :  { %v3564_v53 = vor.u32 %v3985_v48, %v3563_v47  ;;  %v3544_v34 = vor.u32 %v3976_v30, %v3541_v32  ;;  %v3974_v41 = vld [vmem:[%s5980_s2 + $0x14] sm:$0xf0]  ;;  %v3972_v45 = vld [vmem:[%s5980_s2 + $0xc] sm:$0xf]  ;;  %v3525_v46 = vld [vmem:[%s5980_s2 + $0x18] sm:$0xf0] }
 0x37a   :  { %v3524_v48 = vor.u32 %v3974_v41, %v3523_v40  ;;  %v3769_v40 = vld [vmem:[%s5980_s2 + $0xe8] sm:$0xf]  ;;  %v4032_v41 = vld [vmem:[%s5980_s2 + $0xec] sm:$0xf] }
 0x37b   :  { %2260 = vmatpush.bf16.msra.mxu3 %v3592_v42 }
 0x37c   :  { %2222 = vmatpush.bf16.msra.mxu0 %v3564_v53 }
 0x37d   :  { %v4122_v54 = vpop.eup %4121 }
 0x37e   :  { %v1672_v56 = vmul.f32 %v4122_v54, %v1666_v55  ;;  %v3565_v54 = vld [vmem:[%s5980_s2 + $0x70] sm:$0xf0]  ;;  %v3571_v55 = vld [vmem:[%s5980_s2 + $0x68] sm:$0xf] }
 0x37f   :  { %v3568_v60 = vor.u32 %v3983_v49, %v3565_v54  ;;  %v1691_v54 = vunpack.c.l.bf16 %v5649_v4 }
 0x380   :  { %v5524_v57 = vsel %vm1679_vm5, %v1672_v56, %v5310_v20  ;;  %v1682_v59 = vsel %vm1679_vm5, %v1672_v56, 0.0  ;;  %v3999_v20 = vld [vmem:[%s5980_s2 + $0xe4] sm:$0xf]  ;;  %v3986_v56 = vld [vmem:[%s5980_s2 + $0x74] sm:$0xf0]  ;;  %2223 = vmatpush.bf16.msra.mxu0 %v3548_v6 }
 0x381   :  { %1684 = vst [vmem:[#allocation2 + $0x20] sm:$0xff] %v1682_v59  ;;  %v1693_v9 = vpack.c.bf16 %v5524_v57, %v5524_v57  ;;  %v3632_v0 = vor.u32 %v3999_v20, %v3629_v13  ;;  %v3572_v20 = vor.u32 %v3986_v56, %v3571_v55  ;;  %v3573_v13 = vld [vmem:[%s5980_s2 + $0x78] sm:$0xf0] }
 0x382   :  { %v3576_v62 = vor.u32 %v3984_v11, %v3573_v13 }
 0x383   :  { %1894 = vmatmul.bf16.vlgmr.msrb.gmra.mxu0 %v1693_v9  ;;  %1907 = vmatmul.bf16.vlgmr.msrb.gmra.mxu1 %v1693_v9 }
 0x384   :  { %1920 = vmatmul.bf16.vlgmr.msrb.gmra.mxu2 %v1693_v9  ;;  %1933 = vmatmul.bf16.vlgmr.msrb.gmra.mxu3 %v1693_v9 }
 0x385   :  { %2231 = vmatpush.bf16.msra.mxu1 %v3632_v0  ;;  %2248 = vmatpush.bf16.msra.mxu2 %v3572_v20 }
 0x386   :  { %2261 = vmatpush.bf16.msra.mxu3 %v3576_v62  ;;  %2224 = vmatpush.bf16.msra.mxu0 %v3532_v23 }
 0x389   :  { %2232 = vmatpush.bf16.msra.mxu1 %v3616_v16  ;;  %v3557_v16 = vld [vmem:[%s5980_s2 + $0x58] sm:$0xf0]  ;;  %2249 = vmatpush.bf16.msra.mxu2 %v3556_v15 }
 0x38a   :  { %v3560_v22 = vor.u32 %v3980_v12, %v3557_v16 }
 0x38c   :  { %2262 = vmatpush.bf16.msra.mxu3 %v3560_v22  ;;  %v2010_v22 = vpop.permute.xlu2 %2009 }
 0x38d   :  { %2233 = vmatpush.bf16.msra.mxu1 %v3600_v25  ;;  %2250 = vmatpush.bf16.msra.mxu2 %v3540_v33  ;;  %vm2011_vm2 = vcmp.eq.s32.totalorder %v2010_v22, 1  ;;  %v4020_v22 = vld [vmem:[%s5980_s2 + $0x8c] sm:$0xf] }
 0x390   :  { %2263 = vmatpush.bf16.msra.mxu3 %v3544_v34 }
 0x391   :  { %2234 = vmatpush.bf16.msra.mxu1 %v3584_v44  ;;  %v3520_v44 = vor.u32 %v3971_v37, %v3517_v51  ;;  %2251 = vmatpush.bf16.msra.mxu2 %v3524_v48  ;;  %v4033_v37 = vld [vmem:[%s5980_s2 + $0xec] sm:$0xf0]  ;;  %v3763_v51 = vld [vmem:[%s5980_s2 + $0xf0] sm:$0xf0]  ;;  %v4027_v48 = vld [vmem:[%s5980_s2 + $0xc4] sm:$0xf] }
 0x395   :  { %2235 = vmatpush.bf16.msra.mxu1 %v3568_v60 }
 0x399   :  { %2236 = vmatpush.bf16.msra.mxu1 %v3552_v7 }
 0x39d   :  { %2237 = vmatpush.bf16.msra.mxu1 %v3536_v28 }
 0x3a1   :  { %2238 = vmatpush.bf16.msra.mxu1 %v3520_v44 }
 0x400   :  { %v1895_v14 = vpop.f32.mrf.mxu0  ;;  %v1908_v52 = vpop.f32.mrf.mxu1 }
 0x401   :  { %v1938_v59 = vadd.f32 %v1895_v14, %v1689_v58  ;;  %v1939_v9 = vadd.f32 %v1908_v52, %v1690_v43  ;;  %v3516_v43 = vor.u32 %v3973_v36, %v3515_v35  ;;  %v3528_v14 = vor.u32 %v3972_v45, %v3525_v46  ;;  %v3761_v36 = vld [vmem:[%s5980_s2 + $0xe0] sm:$0xf]  ;;  %v3771_v45 = vld [vmem:[%s5980_s2 + $0xf8] sm:$0xf0] }
 0x402   :  { %v3774_v46 = vor.u32 %v4032_v41, %v3771_v45  ;;  %v4013_v45 = vld [vmem:[%s5980_s2 + $0x4c] sm:$0xf0] }
 0x403   :  { %v3507_v63 = vmul.f32 -1.442695, %v1938_v59  ;;  %v3508_v0 = vmul.f32 -1.442695, %v1939_v9  ;;  %2225 = vmatpush.bf16.msra.mxu0 %v3516_v43  ;;  %2264 = vmatpush.bf16.msra.mxu3 %v3528_v14  ;;  %v3747_v14 = vld [vmem:[%s5980_s2 + $0xd0] sm:$0xf0] }
 0x405   :  { %4123 = vpow2.f32 %v3507_v63 }
 0x406   :  { %4125 = vpow2.f32 %v3508_v0 }
 0x407   :  { %v1921_v21 = vpop.f32.mrf.mxu2  ;;  %v1934_v31 = vpop.f32.mrf.mxu3  ;;  %2589 = vmatpush.bf16.msrb.mxu3 %v3774_v46  ;;  %v4011_v46 = vld [vmem:[%s5980_s2 + $0x44] sm:$0xf] }
 0x408   :  { %v1941_v26 = vadd.f32 %v1934_v31, %v1692_v2  ;;  %v1897_v27 = vpop.f32.mrf.mxu0  ;;  %v1910_v25 = vpop.f32.mrf.mxu1  ;;  %v1940_v9 = vadd.f32 %v1921_v21, %v1691_v54  ;;  %v3750_v54 = vor.u32 %v4027_v48, %v3747_v14  ;;  %v4014_v14 = vld [vmem:[%s5980_s2 + $0x54] sm:$0xf0] }
 0x40a   :  { %v3509_v39 = vmul.f32 -1.442695, %v1941_v26 }
 0x40b   :  { %v4124_v58 = vpop.eup %4123 }
 0x40c   :  { %v4126_v42 = vpop.eup %4125  ;;  %v1945_v47 = vadd.f32 1.0, %v4124_v58  ;;  %4127 = vpow2.f32 %v3509_v39  ;;  %v3762_v39 = vor.u32 %v4033_v37, %v3761_v36  ;;  %v4034_v58 = vld [vmem:[%s5980_s2 + $0xf4] sm:$0xf0]  ;;  %v5863_v36 = vld [vmem:[%s5979_s1 + $0x68] sm:$0xff] }
 0x40d   :  { %v1964_v49 = vadd.f32 1.0, %v4126_v42  ;;  %v3770_v44 = vor.u32 %v4034_v58, %v3769_v40  ;;  %v3745_v42 = vld [vmem:[%s5980_s2 + $0xc0] sm:$0xf]  ;;  %v2024_v41 = vunpack.c.h.bf16 %v5863_v36 }
 0x40e   :  { %4129 = vrcp.f32 %v1945_v47  ;;  %v1957_v63 = vand.u32 2147483648, %v1945_v47  ;;  %v1955_v2 = vand.u32 2147483647, %v1945_v47  ;;  %vm1951_vm12 = vweird.f32 %v1945_v47  ;;  %2550 = vmatpush.bf16.msrb.mxu0 %v3762_v39  ;;  %v4016_v39 = vld [vmem:[%s5980_s2 + $0x6c] sm:$0xf] }
 0x40f   :  { %4131 = vrcp.f32 %v1964_v49  ;;  %v1923_v52 = vpop.f32.mrf.mxu2  ;;  %v1936_v53 = vpop.f32.mrf.mxu3  ;;  %v1976_v0 = vand.u32 2147483648, %v1964_v49  ;;  %v1974_v4 = vand.u32 2147483647, %v1964_v49  ;;  %vm1970_vm13 = vweird.f32 %v1964_v49  ;;  %2576 = vmatpush.bf16.msrb.mxu2 %v3770_v44  ;;  %v3681_v44 = vld [vmem:[%s5980_s2 + $0x40] sm:$0xf] }
 0x410   :  { %v1958_v6 = vor.u32 1.1754944e-38, %v1957_v63  ;;  %vm1956_vm0 = vcmp.eq.f32.partialorder %v1955_v2, 8.507059e+37  ;;  %v3753_v52 = vld [vmem:[%s5980_s2 + $0xc8] sm:$0xf]  ;;  %v4030_v53 = vld [vmem:[%s5980_s2 + $0xd4] sm:$0xf0] }
 0x411   :  { %v1977_v10 = vor.u32 1.1754944e-38, %v1976_v0  ;;  %vm1975_vm1 = vcmp.eq.f32.partialorder %v1974_v4, 8.507059e+37  ;;  %v3737_v63 = vld [vmem:[%s5980_s2 + $0xa8] sm:$0xf]  ;;  %v4026_v0 = vld [vmem:[%s5980_s2 + $0xb4] sm:$0xf0] }
 0x412   :  { %v4128_v55 = vpop.eup %4127  ;;  %v3738_v2 = vor.u32 %v4026_v0, %v3737_v63  ;;  %v3739_v4 = vld [vmem:[%s5980_s2 + $0xb8] sm:$0xf0] }
 0x413   :  { %v1984_v56 = vadd.f32 1.0, %v4128_v55  ;;  %v3754_v55 = vor.u32 %v4030_v53, %v3753_v52  ;;  %v4012_v52 = vld [vmem:[%s5980_s2 + $0x4c] sm:$0xf] }
 0x414   :  { %v4130_v59 = vpop.eup %4129 }
 0x415   :  { %v4132_v60 = vpop.eup %4131  ;;  %v1947_v20 = vmul.f32 %v4130_v59, %v1945_v47  ;;  %4133 = vrcp.f32 %v1984_v56  ;;  %vm1952_vm10 = vweird.f32 %v4130_v59  ;;  %v1996_v26 = vand.u32 2147483648, %v1984_v56  ;;  %v4029_v47 = vld [vmem:[%s5980_s2 + $0xcc] sm:$0xf0]  ;;  %2577 = vmatpush.bf16.msrb.mxu2 %v3754_v55  ;;  %v3665_v55 = vld [vmem:[%s5980_s2 + $0x20] sm:$0xf] }
 0x416   :  { %v1966_v11 = vmul.f32 %v4132_v60, %v1964_v49  ;;  %4135 = vtanh.f32 %v1940_v9  ;;  %vm1971_vm11 = vweird.f32 %v4132_v60  ;;  %vm1953_vm14 = vmor %vm1951_vm12, %vm1952_vm10  ;;  %vm1990_vm4 = vweird.f32 %v1984_v56 }
 0x417   :  { %v1948_v13 = vsub.f32 1.0, %v1947_v20  ;;  %vm1972_vm15 = vmor %vm1970_vm13, %vm1971_vm11  ;;  %v1994_v25 = vand.u32 2147483647, %v1984_v56  ;;  %v1997_v29 = vor.u32 1.1754944e-38, %v1996_v26  ;;  %v3746_v49 = vor.u32 %v4029_v47, %v3745_v42  ;;  %v4025_v20 = vld [vmem:[%s5980_s2 + $0xac] sm:$0xf0] }
 0x418   :  { %v1967_v62 = vsub.f32 1.0, %v1966_v11  ;;  %v4023_v11 = vld [vmem:[%s5980_s2 + $0xa4] sm:$0xf]  ;;  %v3683_v42 = vld [vmem:[%s5980_s2 + $0x50] sm:$0xf0]  ;;  %v3682_v47 = vor.u32 %v4013_v45, %v3681_v44 }
 0x419   :  { %v1949_v1 = vmul.f32 %v4130_v59, %v1948_v13  ;;  %vm1995_vm6 = vcmp.eq.f32.partialorder %v1994_v25, 8.507059e+37  ;;  %2551 = vmatpush.bf16.msrb.mxu0 %v3746_v49  ;;  %2578 = vmatpush.bf16.msrb.mxu2 %v3738_v2  ;;  %v4015_v26 = vld [vmem:[%s5980_s2 + $0x64] sm:$0xf]  ;;  %v3686_v48 = vor.u32 %v4011_v46, %v3683_v42  ;;  %v3689_v49 = vld [vmem:[%s5980_s2 + $0x48] sm:$0xf] }
 0x41a   :  { %v1968_v3 = vmul.f32 %v4132_v60, %v1967_v62  ;;  %v3731_v62 = vld [vmem:[%s5980_s2 + $0xb0] sm:$0xf0]  ;;  %v3690_v53 = vor.u32 %v4014_v14, %v3689_v49 }
 0x41b   :  { %v4134_v5 = vpop.eup %4133  ;;  %v1950_v61 = vadd.f32 %v4130_v59, %v1949_v1  ;;  %v3734_v1 = vor.u32 %v4023_v11, %v3731_v62  ;;  %v4007_v11 = vld [vmem:[%s5980_s2 + $0x24] sm:$0xf]  ;;  %v3673_v62 = vld [vmem:[%s5980_s2 + $0x28] sm:$0xf] }
 0x41c   :  { %v1969_v7 = vadd.f32 %v4132_v60, %v1968_v3  ;;  %v1986_v8 = vmul.f32 %v4134_v5, %v1984_v56  ;;  %v4136_v15 = vpop.eup %4135  ;;  %vm1991_vm3 = vweird.f32 %v4134_v5  ;;  %v4028_v56 = vld [vmem:[%s5980_s2 + $0xcc] sm:$0xf] }
 0x41d   :  { %v1954_v12 = vsel %vm1953_vm14, %v4130_v59, %v1950_v61  ;;  %vm1992_vm5 = vmor %vm1990_vm4, %vm1991_vm3  ;;  %v3755_v59 = vld [vmem:[%s5980_s2 + $0xd8] sm:$0xf0]  ;;  %v4024_v3 = vld [vmem:[%s5980_s2 + $0xac] sm:$0xf] }
 0x41e   :  { %v1959_v16 = vsel %vm1956_vm0, %v1958_v6, %v1954_v12  ;;  %v1973_v18 = vsel %vm1972_vm15, %v4132_v60, %v1969_v7  ;;  %v1987_v19 = vsub.f32 1.0, %v1986_v8  ;;  %v3758_v9 = vor.u32 %v4028_v56, %v3755_v59  ;;  %v3729_v60 = vld [vmem:[%s5980_s2 + $0xa0] sm:$0xf]  ;;  %v4021_v7 = vld [vmem:[%s5980_s2 + $0x8c] sm:$0xf0] }
 0x41f   :  { %v1978_v21 = vsel %vm1975_vm1, %v1977_v10, %v1973_v18  ;;  %v2001_v31 = vmul.f32 %v4136_v15, %v1959_v16  ;;  %v3730_v13 = vor.u32 %v4025_v20, %v3729_v60  ;;  %v3742_v61 = vor.u32 %v4024_v3, %v3739_v4  ;;  %v3713_v6 = vld [vmem:[%s5980_s2 + $0x80] sm:$0xf]  ;;  %v4019_v8 = vld [vmem:[%s5980_s2 + $0x84] sm:$0xf]  ;;  %v3715_v12 = vld [vmem:[%s5980_s2 + $0x90] sm:$0xf0] }
 0x420   :  { %v2000_v23 = vmul.f32 %v1978_v21, %v5520_v50  ;;  %v1988_v38 = vmul.f32 %v4134_v5, %v1987_v19  ;;  %2590 = vmatpush.bf16.msrb.mxu3 %v3758_v9  ;;  %v3714_v10 = vor.u32 %v4021_v7, %v3713_v6  ;;  %v3721_v15 = vld [vmem:[%s5980_s2 + $0x88] sm:$0xf]  ;;  %v4022_v16 = vld [vmem:[%s5980_s2 + $0x94] sm:$0xf0]  ;;  %v3718_v21 = vor.u32 %v4019_v8, %v3715_v12  ;;  %v4009_v56 = vld [vmem:[%s5980_s2 + $0x2c] sm:$0xf0] }
 0x421   :  { %2552 = vmatpush.bf16.msrb.mxu0 %v3730_v13  ;;  %v3666_v20 = vor.u32 %v4009_v56, %v3665_v55  ;;  %v3667_v13 = vld [vmem:[%s5980_s2 + $0x30] sm:$0xf0]  ;;  %v4010_v3 = vld [vmem:[%s5980_s2 + $0x34] sm:$0xf0]  ;;  %v4008_v4 = vld [vmem:[%s5980_s2 + $0x2c] sm:$0xf] }
 0x422   :  { %v2002_v24 = vadd.f32 %v2001_v31, %v2000_v23  ;;  %v1989_v17 = vadd.f32 %v4134_v5, %v1988_v38  ;;  %v3722_v31 = vor.u32 %v4022_v16, %v3721_v15  ;;  %v3723_v23 = vld [vmem:[%s5980_s2 + $0x98] sm:$0xf0]  ;;  %v3670_v2 = vor.u32 %v4007_v11, %v3667_v13  ;;  %v3649_v7 = vld [vmem:[%s5980_s2] sm:$0xf]  ;;  %v4005_v8 = vld [vmem:[%s5980_s2 + $0xc] sm:$0xf0] }
 0x423   :  { %v3726_v38 = vor.u32 %v4020_v22, %v3723_v23  ;;  %v3651_v15 = vld [vmem:[%s5980_s2 + $0x10] sm:$0xf0]  ;;  %v3657_v16 = vld [vmem:[%s5980_s2 + $0x8] sm:$0xf]  ;;  %v4004_v22 = vld [vmem:[%s5980_s2 + $0xc] sm:$0xf] }
 0x424   :  { %4137 = vtanh.f32 %v2002_v24  ;;  %v5734_v27 = vsel %vm2011_vm2, %v2002_v24, %v5520_v50  ;;  %v1993_v28 = vsel %vm1992_vm5, %v4134_v5, %v1989_v17  ;;  %v3511_v5 = vld [vmem:[%s5979_s1 + $0x60] sm:$0xff]  ;;  %2591 = vmatpush.bf16.msrb.mxu3 %v3742_v61  ;;  %2579 = vmatpush.bf16.msrb.mxu2 %v3722_v31  ;;  %v4017_v17 = vld [vmem:[%s5980_s2 + $0x6c] sm:$0xf0]  ;;  %v3674_v61 = vor.u32 %v4010_v3, %v3673_v62  ;;  %v4006_v31 = vld [vmem:[%s5980_s2 + $0x14] sm:$0xf0] }
 0x425   :  { %v1998_v32 = vsel %vm1995_vm6, %v1997_v29, %v1993_v28  ;;  %v2021_v18 = vunpack.c.l.bf16 %v3511_v5  ;;  %v2022_v19 = vunpack.c.h.bf16 %v3511_v5  ;;  %2553 = vmatpush.bf16.msrb.mxu0 %v3714_v10  ;;  %v3697_v24 = vld [vmem:[%s5980_s2 + $0x60] sm:$0xf]  ;;  %v3675_v5 = vld [vmem:[%s5980_s2 + $0x38] sm:$0xf0]  ;;  %v4003_v10 = vld [vmem:[%s5980_s2 + $0x4] sm:$0xf] }
 0x426   :  { %v3698_v29 = vor.u32 %v4017_v17, %v3697_v24  ;;  %v3678_v6 = vor.u32 %v4008_v4, %v3675_v5  ;;  %v3659_v23 = vld [vmem:[%s5980_s2 + $0x18] sm:$0xf0]  ;;  %v3658_v17 = vor.u32 %v4006_v31, %v3657_v16 }
 0x428   :  { %2592 = vmatpush.bf16.msrb.mxu3 %v3726_v38 }
 0x429   :  { %2554 = vmatpush.bf16.msrb.mxu0 %v3698_v29 }
 0x42a   :  { %v4138_v30 = vpop.eup %4137 }
 0x42b   :  { %v2004_v33 = vmul.f32 %v4138_v30, %v1998_v32  ;;  %v3699_v30 = vld [vmem:[%s5980_s2 + $0x70] sm:$0xf0]  ;;  %v3705_v32 = vld [vmem:[%s5980_s2 + $0x68] sm:$0xf] }
 0x42c   :  { %v3702_v37 = vor.u32 %v4015_v26, %v3699_v30  ;;  %v2023_v30 = vunpack.c.l.bf16 %v5863_v36 }
 0x42d   :  { %v5738_v34 = vsel %vm2011_vm2, %v2004_v33, %v5524_v57  ;;  %v2014_v35 = vsel %vm2011_vm2, %v2004_v33, 0.0  ;;  %v4031_v57 = vld [vmem:[%s5980_s2 + $0xe4] sm:$0xf]  ;;  %v4018_v33 = vld [vmem:[%s5980_s2 + $0x74] sm:$0xf0]  ;;  %2555 = vmatpush.bf16.msrb.mxu0 %v3682_v47 }
 0x42e   :  { %2016 = vst [vmem:[#allocation2 + $0x28] sm:$0xff] %v2014_v35  ;;  %v2025_v50 = vpack.c.bf16 %v5738_v34, %v5738_v34  ;;  %v3766_v43 = vor.u32 %v4031_v57, %v3763_v51  ;;  %v3706_v57 = vor.u32 %v4018_v33, %v3705_v32  ;;  %v3707_v51 = vld [vmem:[%s5980_s2 + $0x78] sm:$0xf0] }
 0x42f   :  { %v3710_v40 = vor.u32 %v4016_v39, %v3707_v51 }
 0x430   :  { %2226 = vmatmul.bf16.vlgmr.msra.gmra.mxu0 %v2025_v50  ;;  %2239 = vmatmul.bf16.vlgmr.msra.gmra.mxu1 %v2025_v50 }
 0x431   :  { %2252 = vmatmul.bf16.vlgmr.msra.gmra.mxu2 %v2025_v50  ;;  %2265 = vmatmul.bf16.vlgmr.msra.gmra.mxu3 %v2025_v50 }
 0x432   :  { %2563 = vmatpush.bf16.msrb.mxu1 %v3766_v43  ;;  %2580 = vmatpush.bf16.msrb.mxu2 %v3706_v57 }
 0x433   :  { %2593 = vmatpush.bf16.msrb.mxu3 %v3710_v40  ;;  %2556 = vmatpush.bf16.msrb.mxu0 %v3666_v20 }
 0x436   :  { %2564 = vmatpush.bf16.msrb.mxu1 %v3750_v54  ;;  %v3691_v54 = vld [vmem:[%s5980_s2 + $0x58] sm:$0xf0]  ;;  %2581 = vmatpush.bf16.msrb.mxu2 %v3690_v53 }
 0x437   :  { %v3694_v60 = vor.u32 %v4012_v52, %v3691_v54 }
 0x439   :  { %2594 = vmatpush.bf16.msrb.mxu3 %v3694_v60  ;;  %v2342_v60 = vpop.permute.xlu0 %2341 }
 0x43a   :  { %2565 = vmatpush.bf16.msrb.mxu1 %v3734_v1  ;;  %2582 = vmatpush.bf16.msrb.mxu2 %v3674_v61  ;;  %vm2343_vm15 = vcmp.eq.s32.totalorder %v2342_v60, 1 }
 0x43d   :  { %2595 = vmatpush.bf16.msrb.mxu3 %v3678_v6 }
 0x43e   :  { %2566 = vmatpush.bf16.msrb.mxu1 %v3718_v21  ;;  %v3654_v21 = vor.u32 %v4003_v10, %v3651_v15  ;;  %2583 = vmatpush.bf16.msrb.mxu2 %v3658_v17 }
 0x442   :  { %2567 = vmatpush.bf16.msrb.mxu1 %v3702_v37 }
 0x446   :  { %2568 = vmatpush.bf16.msrb.mxu1 %v3686_v48 }
 0x44a   :  { %2569 = vmatpush.bf16.msrb.mxu1 %v3670_v2 }
 0x44e   :  { %2570 = vmatpush.bf16.msrb.mxu1 %v3654_v21 }
 0x4ad   :  { %v2227_v25 = vpop.f32.mrf.mxu0  ;;  %v2240_v28 = vpop.f32.mrf.mxu1 }
 0x4ae   :  { %v2270_v35 = vadd.f32 %v2227_v25, %v2021_v18  ;;  %v2271_v50 = vadd.f32 %v2240_v28, %v2022_v19  ;;  %v3650_v19 = vor.u32 %v4005_v8, %v3649_v7  ;;  %v3662_v25 = vor.u32 %v4004_v22, %v3659_v23  ;;  %v3645_v8 = vld [vmem:[%s5979_s1 + $0x70] sm:$0xff] }
 0x4af   :  { %v2353_v10 = vunpack.c.l.bf16 %v3645_v8 }
 0x4b0   :  { %v3641_v58 = vmul.f32 -1.442695, %v2270_v35  ;;  %v3642_v43 = vmul.f32 -1.442695, %v2271_v50  ;;  %2557 = vmatpush.bf16.msrb.mxu0 %v3650_v19  ;;  %2596 = vmatpush.bf16.msrb.mxu3 %v3662_v25  ;;  %v3646_v19 = vld [vmem:[%s5979_s1 + $0x78] sm:$0xff] }
 0x4b1   :  { %v2356_v22 = vunpack.c.h.bf16 %v3646_v19 }
 0x4b2   :  { %4139 = vpow2.f32 %v3641_v58 }
 0x4b3   :  { %4141 = vpow2.f32 %v3642_v43 }
 0x4b4   :  { %v2253_v59 = vpop.f32.mrf.mxu2  ;;  %v2266_v9 = vpop.f32.mrf.mxu3 }
 0x4b5   :  { %v2273_v63 = vadd.f32 %v2266_v9, %v2024_v41  ;;  %v2229_v0 = vpop.f32.mrf.mxu0  ;;  %v2242_v1 = vpop.f32.mrf.mxu1  ;;  %v2272_v50 = vadd.f32 %v2253_v59, %v2023_v30 }
 0x4b7   :  { %v3643_v12 = vmul.f32 -1.442695, %v2273_v63 }
 0x4b8   :  { %v4140_v18 = vpop.eup %4139 }
 0x4b9   :  { %v4142_v38 = vpop.eup %4141  ;;  %v2277_v24 = vadd.f32 1.0, %v4140_v18  ;;  %4143 = vpow2.f32 %v3643_v12  ;;  %v2354_v12 = vunpack.c.h.bf16 %v3645_v8 }
 0x4ba   :  { %v2296_v26 = vadd.f32 1.0, %v4142_v38 }
 0x4bb   :  { %4145 = vrcp.f32 %v2277_v24  ;;  %v2289_v58 = vand.u32 2147483648, %v2277_v24  ;;  %v2287_v41 = vand.u32 2147483647, %v2277_v24  ;;  %vm2283_vm9 = vweird.f32 %v2277_v24 }
 0x4bc   :  { %4147 = vrcp.f32 %v2296_v26  ;;  %v2255_v28 = vpop.f32.mrf.mxu2  ;;  %v2268_v29 = vpop.f32.mrf.mxu3  ;;  %v2308_v43 = vand.u32 2147483648, %v2296_v26  ;;  %v2306_v36 = vand.u32 2147483647, %v2296_v26  ;;  %vm2302_vm10 = vweird.f32 %v2296_v26 }
 0x4bd   :  { %v2290_v47 = vor.u32 1.1754944e-38, %v2289_v58  ;;  %vm2288_vm13 = vcmp.eq.f32.partialorder %v2287_v41, 8.507059e+37 }
 0x4be   :  { %v2309_v14 = vor.u32 1.1754944e-38, %v2308_v43  ;;  %vm2307_vm14 = vcmp.eq.f32.partialorder %v2306_v36, 8.507059e+37 }
 0x4bf   :  { %v4144_v32 = vpop.eup %4143 }
 0x4c0   :  { %v2316_v33 = vadd.f32 1.0, %v4144_v32 }
 0x4c1   :  { %v4146_v35 = vpop.eup %4145 }
 0x4c2   :  { %v4148_v37 = vpop.eup %4147  ;;  %v2279_v57 = vmul.f32 %v4146_v35, %v2277_v24  ;;  %4149 = vrcp.f32 %v2316_v33  ;;  %vm2284_vm7 = vweird.f32 %v4146_v35  ;;  %v2328_v63 = vand.u32 2147483648, %v2316_v33 }
 0x4c3   :  { %v2298_v39 = vmul.f32 %v4148_v37, %v2296_v26  ;;  %4151 = vtanh.f32 %v2272_v50  ;;  %vm2303_vm8 = vweird.f32 %v4148_v37  ;;  %vm2285_vm11 = vmor %vm2283_vm9, %vm2284_vm7  ;;  %vm2322_vm1 = vweird.f32 %v2316_v33 }
 0x4c4   :  { %v2280_v51 = vsub.f32 1.0, %v2279_v57  ;;  %vm2304_vm12 = vmor %vm2302_vm10, %vm2303_vm8  ;;  %v2326_v1 = vand.u32 2147483647, %v2316_v33  ;;  %v2329_v3 = vor.u32 1.1754944e-38, %v2328_v63  ;;  %v2355_v50 = vunpack.c.l.bf16 %v3646_v19 }
 0x4c5   :  { %v2299_v40 = vsub.f32 1.0, %v2298_v39 }
 0x4c6   :  { %v2281_v44 = vmul.f32 %v4146_v35, %v2280_v51  ;;  %vm2327_vm3 = vcmp.eq.f32.partialorder %v2326_v1, 8.507059e+37 }
 0x4c7   :  { %v2300_v45 = vmul.f32 %v4148_v37, %v2299_v40 }
 0x4c8   :  { %v4150_v46 = vpop.eup %4149  ;;  %v2282_v42 = vadd.f32 %v4146_v35, %v2281_v44 }
 0x4c9   :  { %v2301_v48 = vadd.f32 %v4148_v37, %v2300_v45  ;;  %v2318_v49 = vmul.f32 %v4150_v46, %v2316_v33  ;;  %v4152_v53 = vpop.eup %4151  ;;  %vm2323_vm0 = vweird.f32 %v4150_v46 }
 0x4ca   :  { %v2286_v52 = vsel %vm2285_vm11, %v4146_v35, %v2282_v42  ;;  %vm2324_vm2 = vmor %vm2322_vm1, %vm2323_vm0 }
 0x4cb   :  { %v2291_v54 = vsel %vm2288_vm13, %v2290_v47, %v2286_v52  ;;  %v2305_v55 = vsel %vm2304_vm12, %v4148_v37, %v2301_v48  ;;  %v2319_v56 = vsub.f32 1.0, %v2318_v49 }
 0x4cc   :  { %v2310_v59 = vsel %vm2307_vm14, %v2309_v14, %v2305_v55  ;;  %v2333_v9 = vmul.f32 %v4152_v53, %v2291_v54 }
 0x4cd   :  { %v2332_v20 = vmul.f32 %v2310_v59, %v5734_v27  ;;  %v2320_v11 = vmul.f32 %v4150_v46, %v2319_v56 }
 0x4cf   :  { %v2334_v13 = vadd.f32 %v2333_v9, %v2332_v20  ;;  %v2321_v62 = vadd.f32 %v4150_v46, %v2320_v11 }
 0x4d1   :  { %4153 = vtanh.f32 %v2334_v13  ;;  %v5948_v0 = vsel %vm2343_vm15, %v2334_v13, %v5734_v27  ;;  %v2325_v2 = vsel %vm2324_vm2, %v4150_v46, %v2321_v62  ;;  %v2674_v62 = vpop.permute.xlu1 %2673 }
 0x4d2   :  { %v2330_v5 = vsel %vm2327_vm3, %v2329_v3, %v2325_v2  ;;  %vm2675_vm12 = vcmp.eq.s32.totalorder %v2674_v62, 1 }
 0x4d7   :  { %v4154_v4 = vpop.eup %4153 }
 0x4d8   :  { %v2336_v61 = vmul.f32 %v4154_v4, %v2330_v5 }
 0x4da   :  { %v5952_v6 = vsel %vm2343_vm15, %v2336_v61, %v5738_v34  ;;  %v2346_v7 = vsel %vm2343_vm15, %v2336_v61, 0.0 }
 0x4db   :  { %2348 = vst [vmem:[#allocation2 + $0x30] sm:$0xff] %v2346_v7  ;;  %v2357_v27 = vpack.c.bf16 %v5952_v6, %v5952_v6 }
 0x4dd   :  { %2558 = vmatmul.bf16.vlgmr.msrb.gmra.mxu0 %v2357_v27  ;;  %2571 = vmatmul.bf16.vlgmr.msrb.gmra.mxu1 %v2357_v27 }
 0x4de   :  { %2584 = vmatmul.bf16.vlgmr.msrb.gmra.mxu2 %v2357_v27  ;;  %2597 = vmatmul.bf16.vlgmr.msrb.gmra.mxu3 %v2357_v27 }
 0x55a   :  { %v2559_v15 = vpop.f32.mrf.mxu0  ;;  %v2572_v16 = vpop.f32.mrf.mxu1 }
 0x55b   :  { %v2602_v34 = vadd.f32 %v2559_v15, %v2353_v10  ;;  %v2603_v18 = vadd.f32 %v2572_v16, %v2354_v12 }
 0x55d   :  { %v3775_v21 = vmul.f32 -1.442695, %v2602_v34  ;;  %v3776_v31 = vmul.f32 -1.442695, %v2603_v18 }
 0x55f   :  { %4155 = vpow2.f32 %v3775_v21 }
 0x560   :  { %4157 = vpow2.f32 %v3776_v31 }
 0x561   :  { %v2585_v23 = vpop.f32.mrf.mxu2  ;;  %v2598_v38 = vpop.f32.mrf.mxu3 }
 0x562   :  { %v2605_v24 = vadd.f32 %v2598_v38, %v2356_v22  ;;  %v2561_v17 = vpop.f32.mrf.mxu0  ;;  %v2574_v26 = vpop.f32.mrf.mxu1  ;;  %v2604_v51 = vadd.f32 %v2585_v23, %v2355_v50 }
 0x564   :  { %v3777_v25 = vmul.f32 -1.442695, %v2605_v24 }
 0x565   :  { %v4156_v28 = vpop.eup %4155 }
 0x566   :  { %v4158_v29 = vpop.eup %4157  ;;  %v2609_v30 = vadd.f32 1.0, %v4156_v28  ;;  %4159 = vpow2.f32 %v3777_v25 }
 0x567   :  { %v2628_v32 = vadd.f32 1.0, %v4158_v29 }
 0x568   :  { %4161 = vrcp.f32 %v2609_v30  ;;  %v2621_v45 = vand.u32 2147483648, %v2609_v30  ;;  %v2619_v42 = vand.u32 2147483647, %v2609_v30  ;;  %vm2615_vm6 = vweird.f32 %v2609_v30 }
 0x569   :  { %4163 = vrcp.f32 %v2628_v32  ;;  %v2587_v33 = vpop.f32.mrf.mxu2  ;;  %v2600_v35 = vpop.f32.mrf.mxu3  ;;  %v2640_v36 = vand.u32 2147483648, %v2628_v32  ;;  %v2638_v48 = vand.u32 2147483647, %v2628_v32  ;;  %vm2634_vm7 = vweird.f32 %v2628_v32 }
 0x56a   :  { %v2622_v52 = vor.u32 1.1754944e-38, %v2621_v45  ;;  %vm2620_vm10 = vcmp.eq.f32.partialorder %v2619_v42, 8.507059e+37 }
 0x56b   :  { %v2641_v55 = vor.u32 1.1754944e-38, %v2640_v36  ;;  %vm2639_vm11 = vcmp.eq.f32.partialorder %v2638_v48, 8.507059e+37 }
 0x56c   :  { %v4160_v37 = vpop.eup %4159 }
 0x56d   :  { %v2648_v57 = vadd.f32 1.0, %v4160_v37 }
 0x56e   :  { %v4162_v39 = vpop.eup %4161 }
 0x56f   :  { %v4164_v40 = vpop.eup %4163  ;;  %v2611_v58 = vmul.f32 %v4162_v39, %v2609_v30  ;;  %4165 = vrcp.f32 %v2648_v57  ;;  %vm2616_vm4 = vweird.f32 %v4162_v39  ;;  %v2660_v5 = vand.u32 2147483648, %v2648_v57 }
 0x570   :  { %v2630_v43 = vmul.f32 %v4164_v40, %v2628_v32  ;;  %4167 = vtanh.f32 %v2604_v51  ;;  %vm2635_vm5 = vweird.f32 %v4164_v40  ;;  %vm2617_vm8 = vmor %vm2615_vm6, %vm2616_vm4  ;;  %vm2654_vm14 = vweird.f32 %v2648_v57 }
 0x571   :  { %v2612_v44 = vsub.f32 1.0, %v2611_v58  ;;  %vm2636_vm9 = vmor %vm2634_vm7, %vm2635_vm5  ;;  %v2658_v61 = vand.u32 2147483647, %v2648_v57  ;;  %v2661_v27 = vor.u32 1.1754944e-38, %v2660_v5 }
 0x572   :  { %v2631_v41 = vsub.f32 1.0, %v2630_v43 }
 0x573   :  { %v2613_v46 = vmul.f32 %v4162_v39, %v2612_v44  ;;  %vm2659_vm0 = vcmp.eq.f32.partialorder %v2658_v61, 8.507059e+37 }
 0x574   :  { %v2632_v47 = vmul.f32 %v4164_v40, %v2631_v41 }
 0x575   :  { %v4166_v49 = vpop.eup %4165  ;;  %v2614_v14 = vadd.f32 %v4162_v39, %v2613_v46 }
 0x576   :  { %v2633_v53 = vadd.f32 %v4164_v40, %v2632_v47  ;;  %v2650_v54 = vmul.f32 %v4166_v49, %v2648_v57  ;;  %v4168_v59 = vpop.eup %4167  ;;  %vm2655_vm13 = vweird.f32 %v4166_v49 }
 0x577   :  { %v2618_v56 = vsel %vm2617_vm8, %v4162_v39, %v2614_v14  ;;  %vm2656_vm15 = vmor %vm2654_vm14, %vm2655_vm13 }
 0x578   :  { %v2623_v9 = vsel %vm2620_vm10, %v2622_v52, %v2618_v56  ;;  %v2637_v60 = vsel %vm2636_vm9, %v4164_v40, %v2633_v53  ;;  %v2651_v20 = vsub.f32 1.0, %v2650_v54 }
 0x579   :  { %v2642_v11 = vsel %vm2639_vm11, %v2641_v55, %v2637_v60  ;;  %v2665_v13 = vmul.f32 %v4168_v59, %v2623_v9 }
 0x57a   :  { %v2664_v63 = vmul.f32 %v2642_v11, %v5948_v0  ;;  %v2652_v1 = vmul.f32 %v4166_v49, %v2651_v20 }
 0x57c   :  { %v2666_v2 = vadd.f32 %v2665_v13, %v2664_v63  ;;  %v2653_v3 = vadd.f32 %v4166_v49, %v2652_v1 }
 0x57e   :  { %4169 = vtanh.f32 %v2666_v2  ;;  %v2677_v4 = vsel %vm2675_vm12, %v2666_v2, %v5948_v0  ;;  %v2657_v7 = vsel %vm2656_vm15, %v4166_v49, %v2653_v3 }
 0x57f   :  { %2682 = vst [vmem:[%s5983_s5] sm:$0xff] %v2677_v4  ;;  %v2662_v10 = vsel %vm2659_vm0, %v2661_v27, %v2657_v7 }
 0x584   :  { %v4170_v8 = vpop.eup %4169 }
 0x585   :  { %v2668_v0 = vmul.f32 %v4170_v8, %v2662_v10 }
 0x587   :  { %v2676_v12 = vsel %vm2675_vm12, %v2668_v0, %v5952_v6  ;;  %v2678_v15 = vsel %vm2675_vm12, %v2668_v0, 0.0 }
 0x588   :  { %2680 = vst [vmem:[#allocation2 + $0x38] sm:$0xff] %v2678_v15 }
 0x589   :  { %2681 = vst [vmem:[%s5982_s4] sm:$0xff] %v2676_v12 }
 0x58a   :  { %2695 = dma.vmem_to_hbm [thread:$0]  %s2688_s13, 1024, %s2690_s16, [#allocation3], %s4213_s18, %s4213_s18, %s4214_s19  }
 0x58b   :  { %4208 = dma.done.wait [#allocation3], 1024  }
 0x58c   :  { %4209 = vsyncadd [#allocation3], 4294966272 }
 0x58d   :  { %2708 = vsyncpa [#allocation3], 1 }

</bundles_post_ra>
